<compile_context>
chip_gen: v7x
topology: tpu7x:2x2x1
jax: 0.10.0
libtpu: 0.0.40
codegen_flags: <defaults>
</compile_context>

<pallas_src>
import numpy as np
import jax
import jax.numpy as jnp
from jax.experimental import pallas as pl
from jax.experimental.pallas import tpu as pltpu

LANES = 128   # final logits padded to one full lane tile


# ----------------------------- fused Pallas kernel ---------------------------

def _make_convnet_kernel(gs):
    """Builds the fused kernel; `gs` = conv4 ('global') kernel height."""

    def convnet_kernel(x_ref, w1_ref, b1_ref, w2_ref, b2_ref, p2_ref,
                       w3_ref, b3_ref, p3_ref, w4_ref, b4_ref, s4_ref,
                       wl1_ref, bl1_ref, wl2_ref, bl2_ref,
                       o_ref, a1_ref, a2_ref, a3_ref):
        bf16 = jnp.bfloat16

        def mm(a, b):
            return jnp.dot(a, b, preferred_element_type=jnp.float32)

        def hswish(v):
            return v * jnp.clip(v + 3.0, 0.0, 6.0) * (1.0 / 6.0)

        def im2col(src_ref, k, m):
            # Lane-concat of k row-shifted views -> (m, k*src_lanes) bf16.
            cols = [src_ref[di:di + m, :] for di in range(k)]
            return jnp.concatenate(cols, axis=-1).astype(bf16)

        # conv1 (3x3, Cin->32) + ReLU            (rows = B_TILE stacked images)
        m1 = a1_ref.shape[0]
        y = mm(im2col(x_ref, 3, m1), w1_ref[...])
        a1_ref[...] = jnp.maximum(y + b1_ref[...], 0.0)

        # conv2 (3x3, 32->32) + AvgPool2d(2) + ReLU
        # Width pool is folded into w2; height pool is the bf16 even/odd 0.5
        # matrix p2 (exact in bf16).  pool(conv)+b == pool(conv+b) only because
        # the bias is spatially uniform.
        m2 = p2_ref.shape[1]
        y = mm(im2col(a1_ref, 3, m2), w2_ref[...])
        y = mm(p2_ref[...], y.astype(bf16))
        a2_ref[...] = jnp.maximum(y + b2_ref[...], 0.0)

        # conv3 (3x3, 32->48) + AvgPool2d(2) + ReLU
        m3 = p3_ref.shape[1]
        y = mm(im2col(a2_ref, 3, m3), w3_ref[...])
        y = mm(p3_ref[...], y.astype(bf16))
        a3_ref[...] = jnp.maximum(y + b3_ref[...], 0.0)

        # conv4 (global gs x gs, 48->mid) + Hardswish, batched over the tile:
        # one merged-conv matmul over all stacked rows, then a tiny 0/1
        # selection matmul gathers the single valid row per image -> (B, mid).
        m4 = s4_ref.shape[1]
        y = mm(im2col(a3_ref, gs, m4), w4_ref[...])
        f = hswish(mm(s4_ref[...], y.astype(bf16)) + b4_ref[...])

        # Linear(mid, mid) + Hardswish
        f = hswish(mm(f.astype(bf16), wl1_ref[...]) + bl1_ref[...])
        # TODO(synk): nn.Dropout with per-forward random p ~ U(0.125, 0.375) is
        # identity at inference; implemented as identity here.
        # Linear(mid, 10), zero-padded to 128 lanes -> dense (B_TILE,128) store.
        o_ref[...] = mm(f.astype(bf16), wl2_ref[...]) + bl2_ref[...]

    return convnet_kernel


# ------------------------- weight preparation (wrapper) ----------------------

def _merged_conv_weight(w, width, pool_width):
    """w: (k, k, Cin, Cout) HWIO -> (k*width*Cin, Wout*Cout) merged banded weight.

    M[di*width*Cin + wi*Cin + ci, ow*Cout + co] = w[di, wi-ow, ci, co]
    (0 <= wi-ow < k).  With pool_width=True, adjacent output-width pairs are
    pre-averaged (the width half of AvgPool2d(2) folded into the weight).
    """
    k, _, cin, cout = w.shape
    wo = width - k + 1
    sel = np.zeros((k, width, wo), np.float32)
    for dj in range(k):
        sel[dj, np.arange(wo) + dj, np.arange(wo)] = 1.0
    banded = jnp.einsum('xyio,ywv->xwivo', w.astype(jnp.float32), jnp.asarray(sel))
    if pool_width:
        banded = banded.reshape(k, width, cin, wo // 2, 2, cout).mean(axis=4)
        wo //= 2
    return banded.reshape(k * width * cin, wo * cout)


def _even_odd_pool(rows_out, rows_in):
    """0.5 * (row 2j + row 2j+1) over the stacked rows (height pool)."""
    p = np.zeros((rows_out, rows_in), np.float32)
    j = np.arange(rows_out)
    p[j, 2 * j] = 0.5
    p[j, 2 * j + 1] = 0.5
    return jnp.asarray(p)


def _row_select(b_tile, stride, rows_in):
    """0/1 matrix picking row b*stride for each image b in the tile."""
    s = np.zeros((b_tile, rows_in), np.float32)
    s[np.arange(b_tile), np.arange(b_tile) * stride] = 1.0
    return jnp.asarray(s)


# ------------------------------ ConvNet model --------------------------------

def init_convnet_params(key, mid_dim=32, img_shape=(16, 16, 3)):
    assert img_shape[0] == img_shape[1]
    img = img_shape[0]
    gs = int(((img - 2 - 2) / 2 - 2) / 2)   # "global_size" from the PyTorch module
    cin = img_shape[2]
    ks = jax.random.split(key, 12)

    def conv_w(k, kh, kw, ci, co):
        fan_in = kh * kw * ci
        return jax.random.normal(k, (kh, kw, ci, co), jnp.float32) / np.sqrt(fan_in)

    def bias(k, co):
        return 0.01 * jax.random.normal(k, (1, co), jnp.float32)

    return dict(
        w1=conv_w(ks[0], 3, 3, cin, 32), b1=bias(ks[1], 32),
        w2=conv_w(ks[2], 3, 3, 32, 32), b2=bias(ks[3], 32),
        w3=conv_w(ks[4], 3, 3, 32, 48), b3=bias(ks[5], 48),
        w4=conv_w(ks[6], gs, gs, 48, mid_dim), b4=bias(ks[7], mid_dim),
        wl1=jax.random.normal(ks[8], (mid_dim, mid_dim), jnp.float32) / np.sqrt(mid_dim),
        bl1=bias(ks[9], mid_dim),
        wl2=jax.random.normal(ks[10], (mid_dim, 10), jnp.float32) / np.sqrt(mid_dim),
        bl2=bias(ks[11], 10),
        gs=gs, mid_dim=mid_dim,
    )


def convnet_forward(x_nchw, params, b_tile=8):
    n, cin, h, w = x_nchw.shape
    mid = params["mid_dim"]
    gs = params["gs"]
    out_dim = params["wl2"].shape[1]
    c1 = params["w1"].shape[3]
    c2 = params["w2"].shape[3]
    c3 = params["w3"].shape[3]

    # Layer geometry (VALID convs; AvgPool2d(2) after conv2 / conv3).
    h1, w1 = h - 2, w - 2                        # after conv1
    h2, w2 = (h1 - 2) // 2, (w1 - 2) // 2        # after conv2 + pool
    h3, w3 = (h2 - 2) // 2, (w2 - 2) // 2        # after conv3 + pool
    assert (h1 - 2) % 2 == 0 and (h2 - 2) % 2 == 0
    assert h3 == gs and w3 == gs
    # Stacked-batch layout needs the per-image row strides (h, h//2) even.
    assert h % 4 == 0

    # Pad batch to a multiple of b_tile; per-image 2-D layout stacked as
    # rows = (image, height), lanes = width*channels.
    B = b_tile
    n_tiles = -(-n // B)
    n_pad = n_tiles * B
    x = jnp.transpose(x_nchw, (0, 2, 3, 1)).astype(jnp.float32)   # NHWC
    if n_pad != n:
        x = jnp.concatenate(
            [x, jnp.zeros((n_pad - n, h, w, cin), jnp.float32)], axis=0)
    x2 = x.reshape(n_pad * h, w * cin)

    # Stacked (per-tile) row counts; per-image row strides: h -> h//2 -> h//4.
    m1 = B * h - 2                 # conv1 output rows (= a1 rows)
    m2 = B * h - 4                 # conv2 output rows
    r2 = B * (h // 2) - 2          # rows after conv2 height-pool (= a2 rows)
    m3 = r2 - 2                    # conv3 output rows
    r3 = B * (h // 4) - 2          # rows after conv3 height-pool (= a3 rows)
    m4 = r3 - (gs - 1)             # conv4 output rows (one valid per image)

    bf16 = jnp.bfloat16
    w1m = _merged_conv_weight(params["w1"], w, pool_width=False).astype(bf16)
    w2m = _merged_conv_weight(params["w2"], w1, pool_width=True).astype(bf16)
    w3m = _merged_conv_weight(params["w3"], w2, pool_width=True).astype(bf16)
    w4m = _merged_conv_weight(params["w4"], w3, pool_width=False).astype(bf16)
    p2h = _even_odd_pool(r2, m2).astype(bf16)
    p3h = _even_odd_pool(r3, m3).astype(bf16)
    s4 = _row_select(B, h // 4, m4).astype(bf16)

    b1r = jnp.tile(params["b1"], (1, w1))        # bias broadcast over width groups
    b2r = jnp.tile(params["b2"], (1, w2))
    b3r = jnp.tile(params["b3"], (1, w3))
    b4r = params["b4"]
    wl1b = params["wl1"].astype(bf16)
    bl1 = params["bl1"]
    wl2p = jnp.zeros((mid, LANES), jnp.float32).at[:, :out_dim].set(
        params["wl2"]).astype(bf16)
    bl2p = jnp.zeros((1, LANES), jnp.float32).at[:, :out_dim].set(params["bl2"])

    operands = (x2, w1m, b1r, w2m, b2r, p2h, w3m, b3r, p3h, w4m, b4r, s4,
                wl1b, bl1, wl2p, bl2p)

    def const_spec(a):
        zeros = (0,) * a.ndim
        return pl.BlockSpec(a.shape, lambda i, _z=zeros: _z)

    in_specs = [pl.BlockSpec((B * h, w * cin), lambda i: (i, 0))]
    in_specs += [const_spec(a) for a in operands[1:]]

    # Advisory cost estimate for the XLA scheduler.
    def dot_flops(m, k, nc):
        return 2 * m * k * nc

    per_tile = (dot_flops(m1, w1m.shape[0], w1m.shape[1])
                + dot_flops(m2, w2m.shape[0], w2m.shape[1])
                + dot_flops(r2, m2, w2m.shape[1])
                + dot_flops(m3, w3m.shape[0], w3m.shape[1])
                + dot_flops(r3, m3, w3m.shape[1])
                + dot_flops(m4, w4m.shape[0], w4m.shape[1])
                + dot_flops(B, m4, mid)
                + dot_flops(B, mid, mid)
                + dot_flops(B, mid, LANES))
    bytes_accessed = (sum(int(a.size) * a.dtype.itemsize for a in operands)
                      + n_pad * LANES * 4)
    cost = pl.CostEstimate(flops=n_tiles * per_tile, transcendentals=0,
                           bytes_accessed=int(bytes_accessed))

    out = pl.pallas_call(
        _make_convnet_kernel(gs),
        grid=(n_tiles,),
        in_specs=in_specs,
        out_specs=pl.BlockSpec((B, LANES), lambda i: (i, 0)),
        out_shape=jax.ShapeDtypeStruct((n_pad, LANES), jnp.float32),
        scratch_shapes=[
            pltpu.VMEM((m1, w1 * c1), jnp.float32),   # conv1 + ReLU
            pltpu.VMEM((r2, w2 * c2), jnp.float32),   # conv2 + pool + ReLU
            pltpu.VMEM((r3, w3 * c3), jnp.float32),   # conv3 + pool + ReLU
        ],
        compiler_params=pltpu.CompilerParams(
            dimension_semantics=("parallel",),
            vmem_limit_bytes=32 * 1024 * 1024),
        cost_estimate=cost,
    )(*operands)

    return out[:n, :out_dim]


# ------------------------------ pure-JAX reference ---------------------------

def reference_forward(x_nchw, params):
    x = jnp.transpose(x_nchw, (0, 2, 3, 1)).astype(jnp.float32)

    def conv(x, w, b):
        y = jax.lax.conv_general_dilated(
            x, w, (1, 1), "VALID", dimension_numbers=("NHWC", "HWIO", "NHWC"))
        return y + b.reshape(1, 1, 1, -1)

    def pool(x):
        nn_, hh, ww, cc = x.shape
        return x.reshape(nn_, hh // 2, 2, ww // 2, 2, cc).mean(axis=(2, 4))

    def hsw(v):
        return v * jnp.clip(v + 3.0, 0.0, 6.0) / 6.0

    y = jax.nn.relu(conv(x, params["w1"], params["b1"]))
    y = jax.nn.relu(pool(conv(y, params["w2"], params["b2"])))
    y = jax.nn.relu(pool(conv(y, params["w3"], params["b3"])))
    y = hsw(conv(y, params["w4"], params["b4"]))
    y = y.reshape(-1, params["mid_dim"])
    y = hsw(y @ params["wl1"] + params["bl1"])
    y = y @ params["wl2"] + params["bl2"]
    return y


# ----------------------------------- main -------------------------------------

if __name__ == "__main__":
    key = jax.random.PRNGKey(0)
    pkey, xkey = jax.random.split(key)

    # img_shape=(16,16,3), mid_dim=32 -> global_size = 2.
    # batch = 16 with b_tile = 8 -> grid of 2 parallel tiles (keeps both v7x TCs busy).
    params = init_convnet_params(pkey, mid_dim=32, img_shape=(16, 16, 3))
    x = jax.random.normal(xkey, (16, 3, 16, 16), jnp.float32)  # NCHW, like PyTorch

    out = jax.block_until_ready(convnet_forward(x, params, b_tile=8))
    ref = jax.block_until_ready(reference_forward(x, params))

    assert out.shape == (16, 10), out.shape
    # Kernel uses bf16 MXU operands with f32 accumulation; reference is all-f32,
    # so allow a slightly looser (but still bug-detecting) tolerance.
    if not np.allclose(np.asarray(out), np.asarray(ref), atol=2e-2, rtol=5e-2):
        err = float(np.max(np.abs(np.asarray(out) - np.asarray(ref))))
        raise AssertionError(
            f"Pallas ConvNet output mismatch vs JAX reference (max abs err {err:.3e})")

    print("KERNEL_OK")
</pallas_src>

<mosaic_0001>
module attributes {stable_mosaic.version = 11 : i64} {
  func.func @convnet_kernel(%arg0: i32, %arg1: memref<128x48xf32, #tpu.memory_space<vmem>>, %arg2: memref<144x448xbf16, #tpu.memory_space<vmem>>, %arg3: memref<1x448xf32, #tpu.memory_space<vmem>>, %arg4: memref<1344x192xbf16, #tpu.memory_space<vmem>>, %arg5: memref<1x192xf32, #tpu.memory_space<vmem>>, %arg6: memref<62x124xbf16, #tpu.memory_space<vmem>>, %arg7: memref<576x96xbf16, #tpu.memory_space<vmem>>, %arg8: memref<1x96xf32, #tpu.memory_space<vmem>>, %arg9: memref<30x60xbf16, #tpu.memory_space<vmem>>, %arg10: memref<192x32xbf16, #tpu.memory_space<vmem>>, %arg11: memref<1x32xf32, #tpu.memory_space<vmem>>, %arg12: memref<8x29xbf16, #tpu.memory_space<vmem>>, %arg13: memref<32x32xbf16, #tpu.memory_space<vmem>>, %arg14: memref<1x32xf32, #tpu.memory_space<vmem>>, %arg15: memref<32x128xbf16, #tpu.memory_space<vmem>>, %arg16: memref<1x128xf32, #tpu.memory_space<vmem>>, %arg17: memref<8x128xf32, #tpu.memory_space<vmem>>, %arg18: memref<126x448xf32, #tpu.memory_space<vmem>>, %arg19: memref<62x192xf32, #tpu.memory_space<vmem>>, %arg20: memref<30x96xf32, #tpu.memory_space<vmem>>) attributes {dimension_semantics = [#tpu.dimension_semantics<parallel>], iteration_bounds = array<i64: 2>, scalar_prefetch = 0 : i64, scratch_operands = 3 : i64, tpu.core_type = #tpu.core_type<tc>, window_params = [{transform_indices = @transform_0, window_bounds = array<i64: 128, 48>}, {pipeline_mode = #tpu.pipeline_mode<synchronous>, transform_indices = @transform_1, window_bounds = array<i64: 144, 448>}, {pipeline_mode = #tpu.pipeline_mode<synchronous>, transform_indices = @transform_2, window_bounds = array<i64: 1, 448>}, {pipeline_mode = #tpu.pipeline_mode<synchronous>, transform_indices = @transform_3, window_bounds = array<i64: 1344, 192>}, {pipeline_mode = #tpu.pipeline_mode<synchronous>, transform_indices = @transform_4, window_bounds = array<i64: 1, 192>}, {pipeline_mode = #tpu.pipeline_mode<synchronous>, transform_indices = @transform_5, window_bounds = array<i64: 62, 124>}, {pipeline_mode = #tpu.pipeline_mode<synchronous>, transform_indices = @transform_6, window_bounds = array<i64: 576, 96>}, {pipeline_mode = #tpu.pipeline_mode<synchronous>, transform_indices = @transform_7, window_bounds = array<i64: 1, 96>}, {pipeline_mode = #tpu.pipeline_mode<synchronous>, transform_indices = @transform_8, window_bounds = array<i64: 30, 60>}, {pipeline_mode = #tpu.pipeline_mode<synchronous>, transform_indices = @transform_9, window_bounds = array<i64: 192, 32>}, {pipeline_mode = #tpu.pipeline_mode<synchronous>, transform_indices = @transform_10, window_bounds = array<i64: 1, 32>}, {pipeline_mode = #tpu.pipeline_mode<synchronous>, transform_indices = @transform_11, window_bounds = array<i64: 8, 29>}, {pipeline_mode = #tpu.pipeline_mode<synchronous>, transform_indices = @transform_12, window_bounds = array<i64: 32, 32>}, {pipeline_mode = #tpu.pipeline_mode<synchronous>, transform_indices = @transform_13, window_bounds = array<i64: 1, 32>}, {pipeline_mode = #tpu.pipeline_mode<synchronous>, transform_indices = @transform_14, window_bounds = array<i64: 32, 128>}, {pipeline_mode = #tpu.pipeline_mode<synchronous>, transform_indices = @transform_15, window_bounds = array<i64: 1, 128>}, {transform_indices = @transform_16, window_bounds = array<i64: 8, 128>}]} {
    %c0 = arith.constant 0 : index
    %c0_0 = arith.constant 0 : index
    %0 = vector.load %arg1[%c0, %c0_0] : memref<128x48xf32, #tpu.memory_space<vmem>>, vector<126x48xf32>
    %c1 = arith.constant 1 : index
    %c0_1 = arith.constant 0 : index
    %1 = vector.load %arg1[%c1, %c0_1] : memref<128x48xf32, #tpu.memory_space<vmem>>, vector<126x48xf32>
    %c2 = arith.constant 2 : index
    %c0_2 = arith.constant 0 : index
    %2 = vector.load %arg1[%c2, %c0_2] : memref<128x48xf32, #tpu.memory_space<vmem>>, vector<126x48xf32>
    %3 = tpu.concatenate %0, %1, %2 in 1 : vector<126x48xf32>, vector<126x48xf32>, vector<126x48xf32> -> vector<126x144xf32>
    %4 = arith.truncf %3 : vector<126x144xf32> to vector<126x144xbf16>
    %c0_3 = arith.constant 0 : index
    %c0_4 = arith.constant 0 : index
    %5 = vector.load %arg2[%c0_3, %c0_4] : memref<144x448xbf16, #tpu.memory_space<vmem>>, vector<144x448xbf16>
    %cst = arith.constant dense<0.000000e+00> : vector<126x448xf32>
    %6 = tpu.matmul %4, %5, %cst {dimension_numbers = #tpu.dot_dimension_numbers<[1], [0], [0], [1], [0, 0, 1, 1], [], []>} : vector<126x144xbf16>, vector<144x448xbf16>, vector<126x448xf32> -> vector<126x448xf32>
    %c0_5 = arith.constant 0 : index
    %c0_6 = arith.constant 0 : index
    %7 = vector.load %arg3[%c0_5, %c0_6] : memref<1x448xf32, #tpu.memory_space<vmem>>, vector<1x448xf32>
    %8 = vector.broadcast %7 : vector<1x448xf32> to vector<126x448xf32>
    %9 = arith.addf %6, %8 : vector<126x448xf32>
    %cst_7 = arith.constant 0.000000e+00 : f32
    %10 = vector.broadcast %cst_7 : f32 to vector<126x448xf32>
    %11 = arith.maximumf %9, %10 : vector<126x448xf32>
    %c0_8 = arith.constant 0 : index
    %c0_9 = arith.constant 0 : index
    %12 = vector.load %arg18[%c0_8, %c0_9] : memref<126x448xf32, #tpu.memory_space<vmem>>, vector<126x448xf32>
    tpu.vector_store %arg18[%c0_8, %c0_9], %11 {strides = array<i32>} : memref<126x448xf32, #tpu.memory_space<vmem>>, vector<126x448xf32>,
    %c0_10 = arith.constant 0 : index
    %c0_11 = arith.constant 0 : index
    %13 = vector.load %arg18[%c0_10, %c0_11] : memref<126x448xf32, #tpu.memory_space<vmem>>, vector<124x448xf32>
    %c1_12 = arith.constant 1 : index
    %c0_13 = arith.constant 0 : index
    %14 = vector.load %arg18[%c1_12, %c0_13] : memref<126x448xf32, #tpu.memory_space<vmem>>, vector<124x448xf32>
    %c2_14 = arith.constant 2 : index
    %c0_15 = arith.constant 0 : index
    %15 = vector.load %arg18[%c2_14, %c0_15] : memref<126x448xf32, #tpu.memory_space<vmem>>, vector<124x448xf32>
    %16 = tpu.concatenate %13, %14, %15 in 1 : vector<124x448xf32>, vector<124x448xf32>, vector<124x448xf32> -> vector<124x1344xf32>
    %17 = arith.truncf %16 : vector<124x1344xf32> to vector<124x1344xbf16>
    %c0_16 = arith.constant 0 : index
    %c0_17 = arith.constant 0 : index
    %18 = vector.load %arg4[%c0_16, %c0_17] : memref<1344x192xbf16, #tpu.memory_space<vmem>>, vector<1344x192xbf16>
    %cst_18 = arith.constant dense<0.000000e+00> : vector<124x192xf32>
    %19 = tpu.matmul %17, %18, %cst_18 {dimension_numbers = #tpu.dot_dimension_numbers<[1], [0], [0], [1], [0, 0, 1, 1], [], []>} : vector<124x1344xbf16>, vector<1344x192xbf16>, vector<124x192xf32> -> vector<124x192xf32>
    %c0_19 = arith.constant 0 : index
    %c0_20 = arith.constant 0 : index
    %20 = vector.load %arg6[%c0_19, %c0_20] : memref<62x124xbf16, #tpu.memory_space<vmem>>, vector<62x124xbf16>
    %21 = arith.truncf %19 : vector<124x192xf32> to vector<124x192xbf16>
    %cst_21 = arith.constant dense<0.000000e+00> : vector<62x192xf32>
    %22 = tpu.matmul %20, %21, %cst_21 {dimension_numbers = #tpu.dot_dimension_numbers<[1], [0], [0], [1], [0, 0, 1, 1], [], []>} : vector<62x124xbf16>, vector<124x192xbf16>, vector<62x192xf32> -> vector<62x192xf32>
    %c0_22 = arith.constant 0 : index
    %c0_23 = arith.constant 0 : index
    %23 = vector.load %arg5[%c0_22, %c0_23] : memref<1x192xf32, #tpu.memory_space<vmem>>, vector<1x192xf32>
    %24 = vector.broadcast %23 : vector<1x192xf32> to vector<62x192xf32>
    %25 = arith.addf %22, %24 : vector<62x192xf32>
    %cst_24 = arith.constant 0.000000e+00 : f32
    %26 = vector.broadcast %cst_24 : f32 to vector<62x192xf32>
    %27 = arith.maximumf %25, %26 : vector<62x192xf32>
    %c0_25 = arith.constant 0 : index
    %c0_26 = arith.constant 0 : index
    %28 = vector.load %arg19[%c0_25, %c0_26] : memref<62x192xf32, #tpu.memory_space<vmem>>, vector<62x192xf32>
    tpu.vector_store %arg19[%c0_25, %c0_26], %27 {strides = array<i32>} : memref<62x192xf32, #tpu.memory_space<vmem>>, vector<62x192xf32>,
    %c0_27 = arith.constant 0 : index
    %c0_28 = arith.constant 0 : index
    %29 = vector.load %arg19[%c0_27, %c0_28] : memref<62x192xf32, #tpu.memory_space<vmem>>, vector<60x192xf32>
    %c1_29 = arith.constant 1 : index
    %c0_30 = arith.constant 0 : index
    %30 = vector.load %arg19[%c1_29, %c0_30] : memref<62x192xf32, #tpu.memory_space<vmem>>, vector<60x192xf32>
    %c2_31 = arith.constant 2 : index
    %c0_32 = arith.constant 0 : index
    %31 = vector.load %arg19[%c2_31, %c0_32] : memref<62x192xf32, #tpu.memory_space<vmem>>, vector<60x192xf32>
    %32 = tpu.concatenate %29, %30, %31 in 1 : vector<60x192xf32>, vector<60x192xf32>, vector<60x192xf32> -> vector<60x576xf32>
    %33 = arith.truncf %32 : vector<60x576xf32> to vector<60x576xbf16>
    %c0_33 = arith.constant 0 : index
    %c0_34 = arith.constant 0 : index
    %34 = vector.load %arg7[%c0_33, %c0_34] : memref<576x96xbf16, #tpu.memory_space<vmem>>, vector<576x96xbf16>
    %cst_35 = arith.constant dense<0.000000e+00> : vector<60x96xf32>
    %35 = tpu.matmul %33, %34, %cst_35 {dimension_numbers = #tpu.dot_dimension_numbers<[1], [0], [0], [1], [0, 0, 1, 1], [], []>} : vector<60x576xbf16>, vector<576x96xbf16>, vector<60x96xf32> -> vector<60x96xf32>
    %c0_36 = arith.constant 0 : index
    %c0_37 = arith.constant 0 : index
    %36 = vector.load %arg9[%c0_36, %c0_37] : memref<30x60xbf16, #tpu.memory_space<vmem>>, vector<30x60xbf16>
    %37 = arith.truncf %35 : vector<60x96xf32> to vector<60x96xbf16>
    %cst_38 = arith.constant dense<0.000000e+00> : vector<30x96xf32>
    %38 = tpu.matmul %36, %37, %cst_38 {dimension_numbers = #tpu.dot_dimension_numbers<[1], [0], [0], [1], [0, 0, 1, 1], [], []>} : vector<30x60xbf16>, vector<60x96xbf16>, vector<30x96xf32> -> vector<30x96xf32>
    %c0_39 = arith.constant 0 : index
    %c0_40 = arith.constant 0 : index
    %39 = vector.load %arg8[%c0_39, %c0_40] : memref<1x96xf32, #tpu.memory_space<vmem>>, vector<1x96xf32>
    %40 = vector.broadcast %39 : vector<1x96xf32> to vector<30x96xf32>
    %41 = arith.addf %38, %40 : vector<30x96xf32>
    %cst_41 = arith.constant 0.000000e+00 : f32
    %42 = vector.broadcast %cst_41 : f32 to vector<30x96xf32>
    %43 = arith.maximumf %41, %42 : vector<30x96xf32>
    %c0_42 = arith.constant 0 : index
    %c0_43 = arith.constant 0 : index
    %44 = vector.load %arg20[%c0_42, %c0_43] : memref<30x96xf32, #tpu.memory_space<vmem>>, vector<30x96xf32>
    tpu.vector_store %arg20[%c0_42, %c0_43], %43 {strides = array<i32>} : memref<30x96xf32, #tpu.memory_space<vmem>>, vector<30x96xf32>,
    %c0_44 = arith.constant 0 : index
    %c0_45 = arith.constant 0 : index
    %45 = vector.load %arg20[%c0_44, %c0_45] : memref<30x96xf32, #tpu.memory_space<vmem>>, vector<29x96xf32>
    %c1_46 = arith.constant 1 : index
    %c0_47 = arith.constant 0 : index
    %46 = vector.load %arg20[%c1_46, %c0_47] : memref<30x96xf32, #tpu.memory_space<vmem>>, vector<29x96xf32>
    %47 = tpu.concatenate %45, %46 in 1 : vector<29x96xf32>, vector<29x96xf32> -> vector<29x192xf32>
    %48 = arith.truncf %47 : vector<29x192xf32> to vector<29x192xbf16>
    %c0_48 = arith.constant 0 : index
    %c0_49 = arith.constant 0 : index
    %49 = vector.load %arg10[%c0_48, %c0_49] : memref<192x32xbf16, #tpu.memory_space<vmem>>, vector<192x32xbf16>
    %cst_50 = arith.constant dense<0.000000e+00> : vector<29x32xf32>
    %50 = tpu.matmul %48, %49, %cst_50 {dimension_numbers = #tpu.dot_dimension_numbers<[1], [0], [0], [1], [0, 0, 1, 1], [], []>} : vector<29x192xbf16>, vector<192x32xbf16>, vector<29x32xf32> -> vector<29x32xf32>
    %c0_51 = arith.constant 0 : index
    %c0_52 = arith.constant 0 : index
    %51 = vector.load %arg12[%c0_51, %c0_52] : memref<8x29xbf16, #tpu.memory_space<vmem>>, vector<8x29xbf16>
    %52 = arith.truncf %50 : vector<29x32xf32> to vector<29x32xbf16>
    %cst_53 = arith.constant dense<0.000000e+00> : vector<8x32xf32>
    %53 = tpu.matmul %51, %52, %cst_53 {dimension_numbers = #tpu.dot_dimension_numbers<[1], [0], [0], [1], [0, 0, 1, 1], [], []>} : vector<8x29xbf16>, vector<29x32xbf16>, vector<8x32xf32> -> vector<8x32xf32>
    %c0_54 = arith.constant 0 : index
    %c0_55 = arith.constant 0 : index
    %54 = vector.load %arg11[%c0_54, %c0_55] : memref<1x32xf32, #tpu.memory_space<vmem>>, vector<1x32xf32>
    %55 = vector.broadcast %54 : vector<1x32xf32> to vector<8x32xf32>
    %56 = arith.addf %53, %55 : vector<8x32xf32>
    %cst_56 = arith.constant 3.000000e+00 : f32
    %57 = vector.broadcast %cst_56 : f32 to vector<8x32xf32>
    %58 = arith.addf %56, %57 : vector<8x32xf32>
    %cst_57 = arith.constant 0.000000e+00 : f32
    %cst_58 = arith.constant 6.000000e+00 : f32
    %59 = vector.broadcast %cst_57 : f32 to vector<8x32xf32>
    %60 = arith.maximumf %59, %58 : vector<8x32xf32>
    %61 = vector.broadcast %cst_58 : f32 to vector<8x32xf32>
    %62 = arith.minimumf %61, %60 : vector<8x32xf32>
    %63 = arith.mulf %56, %62 : vector<8x32xf32>
    %cst_59 = arith.constant 0.166666672 : f32
    %64 = vector.broadcast %cst_59 : f32 to vector<8x32xf32>
    %65 = arith.mulf %63, %64 : vector<8x32xf32>
    %66 = arith.truncf %65 : vector<8x32xf32> to vector<8x32xbf16>
    %c0_60 = arith.constant 0 : index
    %c0_61 = arith.constant 0 : index
    %67 = vector.load %arg13[%c0_60, %c0_61] : memref<32x32xbf16, #tpu.memory_space<vmem>>, vector<32x32xbf16>
    %cst_62 = arith.constant dense<0.000000e+00> : vector<8x32xf32>
    %68 = tpu.matmul %66, %67, %cst_62 {dimension_numbers = #tpu.dot_dimension_numbers<[1], [0], [0], [1], [0, 0, 1, 1], [], []>} : vector<8x32xbf16>, vector<32x32xbf16>, vector<8x32xf32> -> vector<8x32xf32>
    %c0_63 = arith.constant 0 : index
    %c0_64 = arith.constant 0 : index
    %69 = vector.load %arg14[%c0_63, %c0_64] : memref<1x32xf32, #tpu.memory_space<vmem>>, vector<1x32xf32>
    %70 = vector.broadcast %69 : vector<1x32xf32> to vector<8x32xf32>
    %71 = arith.addf %68, %70 : vector<8x32xf32>
    %cst_65 = arith.constant 3.000000e+00 : f32
    %72 = vector.broadcast %cst_65 : f32 to vector<8x32xf32>
    %73 = arith.addf %71, %72 : vector<8x32xf32>
    %cst_66 = arith.constant 0.000000e+00 : f32
    %cst_67 = arith.constant 6.000000e+00 : f32
    %74 = vector.broadcast %cst_66 : f32 to vector<8x32xf32>
    %75 = arith.maximumf %74, %73 : vector<8x32xf32>
    %76 = vector.broadcast %cst_67 : f32 to vector<8x32xf32>
    %77 = arith.minimumf %76, %75 : vector<8x32xf32>
    %78 = arith.mulf %71, %77 : vector<8x32xf32>
    %cst_68 = arith.constant 0.166666672 : f32
    %79 = vector.broadcast %cst_68 : f32 to vector<8x32xf32>
    %80 = arith.mulf %78, %79 : vector<8x32xf32>
    %81 = arith.truncf %80 : vector<8x32xf32> to vector<8x32xbf16>
    %c0_69 = arith.constant 0 : index
    %c0_70 = arith.constant 0 : index
    %82 = vector.load %arg15[%c0_69, %c0_70] : memref<32x128xbf16, #tpu.memory_space<vmem>>, vector<32x128xbf16>
    %cst_71 = arith.constant dense<0.000000e+00> : vector<8x128xf32>
    %83 = tpu.matmul %81, %82, %cst_71 {dimension_numbers = #tpu.dot_dimension_numbers<[1], [0], [0], [1], [0, 0, 1, 1], [], []>} : vector<8x32xbf16>, vector<32x128xbf16>, vector<8x128xf32> -> vector<8x128xf32>
    %c0_72 = arith.constant 0 : index
    %c0_73 = arith.constant 0 : index
    %84 = vector.load %arg16[%c0_72, %c0_73] : memref<1x128xf32, #tpu.memory_space<vmem>>, vector<1x128xf32>
    %85 = vector.broadcast %84 : vector<1x128xf32> to vector<8x128xf32>
    %86 = arith.addf %83, %85 : vector<8x128xf32>
    %c0_74 = arith.constant 0 : index
    %c0_75 = arith.constant 0 : index
    %87 = vector.load %arg17[%c0_74, %c0_75] : memref<8x128xf32, #tpu.memory_space<vmem>>, vector<8x128xf32>
    tpu.vector_store %arg17[%c0_74, %c0_75], %86 {strides = array<i32>} : memref<8x128xf32, #tpu.memory_space<vmem>>, vector<8x128xf32>,
    return
  }
  func.func @transform_0(%arg0: i32) -> (i32, i32) {
    %c0_i32 = arith.constant 0 : i32
    %c0_i32_0 = arith.constant 0 : i32
    return %arg0, %c0_i32 : i32, i32
  }
  func.func @transform_1(%arg0: i32) -> (i32, i32) {
    %c0_i32 = arith.constant 0 : i32
    %c0_i32_0 = arith.constant 0 : i32
    %c0_i32_1 = arith.constant 0 : i32
    return %c0_i32, %c0_i32_0 : i32, i32
  }
  func.func @transform_2(%arg0: i32) -> (i32, i32) {
    %c0_i32 = arith.constant 0 : i32
    %c0_i32_0 = arith.constant 0 : i32
    %c0_i32_1 = arith.constant 0 : i32
    return %c0_i32, %c0_i32_0 : i32, i32
  }
  func.func @transform_3(%arg0: i32) -> (i32, i32) {
    %c0_i32 = arith.constant 0 : i32
    %c0_i32_0 = arith.constant 0 : i32
    %c0_i32_1 = arith.constant 0 : i32
    return %c0_i32, %c0_i32_0 : i32, i32
  }
  func.func @transform_4(%arg0: i32) -> (i32, i32) {
    %c0_i32 = arith.constant 0 : i32
    %c0_i32_0 = arith.constant 0 : i32
    %c0_i32_1 = arith.constant 0 : i32
    return %c0_i32, %c0_i32_0 : i32, i32
  }
  func.func @transform_5(%arg0: i32) -> (i32, i32) {
    %c0_i32 = arith.constant 0 : i32
    %c0_i32_0 = arith.constant 0 : i32
    %c0_i32_1 = arith.constant 0 : i32
    return %c0_i32, %c0_i32_0 : i32, i32
  }
  func.func @transform_6(%arg0: i32) -> (i32, i32) {
    %c0_i32 = arith.constant 0 : i32
    %c0_i32_0 = arith.constant 0 : i32
    %c0_i32_1 = arith.constant 0 : i32
    return %c0_i32, %c0_i32_0 : i32, i32
  }
  func.func @transform_7(%arg0: i32) -> (i32, i32) {
    %c0_i32 = arith.constant 0 : i32
    %c0_i32_0 = arith.constant 0 : i32
    %c0_i32_1 = arith.constant 0 : i32
    return %c0_i32, %c0_i32_0 : i32, i32
  }
  func.func @transform_8(%arg0: i32) -> (i32, i32) {
    %c0_i32 = arith.constant 0 : i32
    %c0_i32_0 = arith.constant 0 : i32
    %c0_i32_1 = arith.constant 0 : i32
    return %c0_i32, %c0_i32_0 : i32, i32
  }
  func.func @transform_9(%arg0: i32) -> (i32, i32) {
    %c0_i32 = arith.constant 0 : i32
    %c0_i32_0 = arith.constant 0 : i32
    %c0_i32_1 = arith.constant 0 : i32
    return %c0_i32, %c0_i32_0 : i32, i32
  }
  func.func @transform_10(%arg0: i32) -> (i32, i32) {
    %c0_i32 = arith.constant 0 : i32
    %c0_i32_0 = arith.constant 0 : i32
    %c0_i32_1 = arith.constant 0 : i32
    return %c0_i32, %c0_i32_0 : i32, i32
  }
  func.func @transform_11(%arg0: i32) -> (i32, i32) {
    %c0_i32 = arith.constant 0 : i32
    %c0_i32_0 = arith.constant 0 : i32
    %c0_i32_1 = arith.constant 0 : i32
    return %c0_i32, %c0_i32_0 : i32, i32
  }
  func.func @transform_12(%arg0: i32) -> (i32, i32) {
    %c0_i32 = arith.constant 0 : i32
    %c0_i32_0 = arith.constant 0 : i32
    %c0_i32_1 = arith.constant 0 : i32
    return %c0_i32, %c0_i32_0 : i32, i32
  }
  func.func @transform_13(%arg0: i32) -> (i32, i32) {
    %c0_i32 = arith.constant 0 : i32
    %c0_i32_0 = arith.constant 0 : i32
    %c0_i32_1 = arith.constant 0 : i32
    return %c0_i32, %c0_i32_0 : i32, i32
  }
  func.func @transform_14(%arg0: i32) -> (i32, i32) {
    %c0_i32 = arith.constant 0 : i32
    %c0_i32_0 = arith.constant 0 : i32
    %c0_i32_1 = arith.constant 0 : i32
    return %c0_i32, %c0_i32_0 : i32, i32
  }
  func.func @transform_15(%arg0: i32) -> (i32, i32) {
    %c0_i32 = arith.constant 0 : i32
    %c0_i32_0 = arith.constant 0 : i32
    %c0_i32_1 = arith.constant 0 : i32
    return %c0_i32, %c0_i32_0 : i32, i32
  }
  func.func @transform_16(%arg0: i32) -> (i32, i32) {
    %c0_i32 = arith.constant 0 : i32
    %c0_i32_0 = arith.constant 0 : i32
    return %arg0, %c0_i32 : i32, i32
  }
}

</mosaic_0001>

<bundles_post_ra>
// kernel: tpu_custom_call.1
= control target key start
LH: loop header
LB: loop body
LE: loop exit
PB: predicated region body
PF: predicated region fallthrough
CT: control target
= control target key end

     0   :  { %s9962_s0 = inlined_call_operand.vmem [shape: f32[256,48], index: 0, kind: input, shape index: {}]   ;;  %s9963_s1 = inlined_call_operand.vmem [shape: bf16[144,448], index: 1, kind: input, shape index: {}]   ;;  %s9964_s2 = inlined_call_operand.vmem [shape: f32[1,448], index: 2, kind: input, shape index: {}]   ;;  %s9965_s3 = inlined_call_operand.vmem [shape: bf16[1344,192], index: 3, kind: input, shape index: {}]   ;;  %s9966_s4 = inlined_call_operand.vmem [shape: f32[1,192], index: 4, kind: input, shape index: {}]   ;;  %s9967_s5 = inlined_call_operand.vmem [shape: bf16[62,124], index: 5, kind: input, shape index: {}]   ;;  %s9968_s6 = inlined_call_operand.vmem [shape: bf16[576,96], index: 6, kind: input, shape index: {}]   ;;  %s9969_s7 = inlined_call_operand.vmem [shape: f32[1,96], index: 7, kind: input, shape index: {}]   ;;  %s9970_s8 = inlined_call_operand.vmem [shape: bf16[30,60], index: 8, kind: input, shape index: {}]   ;;  %s9971_s9 = inlined_call_operand.vmem [shape: bf16[192,32], index: 9, kind: input, shape index: {}]   ;;  %s9972_s10 = inlined_call_operand.vmem [shape: f32[1,32], index: 10, kind: input, shape index: {}]   ;;  %s9973_s11 = inlined_call_operand.vmem [shape: bf16[8,29], index: 11, kind: input, shape index: {}]   ;;  %s9974_s12 = inlined_call_operand.vmem [shape: bf16[32,32], index: 12, kind: input, shape index: {}]   ;;  %s9975_s13 = inlined_call_operand.vmem [shape: f32[1,32], index: 13, kind: input, shape index: {}]   ;;  %s9976_s14 = inlined_call_operand.vmem [shape: bf16[32,128], index: 14, kind: input, shape index: {}]   ;;  %s9977_s15 = inlined_call_operand.vmem [shape: f32[1,128], index: 15, kind: input, shape index: {}]   ;;  %s9978_s16 = inlined_call_operand.hbm [shape: f32[16,128], index: 16, kind: output, shape index: {}]  }
   0x1   :  { %10032 = sst [smem:[#allocation27_spill]] %s9962_s0 }
   0x2   :  { %21 = vsyncpa [#allocation6], 0 }
   0x3   :  { %23 = vsyncpa [#allocation6 + $0x1], 0  ;;  %s6898_s21 = smov 0   ;;  %s6900_s22 = smov 0  }
   0x4   :  { %s6902_s23 = smov 0   ;;  %s6904_s24 = smov 0  }
   0x5 LB: > { %10033 = sst [smem:[#allocation8_spill]] %s6791_s21  ;;  %s6919_s25 = sadd.s32 4294967295, %s6803_s24   ;;  %s6803_s24 = sphi %s6904_s24, %s10207_s24   ;;  %s6799_s23 = sphi %s6902_s23, %s10209_s23   ;;  %s6795_s22 = sphi %s6900_s22, %s10211_s22   ;;  %s6791_s21 = sphi %s6898_s21, %s10210_s21  }
   0x6   : > { %10034 = sst [smem:[#allocation9_spill]] %s6799_s23  ;;  %s5321_s26 = sadd.s32 4294967294, %s6803_s24  }
   0x7   : > { %10035 = sst [smem:[#allocation10_spill]] %s6803_s24  ;;  %s6923_s27 = sadd.s32 1, %s6803_s24  }
   0x8   : > { %10036 = sst [smem:[#allocation11_spill]] %s6923_s27  ;;  %s377_s28 = sadd.s32 1, %s6799_s23 }
   0x9   : > { %s374_s29 = ssub.s32 %s6803_s24, %s6923_s27  ;;  %p387_p0 = scmp.ne.s32.totalorder %s6799_s23, %s6795_s22 }
   0xa   : > { %p375_p1 = scmp.eq.s32.totalorder %s374_s29, 0  ;;  %p388_p2 = scmp.eq.s32.totalorder %s6919_s25, 1 }
   0xb   : > { %p393_p3 = scmp.ne.s32.totalorder %s6795_s22, %s6791_s21  ;;  %p394_p4 = scmp.eq.s32.totalorder %s5321_s26, 1 }
   0xc   : > { %s6934_s30 = scalar_select %p375_p1, %s6799_s23, %s377_s28  }
   0xd   : > { %p6936_p5 = por %p388_p2, %p387_p0  ;;  %p6940_p6 = por %p394_p4, %p393_p3 }
   0xe   : > { %10037 = sst [smem:[#allocation12_spill]] %s6934_s30  ;;  %p5324_p7 = scmp.ge.s32.totalorder %s6803_s24, 1 }
   0xf   : > { %s10039_s17 = scalar_select %p6940_p6, 1, 0 }
  0x10   : > { %p466_p8 = scmp.lt.s32.totalorder %s6803_s24, 3 }
  0x11   : > { %10040 = sst [smem:[#allocation13_spill]] %s10039_s17 }
  0x12   : > { %p467_p9 = pnand %p5324_p7, %p466_p8 }
  0x14   : > { %470 = sbr.rel (%p467_p9) target bundleno = 2917 (0xb65), region = 84 }
  0x1b   : > { %s5326_s18 = sshll.u32 %s6919_s25, 4  ;;  %v6322_v0 = vld [vmem:[%s9963_s1 + $0x4] ss:$16 sps:$4 sm:$0xff]   ;;  %v6324_v1 = vld [vmem:[%s9963_s1 + $0xc] ss:$16 sps:$4 sm:$0xff]   ;;  %s10041_s21 = sld [smem:[#allocation27_spill]] }
  0x1c   : > { %p517_p10 = scmp.lt.s32.totalorder %s5326_s18, 31  ;;  %1012 = vmatprep.subr.bf16.mxu0 %v6322_v0  ;;  %v6326_v2 = vld [vmem:[%s9963_s1] ss:$16 sps:$4 sm:$0xff]   ;;  %v6327_v3 = vld [vmem:[%s9963_s1 + $0x8] ss:$16 sps:$4 sm:$0xff]   ;;  %1125 = vmatprep.subr.bf16.mxu1 %v6324_v1  ;;  %s6805_s24 = smov 48  }
  0x1d   : > { %v6328_v4 = vld [vmem:[%s9963_s1 + $0x24] ss:$16 sps:$4 sm:$0xff]   ;;  %1013 = vmatpush1.bf16.msra.mxu0 %v6326_v2  ;;  %1126 = vmatpush1.bf16.msra.mxu1 %v6327_v3  ;;  %v6330_v5 = vld [vmem:[%s9963_s1 + $0x2c] ss:$16 sps:$4 sm:$0xff]   ;;  %v6332_v6 = vld [vmem:[%s9963_s1 + $0x20] ss:$16 sps:$4 sm:$0xff]  }
  0x1e   : > { %s10213_s18 = smov (!%p517_p10, %s5326_s18), 31  ;;  %1014 = vmatprep.subr.bf16.mxu0 %v6328_v4  ;;  %v6333_v7 = vld [vmem:[%s9963_s1 + $0x28] ss:$16 sps:$4 sm:$0xff]   ;;  %1127 = vmatprep.subr.bf16.mxu1 %v6330_v5  ;;  %v6334_v8 = vld [vmem:[%s9963_s1 + $0x44] ss:$16 sps:$4 sm:$0xff]   ;;  %s9985_s20 = smov 96  }
  0x1f   : > { %s5327_s30 = sshll.u32 %s10213_s18, 3  ;;  %v6336_v33 = vld [vmem:[%s9963_s1 + $0x4c] ss:$16 sps:$4 sm:$0xff]   ;;  %v6338_v37 = vld [vmem:[%s9963_s1 + $0x40] ss:$16 sps:$4 sm:$0xff]   ;;  %s10042_s19 = smov 96  }
  0x20   : > { %v6339_v38 = vld [vmem:[%s9963_s1 + $0x48] ss:$16 sps:$4 sm:$0xff]   ;;  %v6340_v40 = vld [vmem:[%s9963_s1 + $0x64] ss:$16 sps:$4 sm:$0xff]   ;;  %v6342_v41 = vld [vmem:[%s9963_s1 + $0x6c] ss:$16 sps:$4 sm:$0xff]  }
  0x21   : > { %s6974_s17 = scalar_lea.vmem %s10041_s21, %s5327_s30  ;;  %1015 = vmatpush1.bf16.msra.mxu0 %v6332_v6  ;;  %1128 = vmatpush1.bf16.msra.mxu1 %v6333_v7  ;;  %v6344_v42 = vld [vmem:[%s9963_s1 + $0x60] ss:$16 sps:$4 sm:$0xff]   ;;  %v6345_v45 = vld [vmem:[%s9963_s1 + $0x68] ss:$16 sps:$4 sm:$0xff]   ;;  %v6346_v49 = vld [vmem:[%s9963_s1 + $0x84] ss:$16 sps:$4 sm:$0xff]  }
  0x22   : > { %v539_v9 = vld [vmem:[%s6974_s17 + $0x1] sm:$0xff]  ;;  %v540_v10 = vld [vmem:[%s6974_s17 + $0x9] sm:$0xff]  ;;  %v541_v14 = vld [vmem:[%s6974_s17 + $0x11] sm:$0xff]  ;;  %1016 = vmatprep.subr.bf16.mxu0 %v6334_v8  ;;  %1129 = vmatprep.subr.bf16.mxu1 %v6336_v33  ;;  %vm699_vm0 = vcmask 392192   ;;  %vm716_vm1 = vcmask 785408   ;;  %vm987_vm2 = vcmask 130048  }
  0x23   : > { %v555_v11 = vld [vmem:[%s6974_s17 + $0x2] sm:$0xff]  ;;  %v6032_v12 = vpack.i.bf16 %v540_v10, %v539_v9  ;;  %v556_v13 = vld [vmem:[%s6974_s17 + $0xa] sm:$0xff]  ;;  %v542_v15 = vld [vmem:[%s6974_s17 + $0x19] sm:$0xff]  ;;  %vm1305_vm3 = vcmask 523264   ;;  %vm1512_vm4 = vcmask 1046528   ;;  %s6807_s29 = smov 64  }
  0x24   : > { %v6042_v16 = vpack.i.bf16 %v542_v15, %v541_v14  ;;  %v557_v17 = vld [vmem:[%s6974_s17 + $0x12] sm:$0xff]  ;;  %v558_v18 = vld [vmem:[%s6974_s17 + $0x1a] sm:$0xff]  ;;  %v6037_v19 = vpack.i.bf16 %v556_v13, %v555_v11  ;;  %v544_v22 = vld [vmem:[%s6974_s17 + $0x29] sm:$0xff]  ;;  %vm1885_vm5 = vcmask 1045504   ;;  %vm1366_vm6 = vcmask 521216   ;;  %s513_s18 = sand.u32 1, %s6795_s22  }
  0x25   : > { %6033 = vrot.lane.b32.xlu0 %v6032_v12, %s6805_s24  ;;  %v6047_v20 = vpack.i.bf16 %v558_v18, %v557_v17  ;;  %v543_v21 = vld [vmem:[%s6974_s17 + $0x21] sm:$0xff]  ;;  %v560_v24 = vld [vmem:[%s6974_s17 + $0x2a] sm:$0xff]  ;;  %v546_v28 = vld [vmem:[%s6974_s17 + $0x39] sm:$0xff]  ;;  %1017 = vmatpush1.bf16.msra.mxu0 %v6338_v37  ;;  %vm3944_vm7 = vcmask 1014784   ;;  %vm4792_vm8 = vcmask 490496   ;;  %vm4858_vm9 = vcmask 783360  }
  0x26   : > { %6043 = vrot.lane.b32.xlu1 %v6042_v16, %s6805_s24  ;;  %v559_v23 = vld [vmem:[%s6974_s17 + $0x22] sm:$0xff]  ;;  %v6052_v25 = vpack.i.bf16 %v544_v22, %v543_v21  ;;  %v545_v27 = vld [vmem:[%s6974_s17 + $0x31] sm:$0xff]  ;;  %v562_v30 = vld [vmem:[%s6974_s17 + $0x3a] sm:$0xff]  ;;  %1130 = vmatpush1.bf16.msra.mxu1 %v6339_v38  ;;  %vm6810_vm10 = vmmov 0   ;;  %vm5053_vm11 = vcmask 236544   ;;  %vm5131_vm12 = vcmask 261120  }
  0x27   : > { %v6057_v26 = vpack.i.bf16 %v560_v24, %v559_v23  ;;  %v561_v29 = vld [vmem:[%s6974_s17 + $0x32] sm:$0xff]  ;;  %v547_v31 = vld [vmem:[%s6974_s17 + $0x41] sm:$0xff]  ;;  %v548_v32 = vld [vmem:[%s6974_s17 + $0x49] sm:$0xff]  ;;  %v6062_v34 = vpack.i.bf16 %v546_v28, %v545_v27  ;;  %1018 = vmatprep.subr.bf16.mxu0 %v6340_v40  ;;  %1131 = vmatprep.subr.bf16.mxu1 %v6342_v41  ;;  %s5325_s26 = sshll.u32 %s513_s18, 3  ;;  %s5635_s28 = sshll.u32 %s6919_s25, 7 }
  0x28   : > { %v563_v35 = vld [vmem:[%s6974_s17 + $0x42] sm:$0xff]  ;;  %v564_v36 = vld [vmem:[%s6974_s17 + $0x4a] sm:$0xff]  ;;  %v6067_v39 = vpack.i.bf16 %v562_v30, %v561_v29  ;;  %v550_v44 = vld [vmem:[%s6974_s17 + $0x59] sm:$0xff]  ;;  %v6072_v46 = vpack.i.bf16 %v548_v32, %v547_v31  ;;  %s515_s30 = scalar_lea.vmem [#allocation5], %s5325_s26  ;;  %s9920_s21 = scalar_lea.hbm %s9978_s16, %s5635_s28 }
  0x29   : > { %6038 = vrot.lane.b32.xlu0 %v6037_v19, %s9985_s20  ;;  %v549_v43 = vld [vmem:[%s6974_s17 + $0x51] sm:$0xff]  ;;  %v566_v48 = vld [vmem:[%s6974_s17 + $0x5a] sm:$0xff]  ;;  %v6077_v50 = vpack.i.bf16 %v564_v36, %v563_v35  ;;  %1019 = vmatpush1.bf16.msra.mxu0 %v6344_v42  ;;  %v552_v58 = vld [vmem:[%s6974_s17 + $0x69] sm:$0xff]  ;;  %s5262_s23 = sshll.u32 %s515_s30, 4  ;;  %s9922_s23 = int_to_ptr.vmem [resolvable:$true] %s5262_s23 }
  0x2a   : > { %6048 = vrot.lane.b32.xlu1 %v6047_v20, %s9985_s20  ;;  %v565_v47 = vld [vmem:[%s6974_s17 + $0x52] sm:$0xff]  ;;  %v6348_v51 = vld [vmem:[%s9963_s1 + $0x8c] ss:$16 sps:$4 sm:$0xff]   ;;  %1132 = vmatpush1.bf16.msra.mxu1 %v6345_v45  ;;  %v551_v55 = vld [vmem:[%s6974_s17 + $0x61] sm:$0xff]  ;;  %v6082_v57 = vpack.i.bf16 %v550_v44, %v549_v43  ;;  %s6741_s25 = scalar_lea.vmem %s9922_s23, 128 }
  0x2b   : > { %v6350_v52 = vld [vmem:[%s9963_s1 + $0x80] ss:$16 sps:$4 sm:$0xff]   ;;  %v6351_v53 = vld [vmem:[%s9963_s1 + $0x88] ss:$16 sps:$4 sm:$0xff]   ;;  %v6352_v54 = vld [vmem:[%s9963_s1 + $0xa4] ss:$16 sps:$4 sm:$0xff]   ;;  %1020 = vmatprep.subr.bf16.mxu0 %v6346_v49  ;;  %1133 = vmatprep.subr.bf16.mxu1 %v6348_v51  ;;  %v6087_v60 = vpack.i.bf16 %v566_v48, %v565_v47  ;;  %v6092_v4 = vpack.i.bf16 %v552_v58, %v551_v55  ;;  %p6742_p11 = scmp.ne.s32.totalorder %s9922_s23, %s6741_s25 }
  0x2c   : > { %v6354_v56 = vld [vmem:[%s9963_s1 + $0xac] ss:$16 sps:$4 sm:$0xff]   ;;  %v567_v59 = vld [vmem:[%s6974_s17 + $0x62] sm:$0xff]  ;;  %v553_v0 = vld [vmem:[%s6974_s17 + $0x71] sm:$0xff] }
  0x2d   : > { %6053 = vrot.lane.b32.xlu0 %v6052_v25, %s6805_s24  ;;  %v568_v61 = vld [vmem:[%s6974_s17 + $0x6a] sm:$0xff]  ;;  %1021 = vmatpush1.bf16.msra.mxu0 %v6350_v52  ;;  %v554_v1 = vld [vmem:[%s6974_s17 + $0x79] sm:$0x3f]  ;;  %v6358_v2 = vld [vmem:[%s9963_s1 + $0xc4] ss:$16 sps:$4 sm:$0xff]   ;;  %p6743_p12 = pnand %p6742_p11, %p6936_p5 }
  0x2e   : > { %6058 = vrot.lane.b32.xlu1 %v6057_v26, %s9985_s20  ;;  %1134 = vmatpush1.bf16.msra.mxu1 %v6351_v53  ;;  %v6356_v62 = vld [vmem:[%s9963_s1 + $0xa0] ss:$16 sps:$4 sm:$0xff]   ;;  %v6357_v63 = vld [vmem:[%s9963_s1 + $0xa8] ss:$16 sps:$4 sm:$0xff]   ;;  %v6360_v3 = vld [vmem:[%s9963_s1 + $0xcc] ss:$16 sps:$4 sm:$0xff]   ;;  %v6097_v6 = vpack.i.bf16 %v568_v61, %v567_v59  ;;  %v6102_v12 = vpack.i.bf16 %v554_v1, %v553_v0 }
  0x2f   : > { %1022 = vmatprep.subr.bf16.mxu0 %v6352_v54  ;;  %1135 = vmatprep.subr.bf16.mxu1 %v6354_v56  ;;  %v569_v5 = vld [vmem:[%s6974_s17 + $0x72] sm:$0xff]  ;;  %v570_v7 = vld [vmem:[%s6974_s17 + $0x7a] sm:$0x3f]  ;;  %v6378_v20 = vld [vmem:[%s9965_s3 + $0x4] ss:$8 sps:$4 sm:$0xff]   ;;  %p6744_p13 = pneg %p6743_p12 }
  0x30   : > { %v6362_v8 = vld [vmem:[%s9963_s1 + $0xc0] ss:$16 sps:$4 sm:$0xff]   ;;  %v6363_v9 = vld [vmem:[%s9963_s1 + $0xc8] ss:$16 sps:$4 sm:$0xff]   ;;  %v6364_v10 = vld [vmem:[%s9963_s1 + $0xe4] ss:$16 sps:$4 sm:$0xff]   ;;  %v6107_v13 = vpack.i.bf16 %v570_v7, %v569_v5 }
  0x31   : > { %6063 = vrot.lane.b32.xlu0 %v6062_v34, %s6805_s24  ;;  %1023 = vmatpush1.bf16.msra.mxu0 %v6356_v62  ;;  %v6366_v11 = vld [vmem:[%s9963_s1 + $0xec] ss:$16 sps:$4 sm:$0xff]   ;;  %v6368_v14 = vld [vmem:[%s9963_s1 + $0xe0] ss:$16 sps:$4 sm:$0xff]   ;;  %v6369_v15 = vld [vmem:[%s9963_s1 + $0xe8] ss:$16 sps:$4 sm:$0xff]  }
  0x32   : > { %6068 = vrot.lane.b32.xlu1 %v6067_v39, %s9985_s20  ;;  %1136 = vmatpush1.bf16.msra.mxu1 %v6357_v63  ;;  %v6370_v16 = vld [vmem:[%s9963_s1 + $0x104] ss:$16 sps:$4 sm:$0xff]   ;;  %v6372_v17 = vld [vmem:[%s9963_s1 + $0x10c] ss:$16 sps:$4 sm:$0xff]   ;;  %v6374_v18 = vld [vmem:[%s9963_s1 + $0x100] ss:$16 sps:$4 sm:$0xff]  }
  0x33   : > { %1024 = vmatprep.subr.bf16.mxu0 %v6358_v2  ;;  %1137 = vmatprep.subr.bf16.mxu1 %v6360_v3  ;;  %v6375_v19 = vld [vmem:[%s9963_s1 + $0x108] ss:$16 sps:$4 sm:$0xff]   ;;  %v523_v22 = vld [vmem:[%s6974_s17] sm:$0xff]  ;;  %v525_v32 = vld [vmem:[%s6974_s17 + $0x10] sm:$0xff] }
  0x34   : > { %v524_v23 = vld [vmem:[%s6974_s17 + $0x8] sm:$0xff]  ;;  %v526_v33 = vld [vmem:[%s6974_s17 + $0x18] sm:$0xff]  ;;  %v527_v51 = vld [vmem:[%s6974_s17 + $0x20] sm:$0xff] }
  0x35   : > { %6073 = vrot.lane.b32.xlu0 %v6072_v46, %s6805_s24  ;;  %1025 = vmatpush1.bf16.msra.mxu0 %v6362_v8  ;;  %v6376_v39 = vld [vmem:[%s9965_s3] ss:$8 sps:$4 sm:$0xff]   ;;  %v6381_v43 = vld [vmem:[%s9965_s3 + $0x14] ss:$8 sps:$4 sm:$0xff]   ;;  %v6384_v55 = vld [vmem:[%s9965_s3 + $0x24] ss:$8 sps:$4 sm:$0xff]  }
  0x36   : > { %6078 = vrot.lane.b32.xlu1 %v6077_v50, %s9985_s20  ;;  %1138 = vmatpush1.bf16.msra.mxu1 %v6363_v9  ;;  %v6379_v50 = vld [vmem:[%s9965_s3 + $0x10] ss:$8 sps:$4 sm:$0xff]   ;;  %v528_v52 = vld [vmem:[%s6974_s17 + $0x28] sm:$0xff]  ;;  %v6387_v62 = vld [vmem:[%s9965_s3 + $0x34] ss:$8 sps:$4 sm:$0xff]  }
  0x37   : > { %1026 = vmatprep.subr.bf16.mxu0 %v6364_v10  ;;  %1139 = vmatprep.subr.bf16.mxu1 %v6366_v11  ;;  %v6385_v10 = vld [vmem:[%s9965_s3 + $0x30] ss:$8 sps:$4 sm:$0xff]  }
  0x38   : > { %v529_v11 = vld [vmem:[%s6974_s17 + $0x30] sm:$0xff] }
  0x39   : > { %6083 = vrot.lane.b32.xlu0 %v6082_v57, %s6805_s24  ;;  %1027 = vmatpush1.bf16.msra.mxu0 %v6368_v14 }
  0x3a   : > { %6088 = vrot.lane.b32.xlu1 %v6087_v60, %s9985_s20  ;;  %1140 = vmatpush1.bf16.msra.mxu1 %v6369_v15  ;;  %v6382_v60 = vld [vmem:[%s9965_s3 + $0x20] ss:$8 sps:$4 sm:$0xff]  }
  0x3b   : > { %1028 = vmatprep.subr.bf16.mxu0 %v6370_v16  ;;  %1141 = vmatprep.subr.bf16.mxu1 %v6372_v17 }
  0x3d   : > { %6093 = vrot.lane.b32.xlu0 %v6092_v4, %s6805_s24  ;;  %1029 = vmatpush1.bf16.msra.mxu0 %v6374_v18 }
  0x3e   : > { %6098 = vrot.lane.b32.xlu1 %v6097_v6, %s9985_s20  ;;  %1142 = vmatpush1.bf16.msra.mxu1 %v6375_v19  ;;  %v6388_v19 = vld [vmem:[%s9965_s3 + $0x40] ss:$8 sps:$4 sm:$0xff]  }
  0x3f   : > { %3210 = vmatprep.subr.bf16.mxu1 %v6378_v20 }
  0x41   : > { %6103 = vrot.lane.b32.xlu0 %v6102_v12, %s6805_s24  ;;  %v530_v12 = vld [vmem:[%s6974_s17 + $0x38] sm:$0xff] }
  0x42   : > { %6108 = vrot.lane.b32.xlu1 %v6107_v13, %s10042_s19  ;;  %v6390_v13 = vld [vmem:[%s9965_s3 + $0x44] ss:$8 sps:$4 sm:$0xff]  }
  0x97   : > { %v6034_v21 = vpop.permute.xlu0 %6033 }
  0x98   : > { %v6044_v24 = vpop.permute.xlu1 %6043  ;;  %v6036_v25 = vunpack.i.h.bf16 %v6034_v21  ;;  %v6035_v26 = vunpack.i.l.bf16 %v6034_v21  ;;  %v6393_v21 = vld [vmem:[%s9965_s3 + $0x54] ss:$8 sps:$4 sm:$0xff]  }
  0x99   : > { %v6046_v30 = vunpack.i.h.bf16 %v6044_v24  ;;  %v6045_v31 = vunpack.i.l.bf16 %v6044_v24 }
  0x9a   : > { %v700_v35 = vsel %vm699_vm0, %v523_v22, %v6035_v26  ;;  %v701_v36 = vsel %vm699_vm0, %v524_v23, %v6036_v25 }
  0x9b   : > { %v6039_v27 = vpop.permute.xlu0 %6038  ;;  %v702_v48 = vsel %vm699_vm0, %v525_v32, %v6045_v31  ;;  %v703_v49 = vsel %vm699_vm0, %v526_v33, %v6046_v30  ;;  %v532_v30 = vld [vmem:[%s6974_s17 + $0x48] sm:$0xff] }
  0x9c   : > { %v6041_v28 = vunpack.i.h.bf16 %v6039_v27  ;;  %v6040_v29 = vunpack.i.l.bf16 %v6039_v27  ;;  %v6049_v34 = vpop.permute.xlu1 %6048  ;;  %v6396_v31 = vld [vmem:[%s9965_s3 + $0x64] ss:$8 sps:$4 sm:$0xff]  }
  0x9d   : > { %v6051_v37 = vunpack.i.h.bf16 %v6049_v34  ;;  %v6050_v38 = vunpack.i.l.bf16 %v6049_v34 }
  0x9e   : > { %v734_v40 = vpack.c.bf16 %v6041_v28, %v6040_v29  ;;  %v717_v41 = vsel %vm716_vm1, %v700_v35, %v6040_v29  ;;  %v718_v42 = vsel %vm716_vm1, %v701_v36, %v6041_v28  ;;  %v6391_v28 = vld [vmem:[%s9965_s3 + $0x50] ss:$8 sps:$4 sm:$0xff]   ;;  %v531_v29 = vld [vmem:[%s6974_s17 + $0x40] sm:$0xff] }
  0x9f   : > { %v736_v44 = vpack.c.bf16 %v6051_v37, %v6050_v38  ;;  %v733_v45 = vpack.c.bf16 %v718_v42, %v717_v41  ;;  %v6054_v46 = vpop.permute.xlu0 %6053  ;;  %v719_v58 = vsel %vm716_vm1, %v702_v48, %v6050_v38  ;;  %v720_v59 = vsel %vm716_vm1, %v703_v49, %v6051_v37  ;;  %v6394_v37 = vld [vmem:[%s9965_s3 + $0x60] ss:$8 sps:$4 sm:$0xff]   ;;  %v534_v48 = vld [vmem:[%s6974_s17 + $0x58] sm:$0xff]  ;;  %v6402_v49 = vld [vmem:[%s9965_s3 + $0x84] ss:$8 sps:$4 sm:$0xff]  }
  0xa0   : > { %5364 = vmatprep.mubr.msk.bf16.mxu0 %vm987_vm2, %v734_v40  ;;  %5372 = vmatprep.mubr.msk.bf16.mxu1 %vm987_vm2, %v734_v40  ;;  %v6059_v47 = vpop.permute.xlu1 %6058  ;;  %v6056_v56 = vunpack.i.h.bf16 %v6054_v46  ;;  %v6055_v57 = vunpack.i.l.bf16 %v6054_v46  ;;  %v735_v63 = vpack.c.bf16 %v720_v59, %v719_v58  ;;  %v6397_v46 = vld [vmem:[%s9965_s3 + $0x70] ss:$8 sps:$4 sm:$0xff]  }
  0xa1   : > { %1045 = vmatmul.mubr.bf16.vlgmr.msra.gmra.mrb[0].mxu0 %v733_v45  ;;  %1158 = vmatmul.mubr.bf16.vlgmr.msra.gmra.mrb[0].mxu1 %v733_v45  ;;  %v6061_v53 = vunpack.i.h.bf16 %v6059_v47  ;;  %v6060_v54 = vunpack.i.l.bf16 %v6059_v47  ;;  %v533_v47 = vld [vmem:[%s6974_s17 + $0x50] sm:$0xff] }
  0xa2   : > { %5365 = vmatprep.mubr.msk.bf16.mxu0 %vm987_vm2, %v736_v44  ;;  %5373 = vmatprep.mubr.msk.bf16.mxu1 %vm987_vm2, %v736_v44  ;;  %v704_v0 = vsel %vm699_vm0, %v527_v51, %v6055_v57  ;;  %v705_v1 = vsel %vm699_vm0, %v528_v52, %v6056_v56  ;;  %v6405_v57 = vld [vmem:[%s9965_s3 + $0x94] ss:$8 sps:$4 sm:$0xff]  }
  0xa3   : > { %3211 = vmatpush1.bf16.msra.mxu1 %v6376_v39  ;;  %v738_v61 = vpack.c.bf16 %v6061_v53, %v6060_v54  ;;  %v6064_v3 = vpop.permute.xlu0 %6063  ;;  %v721_v4 = vsel %vm716_vm1, %v704_v0, %v6060_v54  ;;  %v722_v5 = vsel %vm716_vm1, %v705_v1, %v6061_v53  ;;  %v6399_v39 = vld [vmem:[%s9965_s3 + $0x74] ss:$8 sps:$4 sm:$0xff]   ;;  %v6403_v0 = vld [vmem:[%s9965_s3 + $0x90] ss:$8 sps:$4 sm:$0xff]   ;;  %v535_v1 = vld [vmem:[%s6974_s17 + $0x60] sm:$0xff] }
  0xa4   : > { %3212 = vmatprep.subr.bf16.mxu1 %v6381_v43  ;;  %v6069_v2 = vpop.permute.xlu1 %6068  ;;  %v6066_v8 = vunpack.i.h.bf16 %v6064_v3  ;;  %v6065_v9 = vunpack.i.l.bf16 %v6064_v3  ;;  %v737_v14 = vpack.c.bf16 %v722_v5, %v721_v4  ;;  %v6408_v3 = vld [vmem:[%s9965_s3 + $0xa4] ss:$8 sps:$4 sm:$0xff]  }
  0xa5   : > { %v6071_v6 = vunpack.i.h.bf16 %v6069_v2  ;;  %v6070_v7 = vunpack.i.l.bf16 %v6069_v2  ;;  %v536_v2 = vld [vmem:[%s6974_s17 + $0x68] sm:$0xff] }
  0xa6   : > { %v706_v16 = vsel %vm699_vm0, %v529_v11, %v6065_v9  ;;  %v707_v17 = vsel %vm699_vm0, %v530_v12, %v6066_v8  ;;  %v6406_v9 = vld [vmem:[%s9965_s3 + $0xa0] ss:$8 sps:$4 sm:$0xff]   ;;  %v6411_v11 = vld [vmem:[%s9965_s3 + $0xb4] ss:$8 sps:$4 sm:$0xff]  }
  0xa7   : > { %3213 = vmatpush1.bf16.msra.mxu1 %v6379_v50  ;;  %v740_v15 = vpack.c.bf16 %v6071_v6, %v6070_v7  ;;  %v6074_v20 = vpop.permute.xlu0 %6073  ;;  %v723_v22 = vsel %vm716_vm1, %v706_v16, %v6070_v7  ;;  %v724_v23 = vsel %vm716_vm1, %v707_v17, %v6071_v6 }
  0xa8   : > { %3214 = vmatprep.subr.bf16.mxu1 %v6384_v55  ;;  %v6079_v18 = vpop.permute.xlu1 %6078  ;;  %v6076_v26 = vunpack.i.h.bf16 %v6074_v20  ;;  %v6075_v27 = vunpack.i.l.bf16 %v6074_v20  ;;  %v739_v32 = vpack.c.bf16 %v724_v23, %v723_v22  ;;  %v6400_v55 = vld [vmem:[%s9965_s3 + $0x80] ss:$8 sps:$4 sm:$0xff]   ;;  %v538_v20 = vld [vmem:[%s6974_s17 + $0x78] sm:$0x3f] }
  0xa9   : > { %1055 = vmatmul.mubr.bf16.gmra.mrb[4].mxu0 %v735_v63  ;;  %1168 = vmatmul.mubr.bf16.gmra.mrb[4].mxu1 %v735_v63  ;;  %v6081_v24 = vunpack.i.h.bf16 %v6079_v18  ;;  %v6080_v25 = vunpack.i.l.bf16 %v6079_v18  ;;  %v6409_v18 = vld [vmem:[%s9965_s3 + $0xb0] ss:$8 sps:$4 sm:$0xff]  }
  0xaa   : > { %5366 = vmatprep.mubr.msk.bf16.mxu0 %vm987_vm2, %v738_v61  ;;  %5374 = vmatprep.mubr.msk.bf16.mxu1 %vm987_vm2, %v738_v61  ;;  %v708_v34 = vsel %vm699_vm0, %v531_v29, %v6075_v27  ;;  %v709_v35 = vsel %vm699_vm0, %v532_v30, %v6076_v26  ;;  %v6412_v29 = vld [vmem:[%s9965_s3 + $0xc0] ss:$8 sps:$4 sm:$0xff]   ;;  %v6417_v30 = vld [vmem:[%s9965_s3 + $0xd4] ss:$8 sps:$4 sm:$0xff]  }
  0xab   : > { %3215 = vmatpush1.bf16.msra.mxu1 %v6382_v60  ;;  %v742_v33 = vpack.c.bf16 %v6081_v24, %v6080_v25  ;;  %v6084_v38 = vpop.permute.xlu0 %6083  ;;  %v725_v40 = vsel %vm716_vm1, %v708_v34, %v6080_v25  ;;  %v726_v41 = vsel %vm716_vm1, %v709_v35, %v6081_v24  ;;  %v6423_v34 = vld [vmem:[%s9965_s3 + $0xf4] ss:$8 sps:$4 sm:$0xff]   ;;  %v6421_v35 = vld [vmem:[%s9965_s3 + $0xf0] ss:$8 sps:$4 sm:$0xff]  }
  0xac   : > { %3216 = vmatprep.subr.bf16.mxu1 %v6387_v62  ;;  %v6089_v36 = vpop.permute.xlu1 %6088  ;;  %v6086_v44 = vunpack.i.h.bf16 %v6084_v38  ;;  %v6085_v45 = vunpack.i.l.bf16 %v6084_v38  ;;  %v741_v50 = vpack.c.bf16 %v726_v41, %v725_v40  ;;  %v6474_v38 = vld [vmem:[%s9965_s3 + $0x104] ss:$8 sps:$4 sm:$0xff]   ;;  %v6477_v40 = vld [vmem:[%s9965_s3 + $0x114] ss:$8 sps:$4 sm:$0xff]   ;;  %v6478_v41 = vld [vmem:[%s9965_s3 + $0x120] ss:$8 sps:$4 sm:$0xff]  }
  0xad   : > { %v6091_v42 = vunpack.i.h.bf16 %v6089_v36  ;;  %v6090_v43 = vunpack.i.l.bf16 %v6089_v36  ;;  %v6426_v36 = vld [vmem:[%s9965_s3 + $0x404] ss:$8 sps:$4 sm:$0xff]   ;;  %3323 = vmatprep.subr.bf16.mxu0 %v6474_v38  ;;  %v6514_v38 = vld [vmem:[%s9965_s3 + $0x1e0] ss:$8 sps:$4 sm:$0xff]  }
  0xae   : > { %v710_v52 = vsel %vm699_vm0, %v533_v47, %v6085_v45  ;;  %v711_v53 = vsel %vm699_vm0, %v534_v48, %v6086_v44  ;;  %v6483_v44 = vld [vmem:[%s9965_s3 + $0x134] ss:$8 sps:$4 sm:$0xff]   ;;  %v6484_v45 = vld [vmem:[%s9965_s3 + $0x140] ss:$8 sps:$4 sm:$0xff]   ;;  %v6487_v47 = vld [vmem:[%s9965_s3 + $0x150] ss:$8 sps:$4 sm:$0xff]  }
  0xaf   : > { %3217 = vmatpush1.bf16.msra.mxu1 %v6385_v10  ;;  %v744_v51 = vpack.c.bf16 %v6091_v42, %v6090_v43  ;;  %v6094_v56 = vpop.permute.xlu0 %6093  ;;  %v727_v58 = vsel %vm716_vm1, %v710_v52, %v6090_v43  ;;  %v728_v59 = vsel %vm716_vm1, %v711_v53, %v6091_v42  ;;  %v6480_v42 = vld [vmem:[%s9965_s3 + $0x124] ss:$8 sps:$4 sm:$0xff]   ;;  %v6481_v43 = vld [vmem:[%s9965_s3 + $0x130] ss:$8 sps:$4 sm:$0xff]   ;;  %v6489_v48 = vld [vmem:[%s9965_s3 + $0x154] ss:$8 sps:$4 sm:$0xff]  }
  0xb0   : > { %3218 = vmatprep.subr.bf16.mxu1 %v6390_v13  ;;  %v6099_v54 = vpop.permute.xlu1 %6098  ;;  %v6096_v62 = vunpack.i.h.bf16 %v6094_v56  ;;  %v6095_v63 = vunpack.i.l.bf16 %v6094_v56  ;;  %v743_v4 = vpack.c.bf16 %v728_v59, %v727_v58  ;;  %v6495_v52 = vld [vmem:[%s9965_s3 + $0x174] ss:$8 sps:$4 sm:$0xff]   ;;  %v6496_v53 = vld [vmem:[%s9965_s3 + $0x180] ss:$8 sps:$4 sm:$0xff]   ;;  %v6499_v56 = vld [vmem:[%s9965_s3 + $0x190] ss:$8 sps:$4 sm:$0xff]  }
  0xb1   : > { %1065 = vmatmul.mubr.bf16.gmra.mrb[8].mxu0 %v737_v14  ;;  %1178 = vmatmul.mubr.bf16.gmra.mrb[8].mxu1 %v737_v14  ;;  %v6101_v60 = vunpack.i.h.bf16 %v6099_v54  ;;  %v6100_v61 = vunpack.i.l.bf16 %v6099_v54  ;;  %v6498_v54 = vld [vmem:[%s9965_s3 + $0x184] ss:$8 sps:$4 sm:$0xff]   ;;  %v6502_v59 = vld [vmem:[%s9965_s3 + $0x1a0] ss:$8 sps:$4 sm:$0xff]  }
  0xb2   : > { %5367 = vmatprep.mubr.msk.bf16.mxu0 %vm987_vm2, %v740_v15  ;;  %5375 = vmatprep.mubr.msk.bf16.mxu1 %vm987_vm2, %v740_v15  ;;  %v712_v6 = vsel %vm699_vm0, %v535_v1, %v6095_v63  ;;  %v713_v7 = vsel %vm699_vm0, %v536_v2, %v6096_v62  ;;  %v785_v63 = vld [vmem:[%s9964_s2] sm:$0xf]  ;;  %v6505_v2 = vld [vmem:[%s9965_s3 + $0x1b0] ss:$8 sps:$4 sm:$0xff]  }
  0xb3   : > { %3219 = vmatpush1.bf16.msra.mxu1 %v6388_v19  ;;  %v746_v5 = vpack.c.bf16 %v6101_v60, %v6100_v61  ;;  %v6104_v10 = vpop.permute.xlu0 %6103  ;;  %v729_v12 = vsel %vm716_vm1, %v712_v6, %v6100_v61  ;;  %v730_v13 = vsel %vm716_vm1, %v713_v7, %v6101_v60  ;;  %v537_v19 = vld [vmem:[%s6974_s17 + $0x70] sm:$0xff]  ;;  %v6504_v60 = vld [vmem:[%s9965_s3 + $0x1a4] ss:$8 sps:$4 sm:$0xff]  }
  0xb4   : > { %3220 = vmatprep.subr.bf16.mxu1 %v6393_v21  ;;  %v6109_v8 = vpop.permute.xlu1 %6108  ;;  %v6106_v16 = vunpack.i.h.bf16 %v6104_v10  ;;  %v6105_v17 = vunpack.i.l.bf16 %v6104_v10  ;;  %v745_v21 = vpack.c.bf16 %v730_v13, %v729_v12  ;;  %v6510_v6 = vld [vmem:[%s9965_s3 + $0x1c4] ss:$8 sps:$4 sm:$0xff]   ;;  %v6513_v12 = vld [vmem:[%s9965_s3 + $0x1d4] ss:$8 sps:$4 sm:$0xff]  }
  0xb5   : > { %v6111_v14 = vunpack.i.h.bf16 %v6109_v8  ;;  %v6110_v15 = vunpack.i.l.bf16 %v6109_v8 }
  0xb6   : > { %v714_v23 = vsel %vm699_vm0, %v537_v19, %v6105_v17  ;;  %v715_v24 = vsel %vm699_vm0, %v538_v20, %v6106_v16 }
  0xb7   : > { %3221 = vmatpush1.bf16.msra.mxu1 %v6391_v28  ;;  %v748_v22 = vpack.c.bf16 %v6111_v14, %v6110_v15  ;;  %v731_v25 = vsel %vm716_vm1, %v714_v23, %v6110_v15  ;;  %v732_v26 = vsel %vm716_vm1, %v715_v24, %v6111_v14  ;;  %v6414_v28 = vld [vmem:[%s9965_s3 + $0xc4] ss:$8 sps:$4 sm:$0xff]  }
  0xb8   : > { %3222 = vmatprep.subr.bf16.mxu1 %v6396_v31  ;;  %v747_v27 = vpack.c.bf16 %v732_v26, %v731_v25  ;;  %v6415_v31 = vld [vmem:[%s9965_s3 + $0xd0] ss:$8 sps:$4 sm:$0xff]  }
  0xb9   : > { %1075 = vmatmul.mubr.bf16.gmra.mrb[12].mxu0 %v739_v32  ;;  %1188 = vmatmul.mubr.bf16.gmra.mrb[12].mxu1 %v739_v32  ;;  %v6420_v32 = vld [vmem:[%s9965_s3 + $0xe4] ss:$8 sps:$4 sm:$0xff]  }
  0xba   : > { %5368 = vmatprep.mubr.msk.bf16.mxu0 %vm987_vm2, %v742_v33  ;;  %5376 = vmatprep.mubr.msk.bf16.mxu1 %vm987_vm2, %v742_v33  ;;  %v6418_v33 = vld [vmem:[%s9965_s3 + $0xe0] ss:$8 sps:$4 sm:$0xff]  }
  0xbb   : > { %3223 = vmatpush1.bf16.msra.mxu1 %v6394_v37  ;;  %v6472_v37 = vld [vmem:[%s9965_s3 + $0x100] ss:$8 sps:$4 sm:$0xff]  }
  0xbc   : > { %3224 = vmatprep.subr.bf16.mxu1 %v6399_v39  ;;  %3324 = vmatpush1.bf16.msra.mxu0 %v6472_v37  ;;  %v6475_v39 = vld [vmem:[%s9965_s3 + $0x110] ss:$8 sps:$4 sm:$0xff]  }
  0xbd   : > { %3325 = vmatprep.subr.bf16.mxu0 %v6477_v40 }
  0xbf   : > { %3225 = vmatpush1.bf16.msra.mxu1 %v6397_v46  ;;  %v6486_v46 = vld [vmem:[%s9965_s3 + $0x144] ss:$8 sps:$4 sm:$0xff]  }
  0xc0   : > { %3226 = vmatprep.subr.bf16.mxu1 %v6402_v49  ;;  %3326 = vmatpush1.bf16.msra.mxu0 %v6475_v39  ;;  %v6490_v49 = vld [vmem:[%s9965_s3 + $0x160] ss:$8 sps:$4 sm:$0xff]  }
  0xc1   : > { %1085 = vmatmul.mubr.bf16.gmra.mrb[16].mxu0 %v741_v50  ;;  %1198 = vmatmul.mubr.bf16.gmra.mrb[16].mxu1 %v741_v50  ;;  %v6492_v50 = vld [vmem:[%s9965_s3 + $0x164] ss:$8 sps:$4 sm:$0xff]  }
  0xc2   : > { %5369 = vmatprep.mubr.msk.bf16.mxu0 %vm987_vm2, %v744_v51  ;;  %5377 = vmatprep.mubr.msk.bf16.mxu1 %vm987_vm2, %v744_v51  ;;  %v6493_v51 = vld [vmem:[%s9965_s3 + $0x170] ss:$8 sps:$4 sm:$0xff]  }
  0xc3   : > { %3227 = vmatpush1.bf16.msra.mxu1 %v6400_v55  ;;  %3327 = vmatprep.subr.bf16.mxu0 %v6480_v42  ;;  %v787_v55 = vlaneseq  ;;  %v6424_v42 = vld [vmem:[%s9965_s3 + $0x400] ss:$8 sps:$4 sm:$0xff]  }
  0xc4   : > { %3228 = vmatprep.subr.bf16.mxu1 %v6405_v57  ;;  %3328 = vmatpush1.bf16.msra.mxu0 %v6478_v41  ;;  %v6501_v57 = vld [vmem:[%s9965_s3 + $0x194] ss:$8 sps:$4 sm:$0xff]  }
  0xc5   : > { %3329 = vmatprep.subr.bf16.mxu0 %v6483_v44  ;;  %v7331_v58 = vshrl.u32 %v787_v55, 7 }
  0xc7   : > { %3229 = vmatpush1.bf16.msra.mxu1 %v6403_v0  ;;  %10043 = vst [vmem:[#allocation14_spill] sm:$0xff] %v7331_v58  ;;  %v9988_v61 = vsub.s32 0, %v7331_v58  ;;  %v797_v62 = vsub.s32 2, %v7331_v58  ;;  %v9987_v0 = vsub.s32 1, %v7331_v58  ;;  %v801_v1 = vsub.s32 3, %v7331_v58 }
  0xc8   : > { %3230 = vmatprep.subr.bf16.mxu1 %v6408_v3  ;;  %3330 = vmatpush1.bf16.msra.mxu0 %v6481_v43  ;;  %v6507_v3 = vld [vmem:[%s9965_s3 + $0x1b4] ss:$8 sps:$4 sm:$0xff]  }
  0xc9   : > { %1095 = vmatmul.mubr.bf16.gmra.mrb[20].mxu0 %v743_v4  ;;  %1208 = vmatmul.mubr.bf16.gmra.mrb[20].mxu1 %v743_v4  ;;  %v7354_v4 = vrot.slane %v785_v63, %v9988_v61  ;;  %v7363_v7 = vrot.slane %v785_v63, %v9987_v0  ;;  %v7365_v8 = vrot.slane %v785_v63, %v801_v1  ;;  %v6519_v43 = vld [vmem:[%s9965_s3 + $0x1f4] ss:$8 sps:$4 sm:$0xff]  }
  0xca   : > { %5370 = vmatprep.mubr.msk.bf16.mxu0 %vm987_vm2, %v746_v5  ;;  %5378 = vmatprep.mubr.msk.bf16.mxu1 %vm987_vm2, %v746_v5  ;;  %v7356_v5 = vrot.slane %v785_v63, %v797_v62  ;;  %v6517_v62 = vld [vmem:[%s9965_s3 + $0x1f0] ss:$8 sps:$4 sm:$0xff]   ;;  %v6453_v0 = vld [vmem:[%s9965_s3 + $0x494] ss:$8 sps:$4 sm:$0xff]  }
  0xcb   : > { %3231 = vmatpush1.bf16.msra.mxu1 %v6406_v9  ;;  %3331 = vmatprep.subr.bf16.mxu0 %v6486_v46  ;;  %v6508_v9 = vld [vmem:[%s9965_s3 + $0x1c0] ss:$8 sps:$4 sm:$0xff]  }
  0xcc   : > { %3232 = vmatprep.subr.bf16.mxu1 %v6411_v11  ;;  %3332 = vmatpush1.bf16.msra.mxu0 %v6484_v45 }
  0xcd   : > { %3333 = vmatprep.subr.bf16.mxu0 %v6489_v48  ;;  %v6429_v48 = vld [vmem:[%s9965_s3 + $0x414] ss:$8 sps:$4 sm:$0xff]  }
  0xcf   : > { %3233 = vmatpush1.bf16.msra.mxu1 %v6409_v18 }
  0xd0   : > { %3234 = vmatprep.subr.bf16.mxu1 %v6414_v28  ;;  %3334 = vmatpush1.bf16.msra.mxu0 %v6487_v47 }
  0xd1   : > { %1105 = vmatmul.mubr.bf16.gmra.mrb[24].mxu0 %v745_v21  ;;  %1218 = vmatmul.mubr.bf16.gmra.mrb[24].mxu1 %v745_v21 }
  0xd2   : > { %5371 = vmatprep.mubr.msk.bf16.mxu0 %vm987_vm2, %v748_v22  ;;  %5379 = vmatprep.mubr.msk.bf16.mxu1 %vm987_vm2, %v748_v22 }
  0xd3   : > { %3235 = vmatpush1.bf16.msra.mxu1 %v6412_v29  ;;  %3335 = vmatprep.subr.bf16.mxu0 %v6492_v50 }
  0xd4   : > { %3236 = vmatprep.subr.bf16.mxu1 %v6417_v30  ;;  %3336 = vmatpush1.bf16.msra.mxu0 %v6490_v49 }
  0xd5   : > { %3337 = vmatprep.subr.bf16.mxu0 %v6495_v52 }
  0xd7   : > { %3237 = vmatpush1.bf16.msra.mxu1 %v6415_v31 }
  0xd8   : > { %3238 = vmatprep.subr.bf16.mxu1 %v6420_v32  ;;  %3338 = vmatpush1.bf16.msra.mxu0 %v6493_v51  ;;  %v6516_v32 = vld [vmem:[%s9965_s3 + $0x1e4] ss:$8 sps:$4 sm:$0xff]  }
  0xd9   : > { %1115 = vmatmul.mubr.bf16.gmra.mrb[28].mxu0 %v747_v27  ;;  %1228 = vmatmul.mubr.bf16.gmra.mrb[28].mxu1 %v747_v27  ;;  %v6511_v27 = vld [vmem:[%s9965_s3 + $0x1d0] ss:$8 sps:$4 sm:$0xff]  }
  0xda   : > { %3339 = vmatprep.subr.bf16.mxu0 %v6498_v54 }
  0xdb   : > { %3239 = vmatpush1.bf16.msra.mxu1 %v6418_v33 }
  0xdc   : > { %3240 = vmatprep.subr.bf16.mxu1 %v6423_v34  ;;  %3340 = vmatpush1.bf16.msra.mxu0 %v6496_v53 }
  0xdd   : > { %3341 = vmatprep.subr.bf16.mxu0 %v6501_v57 }
  0xdf   : > { %3241 = vmatpush1.bf16.msra.mxu1 %v6421_v35 }
  0xe0   : > { %5793 = vmatprep.subr.bf16.mxu1 %v6426_v36  ;;  %3342 = vmatpush1.bf16.msra.mxu0 %v6499_v56 }
  0xe1   : > { %3343 = vmatprep.subr.bf16.mxu0 %v6504_v60 }
  0xe4   : > { %3344 = vmatpush1.bf16.msra.mxu0 %v6502_v59 }
  0xe5   : > { %3345 = vmatprep.subr.bf16.mxu0 %v6507_v3 }
  0xe8   : > { %3346 = vmatpush1.bf16.msra.mxu0 %v6505_v2 }
  0xe9   : > { %3347 = vmatprep.subr.bf16.mxu0 %v6510_v6  ;;  %v6427_v6 = vld [vmem:[%s9965_s3 + $0x410] ss:$8 sps:$4 sm:$0xff]  }
  0xec   : > { %3348 = vmatpush1.bf16.msra.mxu0 %v6508_v9 }
  0xed   : > { %3349 = vmatprep.subr.bf16.mxu0 %v6513_v12 }
  0xf0   : > { %3350 = vmatpush1.bf16.msra.mxu0 %v6511_v27 }
  0xf1   : > { %3351 = vmatprep.subr.bf16.mxu0 %v6516_v32 }
  0xf4   : > { %3352 = vmatpush1.bf16.msra.mxu0 %v6514_v38 }
  0xf5   : > { %3353 = vmatprep.subr.bf16.mxu0 %v6519_v43 }
  0xf8   : > { %3354 = vmatpush1.bf16.msra.mxu0 %v6517_v62 }
 0x174   : > { %v1046_v10 = vpop.f32.mrb[0].mxu0  ;;  %v1159_v11 = vpop.f32.mrb[0].mxu1 }
 0x175   : > { %v1047_v13 = vadd.f32 %v1046_v10, %v7354_v4  ;;  %v1160_v14 = vadd.f32 %v1159_v11, %v7356_v5  ;;  %v1048_v15 = vpop.f32.mrb[1].mxu0  ;;  %v1161_v16 = vpop.f32.mrb[1].mxu1 }
 0x176   : > { %v1049_v17 = vadd.f32 %v1048_v15, %v7363_v7  ;;  %v1162_v18 = vadd.f32 %v1161_v16, %v7365_v8  ;;  %v1050_v19 = vpop.f32.mrb[2].mxu0  ;;  %v1163_v20 = vpop.f32.mrb[2].mxu1 }
 0x177   : > { %v1238_v21 = vmax.f32 %v1047_v13, 0.0  ;;  %v1240_v22 = vmax.f32 %v1160_v14, 0.0  ;;  %v1051_v23 = vadd.f32 %v1050_v19, %v7354_v4  ;;  %v7379_v24 = vadd.f32 %v1163_v20, %v7356_v5  ;;  %v1052_v25 = vpop.f32.mrb[3].mxu0  ;;  %v1165_v26 = vpop.f32.mrb[3].mxu1  ;;  %v6432_v14 = vld [vmem:[%s9965_s3 + $0x424] ss:$8 sps:$4 sm:$0xff]  }
 0x178   : > { %v1239_v28 = vmax.f32 %v1049_v17, 0.0  ;;  %v1241_v29 = vmax.f32 %v1162_v18, 0.0  ;;  %v1053_v30 = vadd.f32 %v1052_v25, %v7363_v7  ;;  %v1166_v31 = vadd.f32 %v1165_v26, %v7365_v8  ;;  %v6522_v25 = vld [vmem:[%s9965_s3 + $0x204] ss:$8 sps:$4 sm:$0xff]  }
 0x179   : > { %1302 = vst [vmem:[#allocation2] sm:$0xff] %v1238_v21  ;;  %1304 = vst [vmem:[#allocation2 + $0x10] sm:$0xff] %v1240_v22  ;;  %v7389_v33 = vmax.f32 %v1051_v23, 0.0  ;;  %v1244_v34 = vmax.f32 %v7379_v24, 0.0  ;;  %v6430_v23 = vld [vmem:[%s9965_s3 + $0x420] ss:$8 sps:$4 sm:$0xff]   ;;  %3436 = vmatprep.subr.bf16.mxu0 %v6522_v25 }
 0x17a   : > { %1303 = vst [vmem:[#allocation2 + $0x8] sm:$0xff] %v1239_v28  ;;  %1306 = vst.msk [vmem:[#allocation2 + $0x18] sm:$0xff] %vm1305_vm3, %v1241_v29  ;;  %v7393_v35 = vmax.f32 %v1053_v30, 0.0  ;;  %v1245_v36 = vmax.f32 %v1166_v31, 0.0  ;;  %v6435_v31 = vld [vmem:[%s9965_s3 + $0x434] ss:$8 sps:$4 sm:$0xff]  }
 0x17b   : > { %1307 = vst [vmem:[#allocation2 + $0x20] sm:$0xff] %v7389_v33  ;;  %1309 = vst [vmem:[#allocation2 + $0x30] sm:$0xff] %v1244_v34  ;;  %v2090_v37 = vpack.c.bf16 %v7389_v33, %v1238_v21  ;;  %v1514_v53 = vrot.slane %v7389_v33, 1 }
 0x17c   : > { %1308 = vst [vmem:[#allocation2 + $0x28] sm:$0xff] %v7393_v35  ;;  %1310 = vst.msk [vmem:[#allocation2 + $0x38] sm:$0xff] %vm1305_vm3, %v1245_v36  ;;  %v1056_v39 = vpop.f32.mrb[4].mxu0  ;;  %v1169_v40 = vpop.f32.mrb[4].mxu1  ;;  %v2091_v41 = vpack.c.bf16 %v7393_v35, %v1239_v28  ;;  %v1517_v62 = vrot.slane %v7393_v35, 1 }
 0x17d   : > { %v1057_v44 = vadd.f32 %v1056_v39, %v7354_v4  ;;  %v7413_v45 = vadd.f32 %v1169_v40, %v7356_v5  ;;  %v1058_v46 = vpop.f32.mrb[5].mxu0  ;;  %v1171_v47 = vpop.f32.mrb[5].mxu1 }
 0x17e   : > { %v1059_v49 = vadd.f32 %v1058_v46, %v7363_v7  ;;  %v1172_v50 = vadd.f32 %v1171_v47, %v7365_v8  ;;  %v1060_v51 = vpop.f32.mrb[6].mxu0  ;;  %v1173_v52 = vpop.f32.mrb[6].mxu1  ;;  %3242 = vmatprep.mubr.bf16.mxu1 %v2091_v41 }
 0x17f   : > { %v7421_v54 = vmax.f32 %v1057_v44, 0.0  ;;  %v1248_v55 = vmax.f32 %v7413_v45, 0.0  ;;  %v1061_v56 = vadd.f32 %v1060_v51, %v7354_v4  ;;  %v7426_v57 = vadd.f32 %v1173_v52, %v7356_v5  ;;  %v1062_v59 = vpop.f32.mrb[7].mxu0  ;;  %v1175_v60 = vpop.f32.mrb[7].mxu1  ;;  %3243 = vmatmul.mubr.bf16.vlgmr.msra.gmra.mrb[32].mxu1 %v2090_v37 }
 0x180   : > { %v7431_v63 = vmax.f32 %v1059_v49, 0.0  ;;  %v1249_v1 = vmax.f32 %v1172_v50, 0.0  ;;  %v1063_v2 = vadd.f32 %v1062_v59, %v7363_v7  ;;  %v1176_v3 = vadd.f32 %v1175_v60, %v7365_v8  ;;  %5809 = vmatpush1.bf16.msra.mxu1 %v6424_v42  ;;  %v1432_v9 = vld [vmem:[#allocation2] sm:$0xfe]  ;;  %v6433_v50 = vld [vmem:[%s9965_s3 + $0x430] ss:$8 sps:$4 sm:$0xff]  }
 0x181   : > { %1311 = vst [vmem:[#allocation2 + $0x40] sm:$0xff] %v7421_v54  ;;  %1313 = vst [vmem:[#allocation2 + $0x50] sm:$0xff] %v1248_v55  ;;  %v7441_v10 = vmax.f32 %v1061_v56, 0.0  ;;  %v1252_v11 = vmax.f32 %v7426_v57, 0.0  ;;  %5794 = vmatprep.subr.bf16.mxu1 %v6429_v48  ;;  %v1513_v12 = vrot.slane %v1432_v9, 1  ;;  %v1525_v13 = vrot.slane %v7421_v54, 1 }
 0x182   : > { %1314 = vst.msk [vmem:[#allocation2 + $0x58] sm:$0xff] %vm1305_vm3, %v1249_v1  ;;  %v7449_v15 = vmax.f32 %v1063_v2, 0.0  ;;  %v1253_v16 = vmax.f32 %v1176_v3, 0.0  ;;  %v7502_v60 = vld [vmem:[#allocation2 + $0x8] sm:$0xfe] }
 0x183   : > { %1315 = vst [vmem:[#allocation2 + $0x60] sm:$0xff] %v7441_v10  ;;  %1317 = vst [vmem:[#allocation2 + $0x70] sm:$0xff] %v1252_v11  ;;  %v1515_v17 = vsel %vm1512_vm4, %v1513_v12, %v1514_v53  ;;  %v1526_v18 = vsel %vm1512_vm4, %v1514_v53, %v1525_v13  ;;  %v2101_v30 = vpack.c.bf16 %v7441_v10, %v7421_v54  ;;  %v1533_v38 = vrot.slane %v7441_v10, 1  ;;  %v6438_v54 = vld [vmem:[%s9965_s3 + $0x444] ss:$8 sps:$4 sm:$0xff]  }
 0x184   : > { %1318 = vst.msk [vmem:[#allocation2 + $0x78] sm:$0xff] %vm1305_vm3, %v1253_v16  ;;  %v1066_v19 = vpop.f32.mrb[8].mxu0  ;;  %v1179_v20 = vpop.f32.mrb[8].mxu1  ;;  %5810 = vmatpush1.bf16.msra.mxu1 %v6427_v6  ;;  %v6112_v21 = vpack.i.bf16 %v1526_v18, %v1515_v17  ;;  %v2102_v22 = vpack.c.bf16 %v7449_v15, %v7431_v63  ;;  %v7511_v3 = vld [vmem:[#allocation2 + $0x10] sm:$0xfe]  ;;  %v7515_v6 = vrot.slane %v1244_v34, 1 }
 0x185   : > { %v1067_v26 = vadd.f32 %v1066_v19, %v7354_v4  ;;  %v1180_v27 = vadd.f32 %v1179_v20, %v7356_v5  ;;  %v1068_v28 = vpop.f32.mrb[9].mxu0  ;;  %v1181_v29 = vpop.f32.mrb[9].mxu1  ;;  %5795 = vmatprep.subr.bf16.mxu1 %v6432_v14  ;;  %v1534_v1 = vsel %vm1512_vm4, %v1525_v13, %v1533_v38  ;;  %v1527_v12 = vrot.slane %v7431_v63, 1  ;;  %v6436_v17 = vld [vmem:[%s9965_s3 + $0x440] ss:$8 sps:$4 sm:$0xff]  }
 0x186   : > { %v1069_v32 = vadd.f32 %v1068_v28, %v7363_v7  ;;  %v1182_v33 = vadd.f32 %v1181_v29, %v7365_v8  ;;  %v1070_v36 = vpop.f32.mrb[10].mxu0  ;;  %v1183_v37 = vpop.f32.mrb[10].mxu1  ;;  %6113 = vrot.lane.b32.xlu0 %v6112_v21, %s6807_s29  ;;  %3252 = vmatprep.mubr.bf16.mxu1 %v2102_v22  ;;  %v9991_v14 = vrot.slane %v7449_v15, 1  ;;  %v6441_v21 = vld [vmem:[%s9965_s3 + $0x454] ss:$8 sps:$4 sm:$0xff]   ;;  %v1516_v22 = vrot.slane %v7502_v60, 1 }
 0x187   : > { %v7476_v39 = vmax.f32 %v1067_v26, 0.0  ;;  %v7478_v40 = vmax.f32 %v1180_v27, 0.0  ;;  %v1071_v41 = vadd.f32 %v1070_v36, %v7354_v4  ;;  %v1184_v42 = vadd.f32 %v1183_v37, %v7356_v5  ;;  %v1072_v43 = vpop.f32.mrb[11].mxu0  ;;  %v1185_v44 = vpop.f32.mrb[11].mxu1  ;;  %3253 = vmatmul.mubr.bf16.gmra.mrb[36].mxu1 %v2101_v30 }
 0x188   : > { %v7482_v46 = vmax.f32 %v1069_v32, 0.0  ;;  %v1257_v47 = vmax.f32 %v1182_v33, 0.0  ;;  %v1073_v48 = vadd.f32 %v1072_v43, %v7363_v7  ;;  %v1186_v49 = vadd.f32 %v1185_v44, %v7365_v8  ;;  %5811 = vmatpush1.bf16.msra.mxu1 %v6430_v23  ;;  %v6439_v44 = vld [vmem:[%s9965_s3 + $0x450] ss:$8 sps:$4 sm:$0xff]  }
 0x189   : > { %10044 = vst [vmem:[#allocation15_spill] sm:$0xff] %v7478_v40  ;;  %1319 = vst [vmem:[#allocation2 + $0x80] sm:$0xff] %v7476_v39  ;;  %v7491_v51 = vmax.f32 %v1071_v41, 0.0  ;;  %v7493_v52 = vmax.f32 %v1184_v42, 0.0  ;;  %5796 = vmatprep.subr.bf16.mxu1 %v6435_v31  ;;  %v1541_v53 = vrot.slane %v7476_v39, 1  ;;  %v1519_v29 = vrot.slane %v7511_v3, 1 }
 0x18a   : > { %10045 = vst [vmem:[#allocation16_spill] sm:$0xff] %v7482_v46  ;;  %1321 = vst [vmem:[#allocation2 + $0x90] sm:$0xff] %v7478_v40  ;;  %v7500_v56 = vmax.f32 %v1073_v48, 0.0  ;;  %v1261_v59 = vmax.f32 %v1186_v49, 0.0  ;;  %v7675_v3 = vrot.slane %v1252_v11, 1 }
 0x18b   : > { %1322 = vst.msk [vmem:[#allocation2 + $0x98] sm:$0xff] %vm1305_vm3, %v1257_v47  ;;  %1323 = vst [vmem:[#allocation2 + $0xa0] sm:$0xff] %v7491_v51  ;;  %v1542_v2 = vsel %vm1512_vm4, %v1533_v38, %v1541_v53  ;;  %v2112_v20 = vpack.c.bf16 %v7491_v51, %v7476_v39  ;;  %v1549_v28 = vrot.slane %v7491_v51, 1  ;;  %v9989_v51 = vrot.slane %v7478_v40, 2  ;;  %v6442_v39 = vld [vmem:[%s9965_s3 + $0x460] ss:$8 sps:$4 sm:$0xff]  }
 0x18c   : > { %1325 = vst [vmem:[#allocation2 + $0xb0] sm:$0xff] %v7493_v52  ;;  %1326 = vst.msk [vmem:[#allocation2 + $0xb8] sm:$0xff] %vm1305_vm3, %v1261_v59  ;;  %v1076_v9 = vpop.f32.mrb[12].mxu0  ;;  %v1189_v10 = vpop.f32.mrb[12].mxu1  ;;  %5812 = vmatpush1.bf16.msra.mxu1 %v6433_v50  ;;  %v6117_v13 = vpack.i.bf16 %v1542_v2, %v1534_v1  ;;  %v2113_v16 = vpack.c.bf16 %v7500_v56, %v7482_v46  ;;  %v6444_v50 = vld [vmem:[%s9965_s3 + $0x464] ss:$8 sps:$4 sm:$0xff]  }
 0x18d   : > { %v1077_v24 = vadd.f32 %v1076_v9, %v7354_v4  ;;  %v1190_v34 = vadd.f32 %v1189_v10, %v7356_v5  ;;  %v1078_v18 = vpop.f32.mrb[13].mxu0  ;;  %v1191_v19 = vpop.f32.mrb[13].mxu1  ;;  %5797 = vmatprep.subr.bf16.mxu1 %v6438_v54  ;;  %v1926_v1 = vrot.slane %v7493_v52, 2  ;;  %v1550_v10 = vsel %vm1512_vm4, %v1541_v53, %v1549_v28  ;;  %v6451_v11 = vld [vmem:[%s9965_s3 + $0x490] ss:$8 sps:$4 sm:$0xff]  }
 0x18e   : > { %v1079_v23 = vadd.f32 %v1078_v18, %v7363_v7  ;;  %v1192_v25 = vadd.f32 %v1191_v19, %v7365_v8  ;;  %v1080_v26 = vpop.f32.mrb[14].mxu0  ;;  %v1193_v27 = vpop.f32.mrb[14].mxu1  ;;  %6118 = vrot.lane.b32.xlu1 %v6117_v13, %s6807_s29  ;;  %3262 = vmatprep.mubr.bf16.mxu1 %v2113_v16  ;;  %v7585_v53 = vsel %vm1512_vm4, %v1516_v22, %v1517_v62 }
 0x18f   : > { %v7538_v30 = vmax.f32 %v1077_v24, 0.0  ;;  %v7540_v31 = vmax.f32 %v1190_v34, 0.0  ;;  %v1081_v32 = vadd.f32 %v1080_v26, %v7354_v4  ;;  %v1194_v33 = vadd.f32 %v1193_v27, %v7356_v5  ;;  %v1082_v36 = vpop.f32.mrb[15].mxu0  ;;  %v1195_v37 = vpop.f32.mrb[15].mxu1  ;;  %3263 = vmatmul.mubr.bf16.gmra.mrb[40].mxu1 %v2112_v20  ;;  %v6447_v26 = vld [vmem:[%s9965_s3 + $0x474] ss:$8 sps:$4 sm:$0xff]  }
 0x190   : > { %v7544_v38 = vmax.f32 %v1079_v23, 0.0  ;;  %v1265_v41 = vmax.f32 %v1192_v25, 0.0  ;;  %v1083_v42 = vadd.f32 %v1082_v36, %v7363_v7  ;;  %v1196_v43 = vadd.f32 %v1195_v37, %v7365_v8  ;;  %5813 = vmatpush1.bf16.msra.mxu1 %v6436_v17 }
 0x191   : > { %10046 = vst [vmem:[#allocation17_spill] sm:$0xff] %v7538_v30  ;;  %1329 = vst [vmem:[#allocation2 + $0xd0] sm:$0xff] %v7540_v31  ;;  %v7552_v47 = vmax.f32 %v1081_v32, 0.0  ;;  %v7554_v48 = vmax.f32 %v1194_v33, 0.0  ;;  %5798 = vmatprep.subr.bf16.mxu1 %v6441_v21  ;;  %v1557_v49 = vrot.slane %v7538_v30, 1  ;;  %v7596_v27 = vrot.slane %v1248_v55, 1 }
 0x192   : > { %1330 = vst.msk [vmem:[#allocation2 + $0xd8] sm:$0xff] %vm1305_vm3, %v1265_v41  ;;  %v7562_v54 = vmax.f32 %v1083_v42, 0.0  ;;  %v1269_v59 = vmax.f32 %v1196_v43, 0.0  ;;  %v7607_v37 = vsel %vm1885_vm5, %v9989_v51, %v1926_v1 }
 0x193   : > { %1333 = vst [vmem:[#allocation2 + $0xf0] sm:$0xff] %v7554_v48  ;;  %v1558_v13 = vsel %vm1512_vm4, %v1549_v28, %v1557_v49  ;;  %v2123_v25 = vpack.c.bf16 %v7552_v47, %v7538_v30  ;;  %v1565_v36 = vrot.slane %v7552_v47, 1 }
 0x194   : > { %1334 = vst.msk [vmem:[#allocation2 + $0xf8] sm:$0xff] %vm1305_vm3, %v1269_v59  ;;  %v1086_v16 = vpop.f32.mrb[16].mxu0  ;;  %v1199_v17 = vpop.f32.mrb[16].mxu1  ;;  %5814 = vmatpush1.bf16.msra.mxu1 %v6439_v44  ;;  %v6122_v34 = vpack.i.bf16 %v1558_v13, %v1550_v10  ;;  %v2124_v18 = vpack.c.bf16 %v7562_v54, %v7544_v38 }
 0x195   : > { %v1087_v19 = vadd.f32 %v1086_v16, %v7354_v4  ;;  %v1200_v20 = vadd.f32 %v1199_v17, %v7356_v5  ;;  %v1088_v21 = vpop.f32.mrb[17].mxu0  ;;  %v1201_v23 = vpop.f32.mrb[17].mxu1  ;;  %5799 = vmatprep.subr.bf16.mxu1 %v6444_v50  ;;  %v6445_v16 = vld [vmem:[%s9965_s3 + $0x470] ss:$8 sps:$4 sm:$0xff]  }
 0x196   : > { %v1089_v22 = vadd.f32 %v1088_v21, %v7363_v7  ;;  %v1202_v28 = vadd.f32 %v1201_v23, %v7365_v8  ;;  %v1090_v32 = vpop.f32.mrb[18].mxu0  ;;  %v1203_v33 = vpop.f32.mrb[18].mxu1  ;;  %6123 = vrot.lane.b32.xlu0 %v6122_v34, %s6807_s29  ;;  %3272 = vmatprep.mubr.bf16.mxu1 %v2124_v18 }
 0x197   : > { %v7609_v45 = vmax.f32 %v1087_v19, 0.0  ;;  %v7611_v55 = vmax.f32 %v1200_v20, 0.0  ;;  %v1091_v41 = vadd.f32 %v1090_v32, %v7354_v4  ;;  %v1204_v42 = vadd.f32 %v1203_v33, %v7356_v5  ;;  %v1092_v43 = vpop.f32.mrb[19].mxu0  ;;  %v1205_v44 = vpop.f32.mrb[19].mxu1  ;;  %3273 = vmatmul.mubr.bf16.gmra.mrb[44].mxu1 %v2123_v25  ;;  %v6450_v20 = vld [vmem:[%s9965_s3 + $0x484] ss:$8 sps:$4 sm:$0xff]  }
 0x198   : > { %v7615_v50 = vmax.f32 %v1089_v22, 0.0  ;;  %v1273_v59 = vmax.f32 %v1202_v28, 0.0  ;;  %v1093_v10 = vadd.f32 %v1092_v43, %v7363_v7  ;;  %v1206_v13 = vadd.f32 %v1205_v44, %v7365_v8  ;;  %5815 = vmatpush1.bf16.msra.mxu1 %v6442_v39 }
 0x199   : > { %10047 = vst [vmem:[#allocation18_spill] sm:$0xff] %v7609_v45  ;;  %v7622_v17 = vmax.f32 %v1091_v41, 0.0  ;;  %v7624_v34 = vmax.f32 %v1204_v42, 0.0  ;;  %5800 = vmatprep.subr.bf16.mxu1 %v6447_v26  ;;  %v1573_v19 = vrot.slane %v7609_v45, 1  ;;  %v9990_v25 = vrot.slane %v7540_v31, 2 }
 0x19a   : > { %1338 = vst.msk [vmem:[#allocation2 + $0x118] sm:$0xff] %vm1305_vm3, %v1273_v59  ;;  %v7632_v39 = vmax.f32 %v1093_v10, 0.0  ;;  %v1277_v21 = vmax.f32 %v1206_v13, 0.0  ;;  %v1566_v22 = vsel %vm1512_vm4, %v1557_v49, %v1565_v36 }
 0x19b   : > { %v1574_v26 = vsel %vm1512_vm4, %v1565_v36, %v1573_v19  ;;  %v1581_v28 = vrot.slane %v7622_v17, 1  ;;  %v2134_v32 = vpack.c.bf16 %v7622_v17, %v7609_v45  ;;  %v6448_v36 = vld [vmem:[%s9965_s3 + $0x480] ss:$8 sps:$4 sm:$0xff]  }
 0x19c   : > { %1342 = vst.msk [vmem:[#allocation2 + $0x138] sm:$0xff] %vm1305_vm3, %v1277_v21  ;;  %v1096_v33 = vpop.f32.mrb[20].mxu0  ;;  %v1209_v41 = vpop.f32.mrb[20].mxu1  ;;  %5816 = vmatpush1.bf16.msra.mxu1 %v6445_v16  ;;  %v6127_v44 = vpack.i.bf16 %v1574_v26, %v1566_v22  ;;  %v2135_v49 = vpack.c.bf16 %v7632_v39, %v7615_v50  ;;  %v7661_v22 = vsel %vm1512_vm4, %v1519_v29, %v7515_v6 }
 0x19d   : > { %v1097_v59 = vadd.f32 %v1096_v33, %v7354_v4  ;;  %v1210_v10 = vadd.f32 %v1209_v41, %v7356_v5  ;;  %v1098_v13 = vpop.f32.mrb[21].mxu0  ;;  %v1211_v21 = vpop.f32.mrb[21].mxu1  ;;  %5801 = vmatprep.subr.bf16.mxu1 %v6450_v20  ;;  %v1582_v16 = vsel %vm1512_vm4, %v1573_v19, %v1581_v28  ;;  %v7671_v19 = vsel %vm1885_vm5, %v1926_v1, %v9990_v25 }
 0x19e   : > { %v1099_v26 = vadd.f32 %v1098_v13, %v7363_v7  ;;  %v1212_v33 = vadd.f32 %v1211_v21, %v7365_v8  ;;  %v1100_v41 = vpop.f32.mrb[22].mxu0  ;;  %v1213_v61 = vpop.f32.mrb[22].mxu1  ;;  %6128 = vrot.lane.b32.xlu1 %v6127_v44, %s6807_s29  ;;  %3282 = vmatprep.mubr.bf16.mxu1 %v2135_v49 }
 0x19f   : > { %v7677_v29 = vmax.f32 %v1097_v59, 0.0  ;;  %v7679_v20 = vmax.f32 %v1210_v10, 0.0  ;;  %v1101_v13 = vadd.f32 %v1100_v41, %v7354_v4  ;;  %v1214_v44 = vadd.f32 %v1213_v61, %v7356_v5  ;;  %v1102_v49 = vpop.f32.mrb[23].mxu0  ;;  %v1215_v21 = vpop.f32.mrb[23].mxu1  ;;  %3283 = vmatmul.mubr.bf16.gmra.mrb[48].mxu1 %v2134_v32  ;;  %v6456_v32 = vld [vmem:[%s9965_s3 + $0x4a4] ss:$8 sps:$4 sm:$0xff]  }
 0x1a0   : > { %v7683_v51 = vmax.f32 %v1099_v26, 0.0  ;;  %v1281_v43 = vmax.f32 %v1212_v33, 0.0  ;;  %v1103_v1 = vadd.f32 %v1102_v49, %v7363_v7  ;;  %v1216_v57 = vadd.f32 %v1215_v21, %v7365_v8  ;;  %5817 = vmatpush1.bf16.msra.mxu1 %v6448_v36 }
 0x1a1   : > { %10048 = vst [vmem:[#allocation19_spill] sm:$0xff] %v7677_v29  ;;  %v7690_v59 = vmax.f32 %v1101_v13, 0.0  ;;  %v7692_v10 = vmax.f32 %v1214_v44, 0.0  ;;  %5802 = vmatprep.subr.bf16.mxu1 %v6453_v0  ;;  %v1589_v61 = vrot.slane %v7677_v29, 1  ;;  %v7703_v36 = vsel %vm1512_vm4, %v1517_v62, %v1527_v12 }
 0x1a2   : > { %1346 = vst.msk [vmem:[#allocation2 + $0x158] sm:$0xff] %vm1305_vm3, %v1281_v43  ;;  %v7706_v26 = vmax.f32 %v1103_v1, 0.0  ;;  %v1285_v33 = vmax.f32 %v1216_v57, 0.0 }
 0x1a3   : > { %v1590_v44 = vsel %vm1512_vm4, %v1581_v28, %v1589_v61  ;;  %v1597_v49 = vrot.slane %v7690_v59, 1  ;;  %v2145_v35 = vpack.c.bf16 %v7690_v59, %v7677_v29  ;;  %v6454_v28 = vld [vmem:[%s9965_s3 + $0x4a0] ss:$8 sps:$4 sm:$0xff]  }
 0x1a4   : > { %1350 = vst.msk [vmem:[#allocation2 + $0x178] sm:$0xff] %vm1305_vm3, %v1285_v33  ;;  %v1106_v62 = vpop.f32.mrb[24].mxu0  ;;  %v1219_v43 = vpop.f32.mrb[24].mxu1  ;;  %5818 = vmatpush1.bf16.msra.mxu1 %v6451_v11  ;;  %v6132_v1 = vpack.i.bf16 %v1590_v44, %v1582_v16  ;;  %v2146_v57 = vpack.c.bf16 %v7706_v26, %v7683_v51  ;;  %v6459_v16 = vld [vmem:[%s9965_s3 + $0x4b4] ss:$8 sps:$4 sm:$0xff]  }
 0x1a5   : > { %v1107_v25 = vadd.f32 %v1106_v62, %v7354_v4  ;;  %v1220_v33 = vadd.f32 %v1219_v43, %v7356_v5  ;;  %v1108_v0 = vpop.f32.mrb[25].mxu0  ;;  %v1221_v41 = vpop.f32.mrb[25].mxu1  ;;  %5803 = vmatprep.subr.bf16.mxu1 %v6456_v32  ;;  %v1598_v11 = vsel %vm1512_vm4, %v1589_v61, %v1597_v49  ;;  %v7738_v32 = vsel %vm1512_vm4, %v7515_v6, %v7596_v27 }
 0x1a6   : > { %v1109_v21 = vadd.f32 %v1108_v0, %v7363_v7  ;;  %v1222_v13 = vadd.f32 %v1221_v41, %v7365_v8  ;;  %v1110_v42 = vpop.f32.mrb[26].mxu0  ;;  %v1223_v62 = vpop.f32.mrb[26].mxu1  ;;  %6133 = vrot.lane.b32.xlu0 %v6132_v1, %s6807_s29  ;;  %3292 = vmatprep.mubr.bf16.mxu1 %v2146_v57 }
 0x1a7   : > { %v7741_v61 = vmax.f32 %v1107_v25, 0.0  ;;  %v7743_v18 = vmax.f32 %v1220_v33, 0.0  ;;  %v1111_v0 = vadd.f32 %v1110_v42, %v7354_v4  ;;  %v1224_v41 = vadd.f32 %v1223_v62, %v7356_v5  ;;  %v1112_v44 = vpop.f32.mrb[27].mxu0  ;;  %v1225_v2 = vpop.f32.mrb[27].mxu1  ;;  %3293 = vmatmul.mubr.bf16.gmra.mrb[52].mxu1 %v2145_v35  ;;  %v6457_v25 = vld [vmem:[%s9965_s3 + $0x4b0] ss:$8 sps:$4 sm:$0xff]  }
 0x1a8   : > { %v7747_v1 = vmax.f32 %v1109_v21, 0.0  ;;  %v1289_v57 = vmax.f32 %v1222_v13, 0.0  ;;  %v1113_v60 = vadd.f32 %v1112_v44, %v7363_v7  ;;  %v1226_v6 = vadd.f32 %v1225_v2, %v7365_v8  ;;  %5819 = vmatpush1.bf16.msra.mxu1 %v6454_v28  ;;  %v6462_v13 = vld [vmem:[%s9965_s3 + $0x4c4] ss:$8 sps:$4 sm:$0xff]  }
 0x1a9   : > { %10049 = vst [vmem:[#allocation20_spill] sm:$0xff] %v7741_v61  ;;  %v7754_v33 = vmax.f32 %v1111_v0, 0.0  ;;  %v7756_v42 = vmax.f32 %v1224_v41, 0.0  ;;  %5804 = vmatprep.subr.bf16.mxu1 %v6459_v16  ;;  %v1605_v35 = vrot.slane %v7741_v61, 1  ;;  %v7767_v2 = vsel %vm1512_vm4, %v1527_v12, %v9991_v14 }
 0x1aa   : > { %1354 = vst.msk [vmem:[#allocation2 + $0x198] sm:$0xff] %vm1305_vm3, %v1289_v57  ;;  %v7770_v21 = vmax.f32 %v1113_v60, 0.0  ;;  %v1293_v28 = vmax.f32 %v1226_v6, 0.0 }
 0x1ab   : > { %v1606_v0 = vsel %vm1512_vm4, %v1597_v49, %v1605_v35  ;;  %v1613_v41 = vrot.slane %v7754_v33, 1  ;;  %v2156_v43 = vpack.c.bf16 %v7754_v33, %v7741_v61  ;;  %v6460_v49 = vld [vmem:[%s9965_s3 + $0x4c0] ss:$8 sps:$4 sm:$0xff]  }
 0x1ac   : > { %1358 = vst.msk [vmem:[#allocation2 + $0x1b8] sm:$0xff] %vm1305_vm3, %v1293_v28  ;;  %v1116_v12 = vpop.f32.mrb[28].mxu0  ;;  %v1229_v57 = vpop.f32.mrb[28].mxu1  ;;  %5820 = vmatpush1.bf16.msra.mxu1 %v6457_v25  ;;  %v6137_v6 = vpack.i.bf16 %v1606_v0, %v1598_v11  ;;  %v2157_v44 = vpack.c.bf16 %v7770_v21, %v7747_v1  ;;  %v6465_v11 = vld [vmem:[%s9965_s3 + $0x4d4] ss:$8 sps:$4 sm:$0xff]  }
 0x1ad   : > { %v1117_v16 = vadd.f32 %v1116_v12, %v7354_v4  ;;  %v1230_v28 = vadd.f32 %v1229_v57, %v7356_v5  ;;  %v1118_v14 = vpop.f32.mrb[29].mxu0  ;;  %v1231_v23 = vpop.f32.mrb[29].mxu1  ;;  %5805 = vmatprep.subr.bf16.mxu1 %v6462_v13  ;;  %v1614_v25 = vsel %vm1512_vm4, %v1605_v35, %v1613_v41  ;;  %v7802_v13 = vsel %vm1512_vm4, %v7596_v27, %v7675_v3  ;;  %v6463_v27 = vld [vmem:[%s9965_s3 + $0x4d0] ss:$8 sps:$4 sm:$0xff]  }
 0x1ae   : > { %v1119_v60 = vadd.f32 %v1118_v14, %v7363_v7  ;;  %v1232_v9 = vadd.f32 %v1231_v23, %v7365_v8  ;;  %v1120_v62 = vpop.f32.mrb[30].mxu0  ;;  %v1233_v24 = vpop.f32.mrb[30].mxu1  ;;  %6138 = vrot.lane.b32.xlu1 %v6137_v6, %s6807_s29  ;;  %3302 = vmatprep.mubr.bf16.mxu1 %v2157_v44 }
 0x1af   : > { %v7804_v57 = vmax.f32 %v1117_v16, 0.0  ;;  %v7806_v35 = vmax.f32 %v1230_v28, 0.0  ;;  %v1121_v14 = vadd.f32 %v1120_v62, %v7354_v4  ;;  %v1234_v23 = vadd.f32 %v1233_v24, %v7356_v5  ;;  %v1122_v0 = vpop.f32.mrb[31].mxu0  ;;  %v1235_v58 = vpop.f32.mrb[31].mxu1  ;;  %3303 = vmatmul.mubr.bf16.gmra.mrb[56].mxu1 %v2156_v43  ;;  %v6468_v5 = vld [vmem:[%s9965_s3 + $0x4e4] ss:$8 sps:$4 sm:$0xff]  }
 0x1b0   : > { %v7810_v6 = vmax.f32 %v1119_v60, 0.0  ;;  %v1297_v12 = vmax.f32 %v1232_v9, 0.0  ;;  %v1123_v44 = vadd.f32 %v1122_v0, %v7363_v7  ;;  %v1236_v61 = vadd.f32 %v1235_v58, %v7365_v8  ;;  %5821 = vmatpush1.bf16.msra.mxu1 %v6460_v49 }
 0x1b1   : > { %10050 = vst [vmem:[#allocation21_spill] sm:$0xff] %v7804_v57  ;;  %v1298_v16 = vmax.f32 %v1121_v14, 0.0  ;;  %v1300_v28 = vmax.f32 %v1234_v23, 0.0  ;;  %5806 = vmatprep.subr.bf16.mxu1 %v6465_v11  ;;  %v9997_v4 = vrot.slane %v7804_v57, 1  ;;  %v10051_v9 = vrot.slane %v7500_v56, 2 }
 0x1b2   : > { %v10052_v7 = vrot.slane %v7482_v46, 2  ;;  %1362 = vst.msk [vmem:[#allocation2 + $0x1d8] sm:$0xff] %vm1305_vm3, %v1297_v12  ;;  %v1299_v8 = vmax.f32 %v1123_v44, 0.0  ;;  %v1301_v24 = vmax.f32 %v1236_v61, 0.0  ;;  %v10053_v49 = vrot.slane %v7544_v38, 2 }
 0x1b3   : > { %1363 = vst [vmem:[#allocation2 + $0x1e0] sm:$0x3f] %v1298_v16  ;;  %1365 = vst [vmem:[#allocation2 + $0x1f0] sm:$0x3f] %v1300_v28  ;;  %v1622_v60 = vsel %vm1512_vm4, %v1613_v41, %v9997_v4  ;;  %v10054_v11 = vmov %v10051_v9  ;;  %v10055_v12 = vrot.slane %v7482_v46, 1  ;;  %v10056_v61 = vrot.slane %v7449_v15, 1 }
 0x1b4   : > { %v7826_v58 = vsel %vm1885_vm5, %v10052_v7, %v10051_v9  ;;  %v7839_v0 = vsel %vm1885_vm5, %v10054_v11, %v10053_v49  ;;  %v10057_v23 = vrot.slane %v7478_v40, 1  ;;  %1364 = vst [vmem:[#allocation2 + $0x1e8] sm:$0x3f] %v1299_v8  ;;  %1367 = vst.msk [vmem:[#allocation2 + $0x1f8] sm:$0x3f] %vm1366_vm6, %v1301_v24  ;;  %5822 = vmatpush1.bf16.msra.mxu1 %v6463_v27  ;;  %v1950_v7 = vrot.slane %v7611_v55, 2 }
 0x1b5   : > { %v7846_v14 = vsel %vm1512_vm4, %v10056_v61, %v10055_v12  ;;  %v6142_v41 = vpack.i.bf16 %v1622_v60, %v1614_v25  ;;  %v6466_v16 = vld [vmem:[%s9965_s3 + $0x4e0] ss:$8 sps:$4 sm:$0xff]   ;;  %v6162_v28 = vpack.i.bf16 %v7802_v13, %v7767_v2  ;;  %5807 = vmatprep.subr.bf16.mxu1 %v6468_v5  ;;  %v6471_v27 = vld [vmem:[%s9965_s3 + $0x4f4] ss:$8 sps:$4 sm:$0xff]   ;;  %v10058_v25 = vrot.slane %v7500_v56, 1 }
 0x1b6   : > { %v7852_v44 = vsel %vm1512_vm4, %v7675_v3, %v10057_v23  ;;  %v10059_v8 = vmov %v10055_v12  ;;  %v9995_v2 = vrot.slane %v7493_v52, 1  ;;  %v10060_v13 = vrot.slane %v7544_v38, 1 }
 0x1b7   : > { %v7872_v24 = vsel %vm1512_vm4, %v10059_v8, %v10058_v25  ;;  %v10061_v60 = vmov %v10058_v25  ;;  %6143 = vrot.lane.b32.xlu0 %v6142_v41, %s6807_s29  ;;  %v9996_v11 = vrot.slane %v7540_v31, 1  ;;  %v10062_v12 = vrot.slane %v7562_v54, 1 }
 0x1b8   : > { %v7880_v49 = vsel %vm1512_vm4, %v10061_v60, %v10060_v13  ;;  %v10063_v61 = vmov %v10060_v13  ;;  %v1569_v25 = vrot.slane %v7554_v48, 1  ;;  %v10064_v56 = vrot.slane %v7478_v40, 1  ;;  %5823 = vmatpush1.bf16.msra.mxu1 %v6466_v16 }
 0x1b9   : > { %v7891_v23 = vsel %vm1512_vm4, %v10063_v61, %v10062_v12  ;;  %v10065_v8 = vrot.slane %v7562_v54, 2  ;;  %v10066_v13 = vrot.slane %v7544_v38, 2  ;;  %v10067_v5 = vrot.slane %v7615_v50, 2  ;;  %v6469_v38 = vld [vmem:[%s9965_s3 + $0x4f0] ss:$8 sps:$4 sm:$0xff]   ;;  %5808 = vmatprep.subr.bf16.mxu1 %v6471_v27 }
 0x1ba   : > { %v1554_v41 = vsel %vm1512_vm4, %v10064_v56, %v9995_v2  ;;  %v10069_v9 = vrot.slane %v7615_v50, 1  ;;  %v10070_v62 = vrot.slane %v7562_v54, 1  ;;  %v7938_v54 = vsel %vm1512_vm4, %v9996_v11, %v1569_v25 }
 0x1bb   : > { %v7904_v60 = vsel %vm1885_vm5, %v10066_v13, %v10065_v8  ;;  %v10068_v12 = vmov %v10065_v8  ;;  %v10071_v8 = vrot.slane %v7554_v48, 2  ;;  %v10072_v13 = vrot.slane %v7540_v31, 2 }
 0x1bc   : > { %v7911_v61 = vsel %vm1885_vm5, %v10068_v12, %v10067_v5  ;;  %v7918_v56 = vsel %vm1512_vm4, %v10070_v62, %v10069_v9  ;;  %v6172_v16 = vpack.i.bf16 %v1554_v41, %v7872_v24  ;;  %v1958_v48 = vrot.slane %v7624_v34, 2  ;;  %5824 = vmatpush1.bf16.msra.mxu1 %v6469_v38 }
 0x1bd   : > { %v7928_v2 = vsel %vm1885_vm5, %v10072_v13, %v10071_v8  ;;  %v10073_v5 = vmov %v10071_v8  ;;  %v1577_v8 = vrot.slane %v7611_v55, 1  ;;  %v1428_v13 = vld [vmem:[#allocation2 + $0x1e0] sm:$0xf]  ;;  %v10074_v11 = vpack.i.bf16 %v7661_v22, %v7585_v53  ;;  %v1429_v53 = vld [vmem:[#allocation2 + $0x1e8] sm:$0xf] }
 0x1be   : > { %v7933_v12 = vsel %vm1885_vm5, %v10073_v5, %v1950_v7  ;;  %v1436_v5 = vld [vmem:[#allocation2 + $0x1e0] sm:$0x1f]  ;;  %v1966_v3 = vrot.slane %v7679_v20, 2  ;;  %v10075_v27 = vrot.slane %v7632_v39, 1  ;;  %v10076_v24 = vmov %v10069_v9 }
 0x1bf   : > { %6153 = vrot.lane.b32.xlu0 %v10074_v11, %s6807_s29  ;;  %v1585_v62 = vrot.slane %v7624_v34, 1  ;;  %v10077_v9 = vrot.slane %v7683_v51, 1  ;;  %v2167_v22 = vpack.c.bf16 %v1428_v13, %v7804_v57  ;;  %v1629_v11 = vrot.slane %v1436_v5, 1 }
 0x1c0   : > { %v7957_v41 = vsel %vm1512_vm4, %v10076_v24, %v10075_v27  ;;  %v10078_v43 = vmov %v10075_v27  ;;  %v7969_v40 = vsel %vm1512_vm4, %v1569_v25, %v1577_v8  ;;  %v7972_v46 = vsel %vm1885_vm5, %v1950_v7, %v1958_v48 }
 0x1c1   : > { %v7965_v4 = vsel %vm1512_vm4, %v10078_v43, %v10077_v9  ;;  %v2168_v27 = vpack.c.bf16 %v1429_v53, %v7810_v6  ;;  %v7978_v30 = vsel %vm1885_vm5, %v1958_v48, %v1966_v3  ;;  %v1586_v43 = vsel %vm1512_vm4, %v1577_v8, %v1585_v62 }
 0x1c2   : > { %v10079_v9 = vrot.slane %v7804_v57, 1  ;;  %v6192_v7 = vpack.i.bf16 %v1586_v43, %v7957_v41  ;;  %v1593_v5 = vrot.slane %v7679_v20, 1  ;;  %v10080_v48 = vrot.slane %v7706_v26, 1 }
 0x1c3   : > { %3312 = vmatprep.mubr.bf16.mxu1 %v2168_v27  ;;  %6163 = vrot.lane.b32.xlu0 %v6162_v28, %s6807_s29  ;;  %v10081_v53 = vrot.slane %v7683_v51, 1  ;;  %v1601_v24 = vrot.slane %v7692_v10, 1  ;;  %v10083_v25 = vrot.slane %v7615_v50, 2  ;;  %v10084_v28 = vrot.slane %v7683_v51, 2 }
 0x1c4   : > { %v1630_v13 = vsel %vm1512_vm4, %v10079_v9, %v1629_v11  ;;  %v10082_v9 = vrot.slane %v7632_v39, 2  ;;  %3313 = vmatmul.mubr.bf16.gmra.mrb[60].mxu1 %v2167_v22 }
 0x1c5   : > { %v6147_v38 = vpack.i.bf16 %v1629_v11, %v1630_v13  ;;  %v1600_v8 = vsel %vm1512_vm4, %v10081_v53, %v10080_v48  ;;  %v8003_v11 = vsel %vm1512_vm4, %v1585_v62, %v1593_v5  ;;  %v10086_v13 = vrot.slane %v7747_v1, 1 }
 0x1c6   : > { %v8000_v41 = vsel %vm1885_vm5, %v10083_v25, %v10082_v9  ;;  %v10085_v27 = vmov %v10082_v9  ;;  %v1609_v25 = vrot.slane %v7743_v18, 1  ;;  %v10087_v62 = vpack.c.bf16 %v7671_v19, %v7607_v37 }
 0x1c7   : > { %v8010_v43 = vsel %vm1885_vm5, %v10085_v27, %v10084_v28  ;;  %v8017_v50 = vsel %vm1512_vm4, %v10080_v48, %v10086_v13  ;;  %6148 = vrot.lane.b32.xlu1 %v6147_v38, %s6807_s29  ;;  %v1602_v22 = vsel %vm1512_vm4, %v1593_v5, %v1601_v24  ;;  %v1974_v9 = vrot.slane %v7692_v10, 2  ;;  %v8030_v28 = vld [vmem:[#allocation2 + $0x1e8] sm:$0x1f]  ;;  %v8032_v27 = vld [vmem:[#allocation2 + $0x1f0] sm:$0x1f]  ;;  %6173 = vrot.lane.b32.xlu0 %v6172_v16, %s6807_s29 }
 0x1c8   : > { %3714 = vmatprep.mubr.bf16.mxu1 %v10087_v62  ;;  %v6202_v13 = vpack.i.bf16 %v1602_v22, %v1600_v8  ;;  %v8035_v38 = vsel %vm1512_vm4, %v1601_v24, %v1609_v25  ;;  %v1982_v37 = vrot.slane %v7743_v18, 2  ;;  %v10088_v19 = vrot.slane %v7770_v21, 1 }
 0x1c9   : > { %v10089_v48 = vrot.slane %v7747_v1, 1  ;;  %v8047_v53 = vsel %vm1885_vm5, %v1966_v3, %v1974_v9  ;;  %v1617_v8 = vrot.slane %v7756_v42, 1  ;;  %v10090_v24 = vrot.slane %v7810_v6, 1 }
 0x1ca   : > { %v10091_v22 = vmov %v10088_v19  ;;  %v8058_v57 = vsel %vm1885_vm5, %v1974_v9, %v1982_v37  ;;  %v1625_v16 = vrot.slane %v7806_v35, 1  ;;  %v10092_v3 = vpack.i.bf16 %v7738_v32, %v7703_v36 }
 0x1cb   : > { %v1616_v5 = vsel %vm1512_vm4, %v10089_v48, %v10088_v19  ;;  %v8055_v39 = vsel %vm1512_vm4, %v10091_v22, %v10090_v24  ;;  %v1633_v48 = vrot.slane %v8032_v27, 1  ;;  %v2154_v62 = vpack.c.bf16 %v8058_v57, %v8047_v53 }
 0x1cc   : > { %6158 = vrot.lane.b32.xlu1 %v10092_v3, %s6807_s29  ;;  %v1618_v24 = vsel %vm1512_vm4, %v1609_v25, %v1617_v8  ;;  %v10093_v22 = vrot.slane %v7706_v26, 2  ;;  %v10094_v9 = vrot.slane %v7683_v51, 2  ;;  %v10095_v19 = vrot.slane %v7747_v1, 2 }
 0x1cd   : > { %v6212_v36 = vpack.i.bf16 %v1618_v24, %v1616_v5  ;;  %v8085_v32 = vsel %vm1512_vm4, %v1617_v8, %v1625_v16  ;;  %v10097_v25 = vrot.slane %v8030_v28, 1  ;;  %v10098_v3 = vrot.slane %v7810_v6, 1 }
 0x1ce   : > { %v8075_v29 = vsel %vm1885_vm5, %v10094_v9, %v10093_v22  ;;  %v10096_v27 = vmov %v10093_v22  ;;  %v1634_v22 = vsel %vm1512_vm4, %v1625_v16, %v1633_v48  ;;  %v2132_v9 = vpack.c.bf16 %v7933_v12, %v7928_v2 }
 0x1cf   : > { %v8082_v45 = vsel %vm1885_vm5, %v10096_v27, %v10095_v19  ;;  %v1632_v51 = vsel %vm1512_vm4, %v10098_v3, %v10097_v25  ;;  %v10099_v26 = vpack.i.bf16 %v7938_v54, %v7891_v23  ;;  %v6217_v5 = vpack.i.bf16 %v8085_v32, %v8055_v39 }
 0x1d0   : > { %v6222_v8 = vpack.i.bf16 %v1634_v22, %v1632_v51  ;;  %v2153_v19 = vpack.c.bf16 %v8082_v45, %v8075_v29  ;;  %v1988_v24 = vrot.slane %v7770_v21, 2  ;;  %v10100_v16 = vpack.c.bf16 %v7839_v0, %v7826_v58  ;;  %v8157_v22 = vld [vmem:[#allocation2 + $0x38] sm:$0xff] }
 0x1d1   : > { %6183 = vrot.lane.b32.xlu0 %v10099_v26, %s6807_s29  ;;  %v10101_v2 = vrot.slane %v7540_v31, 1  ;;  %v10102_v12 = vrot.slane %v7493_v52, 1  ;;  %v1990_v54 = vrot.slane %v7756_v42, 2  ;;  %v1998_v27 = vrot.slane %v7806_v35, 2 }
 0x1d2   : > { %3715 = vmatmul.mubr.bf16.vlgmr.msra.gmra.mrb[64].mxu1 %v10100_v16  ;;  %v10006_v25 = vrot.slane %v7810_v6, 2  ;;  %v10103_v21 = vpack.i.bf16 %v7852_v44, %v7846_v14  ;;  %v10104_v3 = vrot.slane %v7747_v1, 2  ;;  %v10105_v1 = vpack.c.bf16 %v7911_v61, %v7904_v60  ;;  %v8172_v16 = vld [vmem:[#allocation2 + $0x78] sm:$0xff] }
 0x1d3   : > { %v1562_v23 = vsel %vm1512_vm4, %v10102_v12, %v10101_v2  ;;  %3724 = vmatprep.mubr.bf16.mxu1 %v2132_v9  ;;  %v8120_v58 = vsel %vm1885_vm5, %v1982_v37, %v1990_v54  ;;  %v8125_v52 = vsel %vm1885_vm5, %v1990_v54, %v1998_v27  ;;  %v10106_v37 = vpack.i.bf16 %v7969_v40, %v7918_v56  ;;  %v8159_v9 = vld [vmem:[#allocation2 + $0xd8] sm:$0xff] }
 0x1d4   : > { %6168 = vrot.lane.b32.xlu1 %v10103_v21, %s6807_s29  ;;  %v6177_v31 = vpack.i.bf16 %v1562_v23, %v7880_v49  ;;  %v2165_v0 = vpack.c.bf16 %v8125_v52, %v8120_v58  ;;  %v8134_v14 = vsel %vm1885_vm5, %v10104_v3, %v1988_v24  ;;  %v8140_v44 = vsel %vm1885_vm5, %v1988_v24, %v10006_v25  ;;  %v8162_v24 = vld [vmem:[#allocation2 + $0x28] sm:$0xff]  ;;  %v8167_v40 = vld [vmem:[#allocation2 + $0xb8] sm:$0xff] }
 0x1d5   : > { %6193 = vrot.lane.b32.xlu0 %v6192_v7, %s6807_s29  ;;  %v8145_v7 = vld [vmem:[#allocation2 + $0x58] sm:$0xff]  ;;  %v10107_v51 = vpack.c.bf16 %v7978_v30, %v7972_v46  ;;  %v1890_v60 = vrot.slane %v8162_v24, 2  ;;  %v1900_v61 = vrot.slane %v7431_v63, 2  ;;  %v1908_v46 = vrot.slane %v7449_v15, 2  ;;  %v10115_v49 = vld [vmem:[#allocation17_spill] sm:$0xff] }
 0x1d6   : > { %v1531_v26 = vrot.slane %v8145_v7, 1  ;;  %v1938_v30 = vrot.slane %v7552_v47, 2  ;;  %v1523_v56 = vrot.slane %v8157_v22, 1  ;;  %v8174_v2 = vld [vmem:[#allocation2 + $0x98] sm:$0xff]  ;;  %v10008_v12 = vrot.slane %v8159_v9, 1 }
 0x1d7   : > { %10108 = vst [vmem:[#allocation22_spill] sm:$0xff] %v8174_v2  ;;  %v1954_v23 = vrot.slane %v7622_v17, 2  ;;  %v1970_v63 = vrot.slane %v7690_v59, 2  ;;  %v10109_v54 = vpack.i.bf16 %v8003_v11, %v7965_v4  ;;  %v10110_v59 = vrot.slane %v8030_v28, 1  ;;  %v8195_v11 = vld [vmem:[#allocation2 + $0x158] sm:$0xff] }
 0x1d8   : > { %6178 = vrot.lane.b32.xlu1 %v6177_v31, %s6807_s29  ;;  %v1532_v21 = vsel %vm1512_vm4, %v1523_v56, %v1531_v26  ;;  %v1555_v31 = vrot.slane %v8167_v40, 1  ;;  %v1547_v4 = vrot.slane %v8174_v2, 1  ;;  %v10009_v25 = vrot.slane %v8195_v11, 1 }
 0x1d9   : > { %6203 = vrot.lane.b32.xlu0 %v6202_v13, %s6807_s29  ;;  %v1435_v13 = vld [vmem:[#allocation2 + $0x18] sm:$0xfe] }
 0x1da   : > { %3725 = vmatmul.mubr.bf16.gmra.mrb[68].mxu1 %v10105_v1  ;;  %v1522_v47 = vrot.slane %v1435_v13, 1  ;;  %v6227_v1 = vpack.i.bf16 %v1633_v48, %v10110_v59  ;;  %v10111_v13 = vpack.c.bf16 %v8010_v43, %v8000_v41  ;;  %v1564_v28 = vsel %vm1512_vm4, %v1555_v31, %v10008_v12  ;;  %v8206_v48 = vld [vmem:[#allocation2 + $0x138] sm:$0xff] }
 0x1db   : > { %3734 = vmatprep.mubr.bf16.mxu1 %v10107_v51  ;;  %v8216_v59 = vsel %vm1885_vm5, %v1900_v61, %v1908_v46  ;;  %v10112_v41 = vpack.i.bf16 %v8035_v38, %v8017_v50  ;;  %v10114_v51 = vld [vmem:[#allocation19_spill] sm:$0xff]  ;;  %v10007_v50 = vrot.slane %v10115_v49, 2 }
 0x1dc   : > { %6188 = vrot.lane.b32.xlu1 %v10106_v37, %s6807_s29  ;;  %v1539_v37 = vrot.slane %v8172_v16, 1  ;;  %v1962_v17 = vrot.slane %v10114_v51, 2  ;;  %v8238_v51 = vld [vmem:[#allocation2 + $0x1d8] sm:$0xff] }
 0x1dd   : > { %6213 = vrot.lane.b32.xlu0 %v6212_v36, %s6807_s29  ;;  %v1986_v36 = vrot.slane %v7754_v33, 2  ;;  %v1627_v32 = vrot.slane %v8238_v51, 1  ;;  %v8277_v12 = vld [vmem:[#allocation2 + $0x198] sm:$0xff] }
 0x1de   : > { %v1540_v57 = vsel %vm1512_vm4, %v1531_v26, %v1539_v37  ;;  %v1548_v53 = vsel %vm1512_vm4, %v1539_v37, %v1547_v4  ;;  %v8252_v37 = vsel %vm1885_vm5, %v1954_v23, %v1962_v17  ;;  %v1443_v43 = vld [vmem:[#allocation2 + $0x18] sm:$0xfc] }
 0x1df   : > { %v6237_v45 = vpack.i.bf16 %v1548_v53, %v1540_v57  ;;  %v10118_v57 = vld [vmem:[#allocation16_spill] sm:$0xff] }
 0x1e0   : > { %6198 = vrot.lane.b32.xlu1 %v10109_v54, %s6807_s29  ;;  %v1524_v54 = vsel %vm1512_vm4, %v1522_v47, %v1523_v56  ;;  %v10113_v47 = vld [vmem:[#allocation18_spill] sm:$0xff]  ;;  %v10119_v53 = vrot.slane %v10118_v57, 2  ;;  %v10123_v57 = vrot.slane %v8159_v9, 1 }
 0x1e1   : > { %6223 = vrot.lane.b32.xlu0 %v6222_v8, %s6807_s29  ;;  %v8211_v8 = vsel %vm1885_vm5, %v1890_v60, %v1900_v61  ;;  %v6232_v56 = vpack.i.bf16 %v1532_v21, %v1524_v54  ;;  %v1556_v61 = vsel %vm1512_vm4, %v1547_v4, %v1555_v31  ;;  %v1587_v21 = vrot.slane %v8206_v48, 1  ;;  %v1446_v54 = vld [vmem:[#allocation2 + $0x1f0] sm:$0x3f]  ;;  %v1441_v4 = vld [vmem:[#allocation2 + $0x8] sm:$0xfc] }
 0x1e2   : > { %3735 = vmatmul.mubr.bf16.gmra.mrb[72].mxu1 %v10111_v13  ;;  %v1946_v13 = vrot.slane %v10113_v47, 2  ;;  %v6242_v38 = vpack.i.bf16 %v1564_v28, %v1556_v61  ;;  %v8243_v31 = vsel %vm1885_vm5, %v10007_v50, %v1938_v30  ;;  %v8258_v28 = vld [vmem:[#allocation2 + $0x1b8] sm:$0xff]  ;;  %v8265_v47 = vsel %vm1885_vm5, %v1962_v17, %v1970_v63 }
 0x1e3   : > { %3744 = vmatprep.mubr.bf16.mxu1 %v2154_v62  ;;  %v8235_v62 = vld [vmem:[#allocation2 + $0x118] sm:$0xff]  ;;  %v1596_v39 = vsel %vm1512_vm4, %v1587_v21, %v10009_v25  ;;  %v1889_v3 = vrot.slane %v1441_v4, 2  ;;  %v1611_v4 = vrot.slane %v8277_v12, 1  ;;  %v8329_v24 = vsel %vm1885_vm5, %v1908_v46, %v10119_v53 }
 0x1e4   : > { %6208 = vrot.lane.b32.xlu1 %v10112_v41, %s6807_s29  ;;  %v8246_v41 = vsel %vm1885_vm5, %v1938_v30, %v1946_v13  ;;  %v8249_v26 = vsel %vm1885_vm5, %v1946_v13, %v1954_v23  ;;  %v10116_v13 = vld [vmem:[#allocation20_spill] sm:$0xff]  ;;  %v8268_v61 = vld [vmem:[#allocation2 + $0xf8] sm:$0xff]  ;;  %v1579_v50 = vrot.slane %v8235_v62, 1  ;;  %v2006_v30 = vrot.slane %v1446_v54, 2 }
 0x1e5   : > { %6233 = vrot.lane.b32.xlu0 %v6232_v56, %s6807_s29  ;;  %v1978_v23 = vrot.slane %v10116_v13, 2  ;;  %v1571_v29 = vrot.slane %v8268_v61, 1 }
 0x1e6   : > { %v1588_v25 = vsel %vm1512_vm4, %v1579_v50, %v1587_v21  ;;  %v2007_v52 = vsel %vm1885_vm5, %v1998_v27, %v2006_v30  ;;  %v10010_v27 = vrot.slane %v8174_v2, 2 }
 0x1e7   : > { %v8280_v17 = vsel %vm1885_vm5, %v1970_v63, %v1978_v23  ;;  %v8285_v13 = vsel %vm1885_vm5, %v1978_v23, %v1986_v36  ;;  %v1580_v58 = vsel %vm1512_vm4, %v1571_v29, %v1579_v50  ;;  %v10121_v23 = vrot.slane %v8145_v7, 2 }
 0x1e8   : > { %6218 = vrot.lane.b32.xlu1 %v6217_v5, %s6807_s29  ;;  %v10117_v5 = vld [vmem:[#allocation21_spill] sm:$0xff]  ;;  %v1572_v53 = vsel %vm1512_vm4, %v10123_v57, %v1571_v29  ;;  %v10125_v29 = vrot.slane %v8145_v7, 2 }
 0x1e9   : > { %v10011_v56 = vrot.slane %v10117_v5, 2  ;;  %6243 = vrot.lane.b32.xlu0 %v6242_v38, %s6807_s29  ;;  %v1619_v38 = vrot.slane %v8258_v28, 1 }
 0x1ea   : > { %3745 = vmatmul.mubr.bf16.gmra.mrb[76].mxu1 %v2153_v19  ;;  %v6252_v19 = vpack.i.bf16 %v1596_v39, %v1588_v25  ;;  %v8320_v25 = vld [vmem:[#allocation2 + $0x178] sm:$0xff] }
 0x1eb   : > { %v8299_v63 = vsel %vm1885_vm5, %v1986_v36, %v10011_v56  ;;  %3754 = vmatprep.mubr.bf16.mxu1 %v2165_v0  ;;  %v1628_v33 = vsel %vm1512_vm4, %v1619_v38, %v1627_v32  ;;  %v8313_v36 = vsel %vm1885_vm5, %v1889_v3, %v1890_v60  ;;  %v1620_v60 = vsel %vm1512_vm4, %v1611_v4, %v1619_v38  ;;  %v1445_v3 = vld [vmem:[#allocation2 + $0x1e8] sm:$0x3f]  ;;  %v1439_v38 = vld [vmem:[#allocation2 + $0x1f8] sm:$0x1f] }
 0x1ec   : > { %6228 = vrot.lane.b32.xlu1 %v6227_v1, %s6807_s29  ;;  %v1895_v1 = vrot.slane %v1443_v43, 2  ;;  %v10120_v43 = vrot.slane %v8157_v22, 2  ;;  %v6262_v46 = vpack.i.bf16 %v1628_v33, %v1620_v60  ;;  %v6247_v0 = vpack.i.bf16 %v1580_v58, %v1572_v53 }
 0x1ed   : > { %6253 = vrot.lane.b32.xlu0 %v6252_v19, %s6807_s29  ;;  %v10124_v33 = vpack.c.bf16 %v8140_v44, %v8134_v14  ;;  %v10127_v44 = vrot.slane %v8195_v11, 1  ;;  %v6543_v14 = vld [vmem:[%s9965_s3 + $0x274] ss:$8 sps:$4 sm:$0xff]  }
 0x1ee   : > { %v8337_v50 = vsel %vm1885_vm5, %v1895_v1, %v10120_v43  ;;  %v10122_v39 = vmov %v10120_v43  ;;  %v1603_v1 = vrot.slane %v8320_v25, 1  ;;  %v1912_v43 = vrot.slane %v8172_v16, 2 }
 0x1ef   : > { %v8344_v15 = vsel %vm1885_vm5, %v10122_v39, %v10121_v23  ;;  %v2176_v23 = vpack.c.bf16 %v2006_v30, %v2007_v52  ;;  %v1635_v39 = vrot.slane %v1439_v38, 1  ;;  %v10128_v52 = vrot.slane %v7810_v6, 2 }
 0x1f0   : > { %6238 = vrot.lane.b32.xlu1 %v6237_v45, %s6807_s29  ;;  %v2004_v45 = vrot.slane %v1445_v3, 2  ;;  %v1612_v60 = vsel %vm1512_vm4, %v1603_v1, %v1611_v4  ;;  %v8363_v57 = vsel %vm1885_vm5, %v10125_v29, %v1912_v43  ;;  %v8368_v58 = vsel %vm1885_vm5, %v1912_v43, %v10010_v27 }
 0x1f1   : > { %6263 = vrot.lane.b32.xlu0 %v6262_v46, %s6807_s29  ;;  %10126 = vst [vmem:[#allocation18_spill] sm:$0xff] %v8363_v57  ;;  %v1604_v30 = vsel %vm1512_vm4, %v10127_v44, %v1603_v1  ;;  %v1636_v46 = vsel %vm1512_vm4, %v1627_v32, %v1635_v39  ;;  %v6525_v44 = vld [vmem:[%s9965_s3 + $0x214] ss:$8 sps:$4 sm:$0xff]  }
 0x1f2   : > { %3755 = vmatmul.mubr.bf16.gmra.mrb[80].mxu1 %v10124_v33  ;;  %v6257_v4 = vpack.i.bf16 %v1612_v60, %v1604_v30  ;;  %v2005_v3 = vsel %vm1885_vm5, %v10128_v52, %v2004_v45  ;;  %v6267_v53 = vpack.i.bf16 %v1635_v39, %v1636_v46  ;;  %v1370_v33 = vld [vmem:[#allocation2 + $0x10] sm:$0xff]  ;;  %v6520_v60 = vld [vmem:[%s9965_s3 + $0x200] ss:$8 sps:$4 sm:$0xff]  }
 0x1f3   : > { %3764 = vmatprep.mubr.bf16.mxu1 %v2176_v23  ;;  %v2175_v38 = vpack.c.bf16 %v2004_v45, %v2005_v3  ;;  %v1371_v23 = vld [vmem:[#allocation2 + $0x18] sm:$0xff]  ;;  %v8396_v39 = vld [vmem:[#allocation2 + $0x30] sm:$0xff]  ;;  %v6528_v3 = vld [vmem:[%s9965_s3 + $0x224] ss:$8 sps:$4 sm:$0xff]  }
 0x1f4   : > { %6248 = vrot.lane.b32.xlu1 %v6247_v0, %s6807_s29  ;;  %v2092_v29 = vpack.c.bf16 %v8396_v39, %v1370_v33  ;;  %v8423_v33 = vld [vmem:[#allocation2 + $0x50] sm:$0xff] }
 0x1f8   : > { %6258 = vrot.lane.b32.xlu1 %v6257_v4, %s6807_s29  ;;  %v8382_v0 = vpop.permute.xlu0 %6113 }
 0x1f9   : > { %v6116_v43 = vunpack.i.h.bf16 %v8382_v0  ;;  %v6115_v1 = vunpack.i.l.bf16 %v8382_v0 }
 0x1fa   : > { %3765 = vmatmul.mubr.bf16.gmra.mrb[84].mxu1 %v2175_v38 }
 0x1fb   : > { %v2074_v6 = vsel %vm1305_vm3, %v1371_v23, %v6115_v1  ;;  %v2075_v32 = vsel %vm1305_vm3, %v8157_v22, %v6116_v43  ;;  %v6523_v22 = vld [vmem:[%s9965_s3 + $0x210] ss:$8 sps:$4 sm:$0xff]   ;;  %v6526_v23 = vld [vmem:[%s9965_s3 + $0x220] ss:$8 sps:$4 sm:$0xff]  }
 0x1fc   : > { %6268 = vrot.lane.b32.xlu1 %v6267_v53, %s6807_s29  ;;  %v2093_v45 = vpack.c.bf16 %v2075_v32, %v2074_v6  ;;  %v8425_v6 = vld [vmem:[#allocation2 + $0x70] sm:$0xff] }
 0x1fd   : > { %v2103_v32 = vpack.c.bf16 %v8425_v6, %v8423_v33 }
 0x1fe   : > { %3355 = vmatprep.mubr.bf16.mxu0 %v2093_v45  ;;  %v6529_v45 = vld [vmem:[%s9965_s3 + $0x230] ss:$8 sps:$4 sm:$0xff]  }
 0x1ff   : > { %3356 = vmatmul.mubr.bf16.vlgmr.msra.gmra.mrb[32].mxu0 %v2092_v29 }
 0x200   : > { %v8402_v30 = vpop.permute.xlu1 %6118  ;;  %3437 = vmatpush1.bf16.msra.mxu0 %v6520_v60 }
 0x201   : > { %v6121_v4 = vunpack.i.h.bf16 %v8402_v30  ;;  %v6120_v52 = vunpack.i.l.bf16 %v8402_v30  ;;  %3438 = vmatprep.subr.bf16.mxu0 %v6525_v44  ;;  %v6534_v44 = vld [vmem:[%s9965_s3 + $0x244] ss:$8 sps:$4 sm:$0xff]  }
 0x203   : > { %v2076_v46 = vsel %vm1305_vm3, %v8145_v7, %v6120_v52  ;;  %v2077_v38 = vsel %vm1305_vm3, %v8172_v16, %v6121_v4  ;;  %v6531_v7 = vld [vmem:[%s9965_s3 + $0x234] ss:$8 sps:$4 sm:$0xff]  }
 0x204   : > { %3439 = vmatpush1.bf16.msra.mxu0 %v6523_v22  ;;  %v2104_v53 = vpack.c.bf16 %v2077_v38, %v2076_v46  ;;  %v6532_v38 = vld [vmem:[%s9965_s3 + $0x240] ss:$8 sps:$4 sm:$0xff]  }
 0x205   : > { %3440 = vmatprep.subr.bf16.mxu0 %v6528_v3 }
 0x206   : > { %3365 = vmatprep.mubr.bf16.mxu0 %v2104_v53  ;;  %v6690_v53 = vld [vmem:[#allocation2 + $0x90] sm:$0xff] }
 0x207   : > { %3366 = vmatmul.mubr.bf16.gmra.mrb[36].mxu0 %v2103_v32 }
 0x208   : > { %v8432_v16 = vpop.permute.xlu0 %6123  ;;  %3441 = vmatpush1.bf16.msra.mxu0 %v6526_v23  ;;  %v6691_v23 = vld [vmem:[#allocation2 + $0xb0] sm:$0xff] }
 0x209   : > { %v6126_v60 = vunpack.i.h.bf16 %v8432_v16  ;;  %v6125_v29 = vunpack.i.l.bf16 %v8432_v16  ;;  %3442 = vmatprep.subr.bf16.mxu0 %v6531_v7  ;;  %v2114_v32 = vpack.c.bf16 %v6691_v23, %v6690_v53  ;;  %v6537_v7 = vld [vmem:[%s9965_s3 + $0x254] ss:$8 sps:$4 sm:$0xff]   ;;  %v6538_v53 = vld [vmem:[%s9965_s3 + $0x260] ss:$8 sps:$4 sm:$0xff]   ;;  %v6576_v16 = vld [vmem:[%s9965_s3 + $0x324] ss:$8 sps:$4 sm:$0xff]  }
 0x20a   : > { %v6692_v23 = vld [vmem:[#allocation2 + $0xd0] sm:$0xff] }
 0x20b   : > { %v2078_v22 = vsel %vm1305_vm3, %v8174_v2, %v6125_v29  ;;  %v2079_v3 = vsel %vm1305_vm3, %v8167_v40, %v6126_v60  ;;  %v6535_v40 = vld [vmem:[%s9965_s3 + $0x250] ss:$8 sps:$4 sm:$0xff]  }
 0x20c   : > { %3443 = vmatpush1.bf16.msra.mxu0 %v6529_v45  ;;  %v2115_v46 = vpack.c.bf16 %v2079_v3, %v2078_v22 }
 0x20d   : > { %3444 = vmatprep.subr.bf16.mxu0 %v6534_v44  ;;  %v6540_v44 = vld [vmem:[%s9965_s3 + $0x264] ss:$8 sps:$4 sm:$0xff]  }
 0x20e   : > { %3375 = vmatprep.mubr.bf16.mxu0 %v2115_v46 }
 0x20f   : > { %3376 = vmatmul.mubr.bf16.gmra.mrb[40].mxu0 %v2114_v32  ;;  %v6693_v32 = vld [vmem:[#allocation2 + $0xf0] sm:$0xff] }
 0x210   : > { %v8456_v27 = vpop.permute.xlu1 %6128  ;;  %3445 = vmatpush1.bf16.msra.mxu0 %v6532_v38 }
 0x211   : > { %v6131_v45 = vunpack.i.h.bf16 %v8456_v27  ;;  %v6130_v22 = vunpack.i.l.bf16 %v8456_v27  ;;  %3446 = vmatprep.subr.bf16.mxu0 %v6537_v7  ;;  %v2125_v7 = vpack.c.bf16 %v6693_v32, %v6692_v23  ;;  %v6549_v23 = vld [vmem:[%s9965_s3 + $0x294] ss:$8 sps:$4 sm:$0xff]  }
 0x213   : > { %v2080_v3 = vsel %vm1305_vm3, %v8159_v9, %v6130_v22  ;;  %v2081_v46 = vsel %vm1305_vm3, %v8268_v61, %v6131_v45  ;;  %v6541_v61 = vld [vmem:[%s9965_s3 + $0x270] ss:$8 sps:$4 sm:$0xff]  }
 0x214   : > { %3447 = vmatpush1.bf16.msra.mxu0 %v6535_v40  ;;  %v2126_v38 = vpack.c.bf16 %v2081_v46, %v2080_v3 }
 0x215   : > { %3448 = vmatprep.subr.bf16.mxu0 %v6540_v44  ;;  %v6546_v44 = vld [vmem:[%s9965_s3 + $0x284] ss:$8 sps:$4 sm:$0xff]  }
 0x216   : > { %3385 = vmatprep.mubr.bf16.mxu0 %v2126_v38 }
 0x217   : > { %3386 = vmatmul.mubr.bf16.gmra.mrb[44].mxu0 %v2125_v7 }
 0x218   : > { %v8480_v9 = vpop.permute.xlu0 %6133  ;;  %3449 = vmatpush1.bf16.msra.mxu0 %v6538_v53 }
 0x219   : > { %v6136_v40 = vunpack.i.h.bf16 %v8480_v9  ;;  %v6135_v3 = vunpack.i.l.bf16 %v8480_v9  ;;  %3450 = vmatprep.subr.bf16.mxu0 %v6543_v14  ;;  %v6544_v14 = vld [vmem:[%s9965_s3 + $0x280] ss:$8 sps:$4 sm:$0xff]   ;;  %v6582_v9 = vld [vmem:[%s9965_s3 + $0x344] ss:$8 sps:$4 sm:$0xff]  }
 0x21b   : > { %v2082_v46 = vsel %vm1305_vm3, %v8235_v62, %v6135_v3  ;;  %v2083_v38 = vsel %vm1305_vm3, %v8206_v48, %v6136_v40  ;;  %v10129_v62 = vpack.c.bf16 %v7624_v34, %v7611_v55  ;;  %v6547_v48 = vld [vmem:[%s9965_s3 + $0x290] ss:$8 sps:$4 sm:$0xff]  }
 0x21c   : > { %3451 = vmatpush1.bf16.msra.mxu0 %v6541_v61  ;;  %v2137_v53 = vpack.c.bf16 %v2083_v38, %v2082_v46  ;;  %v6550_v38 = vld [vmem:[%s9965_s3 + $0x2a0] ss:$8 sps:$4 sm:$0xff]  }
 0x21d   : > { %3452 = vmatprep.subr.bf16.mxu0 %v6546_v44  ;;  %v6552_v44 = vld [vmem:[%s9965_s3 + $0x2a4] ss:$8 sps:$4 sm:$0xff]  }
 0x21e   : > { %3395 = vmatprep.mubr.bf16.mxu0 %v2137_v53  ;;  %v6555_v53 = vld [vmem:[%s9965_s3 + $0x2b4] ss:$8 sps:$4 sm:$0xff]  }
 0x21f   : > { %3396 = vmatmul.mubr.bf16.gmra.mrb[48].mxu0 %v10129_v62 }
 0x220   : > { %v8507_v32 = vpop.permute.xlu1 %6138  ;;  %3453 = vmatpush1.bf16.msra.mxu0 %v6544_v14 }
 0x221   : > { %v6141_v7 = vunpack.i.h.bf16 %v8507_v32  ;;  %v6140_v61 = vunpack.i.l.bf16 %v8507_v32  ;;  %3454 = vmatprep.subr.bf16.mxu0 %v6549_v23 }
 0x223   : > { %v2084_v55 = vsel %vm1305_vm3, %v8195_v11, %v6140_v61  ;;  %v2085_v34 = vsel %vm1305_vm3, %v8320_v25, %v6141_v7  ;;  %v10130_v11 = vpack.c.bf16 %v7692_v10, %v7679_v20  ;;  %v6553_v25 = vld [vmem:[%s9965_s3 + $0x2b0] ss:$8 sps:$4 sm:$0xff]  }
 0x224   : > { %3455 = vmatpush1.bf16.msra.mxu0 %v6547_v48  ;;  %v2148_v46 = vpack.c.bf16 %v2085_v34, %v2084_v55  ;;  %v6558_v48 = vld [vmem:[%s9965_s3 + $0x2c4] ss:$8 sps:$4 sm:$0xff]   ;;  %v6556_v34 = vld [vmem:[%s9965_s3 + $0x2c0] ss:$8 sps:$4 sm:$0xff]  }
 0x225   : > { %3456 = vmatprep.subr.bf16.mxu0 %v6552_v44 }
 0x226   : > { %3405 = vmatprep.mubr.bf16.mxu0 %v2148_v46  ;;  %v6561_v46 = vld [vmem:[%s9965_s3 + $0x2d4] ss:$8 sps:$4 sm:$0xff]  }
 0x227   : > { %3406 = vmatmul.mubr.bf16.gmra.mrb[52].mxu0 %v10130_v11 }
 0x228   : > { %3457 = vmatpush1.bf16.msra.mxu0 %v6550_v38 }
 0x229   : > { %v8534_v14 = vpop.permute.xlu0 %6143  ;;  %3458 = vmatprep.subr.bf16.mxu0 %v6555_v53  ;;  %v6564_v53 = vld [vmem:[%s9965_s3 + $0x2e4] ss:$8 sps:$4 sm:$0xff]  }
 0x22a   : > { %v10012_v23 = vunpack.i.h.bf16 %v8534_v14  ;;  %v10018_v62 = vunpack.i.l.bf16 %v8534_v14 }
 0x22c   : > { %v2086_v20 = vsel %vm1305_vm3, %v8277_v12, %v10018_v62  ;;  %v2087_v10 = vsel %vm1305_vm3, %v8258_v28, %v10012_v23  ;;  %3459 = vmatpush1.bf16.msra.mxu0 %v6553_v25  ;;  %v10131_v12 = vpack.c.bf16 %v7756_v42, %v7743_v18  ;;  %v6559_v28 = vld [vmem:[%s9965_s3 + $0x2d0] ss:$8 sps:$4 sm:$0xff]  }
 0x22d   : > { %v2159_v55 = vpack.c.bf16 %v2087_v10, %v2086_v20  ;;  %3460 = vmatprep.subr.bf16.mxu0 %v6558_v48  ;;  %v1431_v42 = vld [vmem:[#allocation2 + $0x1f8] sm:$0xf]  ;;  %v1430_v10 = vld [vmem:[#allocation2 + $0x1f0] sm:$0xf] }
 0x22e   : > { %v2169_v23 = vpack.c.bf16 %v1430_v10, %v7806_v35 }
 0x22f   : > { %3415 = vmatprep.mubr.bf16.mxu0 %v2159_v55  ;;  %v6562_v55 = vld [vmem:[%s9965_s3 + $0x2e0] ss:$8 sps:$4 sm:$0xff]  }
 0x230   : > { %3416 = vmatmul.mubr.bf16.gmra.mrb[56].mxu0 %v10131_v12 }
 0x231   : > { %v8552_v44 = vpop.permute.xlu0 %6153  ;;  %3461 = vmatpush1.bf16.msra.mxu0 %v6556_v34 }
 0x232   : > { %3462 = vmatprep.subr.bf16.mxu0 %v6561_v46  ;;  %v6155_v18 = vunpack.i.l.bf16 %v8552_v44  ;;  %v6156_v34 = vunpack.i.h.bf16 %v8552_v44 }
 0x234   : > { %v1766_v35 = vsel %vm1305_vm3, %v6155_v18, %v6156_v34 }
 0x235   : > { %v8563_v38 = vpop.permute.xlu0 %6163  ;;  %3463 = vmatpush1.bf16.msra.mxu0 %v6559_v28  ;;  %v6567_v28 = vld [vmem:[%s9965_s3 + $0x2f4] ss:$8 sps:$4 sm:$0xff]  }
 0x236   : > { %3464 = vmatprep.subr.bf16.mxu0 %v6564_v53  ;;  %v6565_v53 = vld [vmem:[%s9965_s3 + $0x2f0] ss:$8 sps:$4 sm:$0xff]  }
 0x239   : > { %v8571_v11 = vpop.permute.xlu1 %6148  ;;  %v8576_v20 = vpop.permute.xlu0 %6173  ;;  %3465 = vmatpush1.bf16.msra.mxu0 %v6562_v55  ;;  %v10015_v55 = vunpack.i.h.bf16 %v8563_v38 }
 0x23a   : > { %v10013_v25 = vunpack.i.h.bf16 %v8571_v11  ;;  %v10016_v48 = vunpack.i.l.bf16 %v8571_v11  ;;  %3466 = vmatprep.subr.bf16.mxu0 %v6567_v28 }
 0x23c   : > { %v2088_v46 = vsel %vm1305_vm3, %v8238_v51, %v10016_v48  ;;  %v2089_v12 = vsel %vm1305_vm3, %v1431_v42, %v10013_v25  ;;  %v1765_v51 = vsel %vm1305_vm3, %v6115_v1, %v6155_v18  ;;  %v6570_v1 = vld [vmem:[%s9965_s3 + $0x304] ss:$8 sps:$4 sm:$0xff]  }
 0x23d   : > { %v2170_v56 = vpack.c.bf16 %v2089_v12, %v2088_v46  ;;  %v6165_v12 = vunpack.i.l.bf16 %v8563_v38  ;;  %3467 = vmatpush1.bf16.msra.mxu0 %v6565_v53  ;;  %v6568_v53 = vld [vmem:[%s9965_s3 + $0x300] ss:$8 sps:$4 sm:$0xff]  }
 0x23e   : > { %v8592_v19 = vpop.permute.xlu1 %6158  ;;  %3549 = vmatprep.subr.bf16.mxu0 %v6570_v1 }
 0x23f   : > { %v6161_v21 = vunpack.i.h.bf16 %v8592_v19  ;;  %v6160_v54 = vunpack.i.l.bf16 %v8592_v19  ;;  %3425 = vmatprep.mubr.bf16.mxu0 %v2170_v56 }
 0x240   : > { %3426 = vmatmul.mubr.bf16.gmra.mrb[60].mxu0 %v2169_v23 }
 0x241   : > { %v1768_v46 = vsel %vm1305_vm3, %v6116_v43, %v6160_v54  ;;  %v1769_v56 = vsel %vm1305_vm3, %v6160_v54, %v6161_v21  ;;  %v6175_v54 = vunpack.i.l.bf16 %v8576_v20 }
 0x242   : > { %v2094_v10 = vpack.c.bf16 %v1768_v46, %v1765_v51  ;;  %v2095_v43 = vpack.c.bf16 %v1769_v56, %v1766_v35  ;;  %v1771_v51 = vsel %vm1305_vm3, %v6120_v52, %v6165_v12  ;;  %v6573_v52 = vld [vmem:[%s9965_s3 + $0x314] ss:$8 sps:$4 sm:$0xff]  }
 0x243   : > { %v8600_v42 = vpop.permute.xlu0 %6183 }
 0x244   : > { %3468 = vmatprep.mubr.bf16.mxu0 %v2095_v43  ;;  %v1772_v43 = vsel %vm1305_vm3, %v6165_v12, %v10015_v55  ;;  %v6574_v55 = vld [vmem:[%s9965_s3 + $0x320] ss:$8 sps:$4 sm:$0xff]  }
 0x246   : > { %v8618_v0 = vpop.permute.xlu1 %6168 }
 0x247   : > { %v10014_v23 = vunpack.i.h.bf16 %v8618_v0  ;;  %v6170_v25 = vunpack.i.l.bf16 %v8618_v0  ;;  %v8623_v18 = vpop.permute.xlu0 %6193 }
 0x248   : > { %3469 = vmatmul.mubr.bf16.vlgmr.msra.gmra.mrb[32].mxu0 %v2094_v10 }
 0x249   : > { %v1775_v28 = vsel %vm1305_vm3, %v6170_v25, %v10014_v23  ;;  %v1774_v46 = vsel %vm1305_vm3, %v6121_v4, %v6170_v25  ;;  %v6185_v23 = vunpack.i.l.bf16 %v8600_v42  ;;  %3550 = vmatpush1.bf16.msra.mxu0 %v6568_v53  ;;  %v10019_v53 = vunpack.i.l.bf16 %v8623_v18 }
 0x24a   : > { %v8635_v35 = vpop.permute.xlu1 %6178  ;;  %v2105_v56 = vpack.c.bf16 %v1774_v46, %v1771_v51  ;;  %v2106_v4 = vpack.c.bf16 %v1775_v28, %v1772_v43  ;;  %v8654_v51 = vsel %vm1305_vm3, %v6125_v29, %v6175_v54  ;;  %v6571_v28 = vld [vmem:[%s9965_s3 + $0x310] ss:$8 sps:$4 sm:$0xff]   ;;  %v10021_v43 = vunpack.i.h.bf16 %v8576_v20  ;;  %3551 = vmatprep.subr.bf16.mxu0 %v6573_v52 }
 0x24b   : > { %v6180_v1 = vunpack.i.l.bf16 %v8635_v35  ;;  %v8647_v30 = vpop.permute.xlu0 %6203  ;;  %v10017_v25 = vunpack.i.h.bf16 %v8635_v35 }
 0x24c   : > { %3478 = vmatprep.mubr.bf16.mxu0 %v2106_v4  ;;  %v1778_v27 = vsel %vm1305_vm3, %v6175_v54, %v10021_v43 }
 0x24d   : > { %v8659_v12 = vsel %vm1305_vm3, %v6126_v60, %v6180_v1  ;;  %v1781_v4 = vsel %vm1305_vm3, %v6180_v1, %v10017_v25  ;;  %3552 = vmatpush1.bf16.msra.mxu0 %v6571_v28 }
 0x24e   : > { %v8661_v46 = vpop.permute.xlu1 %6188  ;;  %v2116_v10 = vpack.c.bf16 %v8659_v12, %v8654_v51  ;;  %v8682_v51 = vsel %vm1305_vm3, %v6130_v22, %v6185_v23  ;;  %3553 = vmatprep.subr.bf16.mxu0 %v6576_v16  ;;  %v10022_v22 = vunpack.i.l.bf16 %v8647_v30  ;;  %v2117_v25 = vpack.c.bf16 %v1781_v4, %v1778_v27 }
 0x24f   : > { %v6190_v29 = vunpack.i.l.bf16 %v8661_v46  ;;  %v8673_v60 = vpop.permute.xlu0 %6213  ;;  %v10023_v62 = vunpack.i.h.bf16 %v8661_v46  ;;  %v8712_v16 = vsel %vm1305_vm3, %v6135_v3, %v10019_v53  ;;  %v10028_v3 = vunpack.i.h.bf16 %v8600_v42 }
 0x250   : > { %3479 = vmatmul.mubr.bf16.gmra.mrb[36].mxu0 %v2105_v56  ;;  %v6577_v56 = vld [vmem:[%s9965_s3 + $0x330] ss:$8 sps:$4 sm:$0xff]  }
 0x251   : > { %v8687_v52 = vsel %vm1305_vm3, %v6131_v45, %v6190_v29  ;;  %v6579_v45 = vld [vmem:[%s9965_s3 + $0x334] ss:$8 sps:$4 sm:$0xff]   ;;  %3488 = vmatprep.mubr.bf16.mxu0 %v2117_v25  ;;  %3554 = vmatpush1.bf16.msra.mxu0 %v6574_v55  ;;  %v8739_v55 = vsel %vm1305_vm3, %v6140_v61, %v10022_v22  ;;  %v6580_v61 = vld [vmem:[%s9965_s3 + $0x340] ss:$8 sps:$4 sm:$0xff]  }
 0x252   : > { %v8689_v12 = vpop.permute.xlu1 %6198  ;;  %3555 = vmatprep.subr.bf16.mxu0 %v6579_v45  ;;  %v1787_v45 = vsel %vm1305_vm3, %v6190_v29, %v10023_v62 }
 0x253   : > { %v10020_v48 = vunpack.i.l.bf16 %v8689_v12  ;;  %v8704_v28 = vpop.permute.xlu0 %6223 }
 0x255   : > { %v8719_v54 = vsel %vm1305_vm3, %v6136_v40, %v10020_v48  ;;  %v10026_v40 = vunpack.i.l.bf16 %v8673_v60  ;;  %3556 = vmatpush1.bf16.msra.mxu0 %v6577_v56  ;;  %v6585_v56 = vld [vmem:[%s9965_s3 + $0x354] ss:$8 sps:$4 sm:$0xff]  }
 0x256   : > { %v8721_v1 = vpop.permute.xlu1 %6208  ;;  %3557 = vmatprep.subr.bf16.mxu0 %v6582_v9 }
 0x257   : > { %v10029_v27 = vunpack.i.l.bf16 %v8721_v1  ;;  %v6234_v25 = vpop.permute.xlu0 %6233 }
 0x258   : > { %v6236_v4 = vunpack.i.h.bf16 %v6234_v25  ;;  %v6235_v53 = vunpack.i.l.bf16 %v6234_v25  ;;  %v10024_v25 = vmov 0   ;;  %3489 = vmatmul.mubr.bf16.gmra.mrb[40].mxu0 %v2116_v10  ;;  %v6583_v10 = vld [vmem:[%s9965_s3 + $0x350] ss:$8 sps:$4 sm:$0xff]  }
 0x259   : > { %v8749_v48 = vsel %vm1305_vm3, %v6141_v7, %v10029_v27  ;;  %v1784_v7 = vsel %vm1305_vm3, %v6185_v23, %v10028_v3  ;;  %3995 = vmatprep.mubr.bf16.mxu1 %v10024_v25  ;;  %v10133_v25 = vunpack.i.h.bf16 %v8534_v14  ;;  %3558 = vmatpush1.bf16.msra.mxu0 %v6580_v61  ;;  %v10136_v61 = vunpack.i.h.bf16 %v8576_v20 }
 0x25a   : > { %v8751_v43 = vpop.permute.xlu1 %6218  ;;  %v8762_v29 = vsel %vm1305_vm3, %v6161_v21, %v6236_v4  ;;  %v8767_v32 = vsel %vm1305_vm3, %v6156_v34, %v6235_v53  ;;  %v6201_v21 = vunpack.i.h.bf16 %v8689_v12  ;;  %v2128_v34 = vpack.c.bf16 %v1787_v45, %v1784_v7  ;;  %3559 = vmatprep.subr.bf16.mxu0 %v6585_v56 }
 0x25b   : > { %v10027_v22 = vunpack.i.l.bf16 %v8751_v43  ;;  %v6244_v44 = vpop.permute.xlu0 %6243  ;;  %v10132_v53 = vunpack.i.l.bf16 %v8534_v14  ;;  %v6196_v45 = vunpack.i.h.bf16 %v8623_v18  ;;  %v10139_v14 = vunpack.i.l.bf16 %v8689_v12 }
 0x25c   : > { %v6246_v9 = vunpack.i.h.bf16 %v6244_v44  ;;  %v6245_v62 = vunpack.i.l.bf16 %v6244_v44  ;;  %3498 = vmatprep.mubr.bf16.mxu0 %v2128_v34  ;;  %v10144_v12 = vunpack.i.h.bf16 %v8571_v11 }
 0x25d   : > { %v8784_v23 = vsel %vm1305_vm3, %v10132_v53, %v10026_v40  ;;  %v8792_v19 = vsel %vm1305_vm3, %v10133_v25, %v10027_v22  ;;  %v8797_v53 = vpop.f32.mrb[32].mxu1  ;;  %v6588_v25 = vld [vmem:[%s9965_s3 + $0x364] ss:$8 sps:$4 sm:$0xff]   ;;  %v10137_v22 = vunpack.i.h.bf16 %v8635_v35  ;;  %v1793_v56 = vsel %vm1305_vm3, %v10139_v14, %v6201_v21  ;;  %3560 = vmatpush1.bf16.msra.mxu0 %v6583_v10 }
 0x25e   : > { %v8795_v7 = vpop.permute.xlu1 %6228  ;;  %10134 = vst [vmem:[#allocation19_spill] sm:$0xff] %v8797_v53  ;;  %v8805_v40 = vpop.f32.mrb[33].mxu1  ;;  %v8813_v34 = vsel %vm1305_vm3, %v10136_v61, %v6245_v62  ;;  %v10141_v62 = vunpack.i.l.bf16 %v8704_v28  ;;  %v10142_v35 = vunpack.i.l.bf16 %v8571_v11  ;;  %3561 = vmatprep.subr.bf16.mxu0 %v6588_v25  ;;  %v10146_v25 = vpack.c.bf16 %v8687_v52, %v8682_v51  ;;  %v6589_v51 = vld [vmem:[%s9965_s3 + $0x370] ss:$8 sps:$4 sm:$0xff]  }
 0x25f   : > { %10135 = vst [vmem:[#allocation17_spill] sm:$0xff] %v8805_v40  ;;  %v8818_v3 = vsel %vm1305_vm3, %v10137_v22, %v6246_v9  ;;  %v6254_v44 = vpop.permute.xlu0 %6253  ;;  %v8820_v27 = vpop.f32.mrb[34].mxu1  ;;  %v10143_v9 = vunpack.i.l.bf16 %v8795_v7 }
 0x260   : > { %10138 = vst [vmem:[#allocation20_spill] sm:$0xff] %v8820_v27  ;;  %v6256_v40 = vunpack.i.h.bf16 %v6254_v44  ;;  %v6255_v20 = vunpack.i.l.bf16 %v6254_v44  ;;  %v8827_v53 = vpop.f32.mrb[35].mxu1  ;;  %v8834_v22 = vsel %vm1305_vm3, %v10142_v35, %v10141_v62  ;;  %v6586_v44 = vld [vmem:[%s9965_s3 + $0x360] ss:$8 sps:$4 sm:$0xff]   ;;  %3499 = vmatmul.mubr.bf16.gmra.mrb[44].mxu0 %v10146_v25 }
 0x261   : > { %10140 = vst [vmem:[#allocation21_spill] sm:$0xff] %v8827_v53  ;;  %v8841_v14 = vsel %vm1305_vm3, %v10144_v12, %v10143_v9  ;;  %v10145_v53 = vunpack.i.l.bf16 %v8623_v18  ;;  %v6591_v9 = vld [vmem:[%s9965_s3 + $0x374] ss:$8 sps:$4 sm:$0xff]   ;;  %v6211_v18 = vunpack.i.h.bf16 %v8721_v1  ;;  %3562 = vmatpush1.bf16.msra.mxu0 %v6586_v44 }
 0x262   : > { %v6239_v4 = vpop.permute.xlu1 %6238  ;;  %v8856_v10 = vsel %vm1305_vm3, %v6196_v45, %v6255_v20  ;;  %v8859_v12 = vsel %vm1305_vm3, %v6201_v21, %v6256_v40  ;;  %v10148_v21 = vunpack.i.h.bf16 %v8618_v0  ;;  %3563 = vmatprep.subr.bf16.mxu0 %v6591_v9  ;;  %v10154_v9 = vunpack.i.l.bf16 %v8721_v1 }
 0x263   : > { %v1790_v62 = vsel %vm1305_vm3, %v10145_v53, %v6196_v45  ;;  %v6241_v27 = vunpack.i.h.bf16 %v6239_v4  ;;  %v6240_v11 = vunpack.i.l.bf16 %v6239_v4  ;;  %v6221_v53 = vunpack.i.h.bf16 %v8751_v43  ;;  %v6264_v61 = vpop.permute.xlu0 %6263  ;;  %v8879_v4 = vpop.f32.mrb[36].mxu1 }
 0x264   : > { %v2139_v2 = vpack.c.bf16 %v1793_v56, %v1790_v62  ;;  %v6266_v35 = vunpack.i.h.bf16 %v6264_v61  ;;  %v6265_v57 = vunpack.i.l.bf16 %v6264_v61  ;;  %v10147_v45 = vunpack.i.h.bf16 %v8563_v38  ;;  %10149 = vst [vmem:[#allocation16_spill] sm:$0xff] %v8879_v4  ;;  %v8886_v0 = vpop.f32.mrb[37].mxu1 }
 0x265   : > { %v8876_v20 = vsel %vm1305_vm3, %v10148_v21, %v6241_v27  ;;  %v6206_v56 = vunpack.i.h.bf16 %v8647_v30  ;;  %10150 = vst [vmem:[#allocation23_spill] sm:$0xff] %v8886_v0  ;;  %v6594_v27 = vld [vmem:[%s9965_s3 + $0x384] ss:$8 sps:$4 sm:$0xff]   ;;  %v8899_v25 = vpop.f32.mrb[38].mxu1  ;;  %v10155_v38 = vunpack.i.h.bf16 %v8600_v42  ;;  %3564 = vmatpush1.bf16.msra.mxu0 %v6589_v51  ;;  %v10157_v42 = vunpack.i.l.bf16 %v8647_v30 }
 0x266   : > { %v8871_v40 = vsel %vm1305_vm3, %v10147_v45, %v6240_v11  ;;  %v6249_v62 = vpop.permute.xlu1 %6248  ;;  %3508 = vmatprep.mubr.bf16.mxu0 %v2139_v2  ;;  %v10151_v2 = vunpack.i.h.bf16 %v8673_v60  ;;  %v8897_v11 = vsel %vm1305_vm3, %v6221_v53, %v6266_v35  ;;  %10152 = vst [vmem:[#allocation24_spill] sm:$0xff] %v8899_v25  ;;  %v8903_v21 = vpop.f32.mrb[39].mxu1  ;;  %v6592_v45 = vld [vmem:[%s9965_s3 + $0x380] ss:$8 sps:$4 sm:$0xff]   ;;  %3565 = vmatprep.subr.bf16.mxu0 %v6594_v27  ;;  %v10160_v1 = vunpack.i.h.bf16 %v8673_v60 }
 0x267   : > { %v6251_v52 = vunpack.i.h.bf16 %v6249_v62  ;;  %v6250_v61 = vunpack.i.l.bf16 %v6249_v62  ;;  %10153 = vst [vmem:[#allocation25_spill] sm:$0xff] %v8903_v21  ;;  %v1799_v62 = vsel %vm1305_vm3, %v10154_v9, %v6211_v18  ;;  %v10158_v51 = vpack.c.bf16 %v8719_v54, %v8712_v16  ;;  %v8938_v30 = vpop.f32.mrb[40].mxu1 }
 0x268   : > { %v8894_v44 = vsel %vm1305_vm3, %v10151_v2, %v6265_v57  ;;  %v10156_v57 = vunpack.i.h.bf16 %v8661_v46  ;;  %v6597_v46 = vld [vmem:[%s9965_s3 + $0x394] ss:$8 sps:$4 sm:$0xff]   ;;  %v6226_v16 = vunpack.i.h.bf16 %v8704_v28  ;;  %v6231_v54 = vunpack.i.h.bf16 %v8795_v7 }
 0x269   : > { %v8911_v0 = vsel %vm1305_vm3, %v10155_v38, %v6250_v61  ;;  %v1796_v38 = vsel %vm1305_vm3, %v10157_v42, %v6206_v56  ;;  %3509 = vmatmul.mubr.bf16.gmra.mrb[48].mxu0 %v10158_v51 }
 0x26a   : > { %v8916_v35 = vsel %vm1305_vm3, %v10156_v57, %v6251_v52  ;;  %v6259_v2 = vpop.permute.xlu1 %6258  ;;  %v2150_v52 = vpack.c.bf16 %v1799_v62, %v1796_v38  ;;  %3566 = vmatpush1.bf16.msra.mxu0 %v6592_v45  ;;  %v6600_v45 = vld [vmem:[%s9965_s3 + $0x3a4] ss:$8 sps:$4 sm:$0xff]   ;;  %v10159_v38 = vunpack.i.l.bf16 %v8751_v43  ;;  %v10161_v43 = vunpack.i.l.bf16 %v8673_v60 }
 0x26b   : > { %v6261_v9 = vunpack.i.h.bf16 %v6259_v2  ;;  %v6260_v21 = vunpack.i.l.bf16 %v6259_v2  ;;  %v6595_v2 = vld [vmem:[%s9965_s3 + $0x390] ss:$8 sps:$4 sm:$0xff]   ;;  %3567 = vmatprep.subr.bf16.mxu0 %v6597_v46  ;;  %v6598_v46 = vld [vmem:[%s9965_s3 + $0x3a0] ss:$8 sps:$4 sm:$0xff]  }
 0x26c   : > { %3518 = vmatprep.mubr.bf16.mxu0 %v2150_v52  ;;  %v1805_v52 = vsel %vm1305_vm3, %v10159_v38, %v6221_v53  ;;  %v1802_v53 = vsel %vm1305_vm3, %v10161_v43, %v10160_v1  ;;  %v6606_v1 = vld [vmem:[%s9965_s3 + $0x3c4] ss:$8 sps:$4 sm:$0xff]  }
 0x26d   : > { %v8933_v61 = vsel %vm1305_vm3, %v6206_v56, %v6260_v21  ;;  %v8936_v57 = vsel %vm1305_vm3, %v6211_v18, %v6261_v9  ;;  %v8947_v18 = vpop.f32.mrb[41].mxu1 }
 0x26e   : > { %v6269_v27 = vpop.permute.xlu1 %6268  ;;  %v8952_v9 = vpop.f32.mrb[42].mxu1  ;;  %3568 = vmatpush1.bf16.msra.mxu0 %v6595_v2  ;;  %v10162_v2 = vpack.c.bf16 %v8749_v48, %v8739_v55  ;;  %v10163_v48 = vunpack.i.l.bf16 %v8795_v7  ;;  %v10165_v7 = vpack.c.bf16 %v8792_v19, %v8784_v23  ;;  %v6695_v19 = vld [vmem:[#allocation2 + $0x20] sm:$0xff] }
 0x26f   : > { %v6271_v56 = vunpack.i.h.bf16 %v6269_v27  ;;  %v6270_v21 = vunpack.i.l.bf16 %v6269_v27  ;;  %v8954_v42 = vpop.f32.mrb[43].mxu1  ;;  %3569 = vmatprep.subr.bf16.mxu0 %v6600_v45  ;;  %v6601_v45 = vld [vmem:[%s9965_s3 + $0x3b0] ss:$8 sps:$4 sm:$0xff]   ;;  %v1887_v23 = vrot.slane %v6695_v19, 2 }
 0x270   : > { %v8981_v38 = vpop.f32.mrb[44].mxu1  ;;  %v1811_v55 = vsel %vm1305_vm3, %v10163_v48, %v6231_v54 }
 0x271   : > { %v8960_v51 = vsel %vm1305_vm3, %v6226_v16, %v6270_v21  ;;  %v8963_v27 = vsel %vm1305_vm3, %v6231_v54, %v6271_v56  ;;  %v6603_v56 = vld [vmem:[%s9965_s3 + $0x3b4] ss:$8 sps:$4 sm:$0xff]   ;;  %v2161_v21 = vpack.c.bf16 %v1805_v52, %v1802_v53  ;;  %3519 = vmatmul.mubr.bf16.gmra.mrb[52].mxu0 %v10162_v2  ;;  %v8986_v60 = vpop.f32.mrb[45].mxu1  ;;  %v1440_v53 = vld [vmem:[#allocation2] sm:$0xfc] }
 0x272   : > { %3570 = vmatpush1.bf16.msra.mxu0 %v6598_v46  ;;  %v8991_v52 = vpop.f32.mrb[46].mxu1  ;;  %v6604_v46 = vld [vmem:[%s9965_s3 + $0x3c0] ss:$8 sps:$4 sm:$0xff]   ;;  %v6609_v2 = vld [vmem:[%s9965_s3 + $0x3d4] ss:$8 sps:$4 sm:$0xff]   ;;  %v1886_v54 = vrot.slane %v1440_v53, 2 }
 0x273   : > { %3528 = vmatprep.mubr.bf16.mxu0 %v2161_v21  ;;  %3571 = vmatprep.subr.bf16.mxu0 %v6603_v56  ;;  %v8993_v43 = vpop.f32.mrb[47].mxu1  ;;  %v10164_v56 = vunpack.i.l.bf16 %v8704_v28  ;;  %v6607_v28 = vld [vmem:[%s9965_s3 + $0x3d0] ss:$8 sps:$4 sm:$0xff]  }
 0x274   : > { %v9010_v25 = vpop.f32.mrb[48].mxu1 }
 0x275   : > { %v1808_v21 = vsel %vm1305_vm3, %v10164_v56, %v6226_v16  ;;  %v9015_v16 = vpop.f32.mrb[49].mxu1  ;;  %v6610_v56 = vld [vmem:[%s9965_s3 + $0x3e0] ss:$8 sps:$4 sm:$0xff]  }
 0x276   : > { %3572 = vmatpush1.bf16.msra.mxu0 %v6601_v45  ;;  %v2172_v62 = vpack.c.bf16 %v1811_v55, %v1808_v21  ;;  %v6694_v45 = vld [vmem:[#allocation2 + $0x40] sm:$0xff]  ;;  %v9020_v55 = vpop.f32.mrb[50].mxu1  ;;  %v6615_v21 = vld [vmem:[%s9965_s3 + $0x3f4] ss:$8 sps:$4 sm:$0xff]  }
 0x277   : > { %3573 = vmatprep.subr.bf16.mxu0 %v6606_v1  ;;  %v1898_v48 = vrot.slane %v6694_v45, 2  ;;  %v6612_v1 = vld [vmem:[%s9965_s3 + $0x3e4] ss:$8 sps:$4 sm:$0xff]   ;;  %v9022_v53 = vpop.f32.mrb[51].mxu1 }
 0x278   : > { %v6696_v45 = vld [vmem:[#allocation2 + $0x80] sm:$0xff] }
 0x279   : > { %3529 = vmatmul.mubr.bf16.gmra.mrb[56].mxu0 %v10165_v7  ;;  %v10166_v7 = vpack.c.bf16 %v8841_v14, %v8834_v22  ;;  %v1914_v19 = vrot.slane %v6696_v45, 2  ;;  %v6698_v14 = vld [vmem:[%s9965_s3 + $0x404] ss:$8 sps:$4 sm:$0xff]  }
 0x27a   : > { %3538 = vmatprep.mubr.bf16.mxu0 %v2172_v62  ;;  %3574 = vmatpush1.bf16.msra.mxu0 %v6604_v46  ;;  %v1888_v62 = vsel %vm1885_vm5, %v1886_v54, %v1887_v23  ;;  %v1899_v46 = vsel %vm1885_vm5, %v1887_v23, %v1898_v48  ;;  %v9035_v54 = vpop.f32.mrb[52].mxu1 }
 0x27b   : > { %3575 = vmatprep.subr.bf16.mxu0 %v6609_v2  ;;  %v2097_v2 = vpack.c.bf16 %v1899_v46, %v1888_v62  ;;  %v9040_v4 = vpop.f32.mrb[53].mxu1 }
 0x27c   : > { %v9042_v62 = vpop.f32.mrb[54].mxu1 }
 0x27d   : > { %v9044_v46 = vpop.f32.mrb[55].mxu1 }
 0x27e   : > { %3576 = vmatpush1.bf16.msra.mxu0 %v6607_v28  ;;  %v6613_v28 = vld [vmem:[%s9965_s3 + $0x3f0] ss:$8 sps:$4 sm:$0xff]   ;;  %10167 = vst [vmem:[#allocation26_spill] sm:$0xff] %v9044_v46 }
 0x27f   : > { %3577 = vmatprep.subr.bf16.mxu0 %v6612_v1  ;;  %v6697_v1 = vld [vmem:[#allocation2 + $0x60] sm:$0xff] }
 0x280   : > { %v1906_v23 = vrot.slane %v6697_v1, 2 }
 0x281   : > { %3539 = vmatmul.mubr.bf16.gmra.mrb[60].mxu0 %v10166_v7  ;;  %v10168_v7 = vpack.c.bf16 %v8762_v29, %v8767_v32  ;;  %v10169_v32 = vrot.slane %v10115_v49, 2  ;;  %v6704_v49 = vld [vmem:[%s9965_s3 + $0x420] ss:$8 sps:$4 sm:$0xff]  }
 0x282   : > { %3578 = vmatpush1.bf16.msra.mxu0 %v6610_v56  ;;  %3581 = vmatprep.mubr.bf16.mxu0 %v2097_v2  ;;  %v1915_v22 = vsel %vm1885_vm5, %v1906_v23, %v1914_v19  ;;  %v1907_v56 = vsel %vm1885_vm5, %v1898_v48, %v1906_v23  ;;  %v9057_v45 = vpop.f32.mrb[56].mxu1  ;;  %v6701_v48 = vld [vmem:[%s9965_s3 + $0x414] ss:$8 sps:$4 sm:$0xff]  }
 0x283   : > { %3579 = vmatprep.subr.bf16.mxu0 %v6615_v21  ;;  %v2108_v2 = vpack.c.bf16 %v1915_v22, %v1907_v56  ;;  %v6699_v21 = vld [vmem:[%s9965_s3 + $0x400] ss:$8 sps:$4 sm:$0xff]   ;;  %v9059_v46 = vpop.f32.mrb[57].mxu1  ;;  %v6703_v56 = vld [vmem:[%s9965_s3 + $0x424] ss:$8 sps:$4 sm:$0xff]  }
 0x284   : > { %v9064_v23 = vpop.f32.mrb[58].mxu1 }
 0x285   : > { %v9066_v29 = vpop.f32.mrb[59].mxu1 }
 0x286   : > { %3580 = vmatpush1.bf16.msra.mxu0 %v6613_v28  ;;  %v6700_v28 = vld [vmem:[#allocation2 + $0xa0] sm:$0xff] }
 0x287   : > { %3662 = vmatprep.subr.bf16.mxu0 %v6698_v14  ;;  %v1922_v1 = vrot.slane %v6700_v28, 2  ;;  %v6702_v14 = vld [vmem:[%s9965_s3 + $0x410] ss:$8 sps:$4 sm:$0xff]   ;;  %v6705_v28 = vld [vmem:[%s9965_s3 + $0x434] ss:$8 sps:$4 sm:$0xff]  }
 0x289   : > { %3582 = vmatmul.mubr.bf16.vlgmr.msra.gmra.mrb[32].mxu0 %v10168_v7  ;;  %v1931_v22 = vsel %vm1885_vm5, %v1922_v1, %v10169_v32  ;;  %v6708_v32 = vld [vmem:[%s9965_s3 + $0x440] ss:$8 sps:$4 sm:$0xff]  }
 0x28a   : > { %3591 = vmatprep.mubr.bf16.mxu0 %v2108_v2  ;;  %3663 = vmatpush1.bf16.msra.mxu0 %v6699_v21  ;;  %v1923_v2 = vsel %vm1885_vm5, %v1914_v19, %v1922_v1  ;;  %v10170_v21 = vpack.c.bf16 %v8876_v20, %v8871_v40  ;;  %v6706_v19 = vld [vmem:[%s9965_s3 + $0x430] ss:$8 sps:$4 sm:$0xff]   ;;  %v6707_v40 = vld [vmem:[%s9965_s3 + $0x444] ss:$8 sps:$4 sm:$0xff]   ;;  %v10171_v20 = vpack.c.bf16 %v8818_v3, %v8813_v34 }
 0x28b   : > { %3664 = vmatprep.subr.bf16.mxu0 %v6701_v48  ;;  %v2119_v7 = vpack.c.bf16 %v1931_v22, %v1923_v2  ;;  %v10172_v48 = vpack.c.bf16 %v8246_v41, %v8243_v31  ;;  %v6710_v31 = vld [vmem:[%s9965_s3 + $0x450] ss:$8 sps:$4 sm:$0xff]   ;;  %v6711_v41 = vld [vmem:[%s9965_s3 + $0x464] ss:$8 sps:$4 sm:$0xff]  }
 0x28e   : > { %3665 = vmatpush1.bf16.msra.mxu0 %v6702_v14  ;;  %v6709_v14 = vld [vmem:[%s9965_s3 + $0x454] ss:$8 sps:$4 sm:$0xff]  }
 0x28f   : > { %3666 = vmatprep.subr.bf16.mxu0 %v6703_v56  ;;  %v10173_v56 = vpack.c.bf16 %v8916_v35, %v8911_v0 }
 0x291   : > { %3592 = vmatmul.mubr.bf16.gmra.mrb[36].mxu0 %v10170_v21  ;;  %v6712_v21 = vld [vmem:[%s9965_s3 + $0x460] ss:$8 sps:$4 sm:$0xff]  }
 0x292   : > { %3601 = vmatprep.mubr.bf16.mxu0 %v2119_v7  ;;  %3667 = vmatpush1.bf16.msra.mxu0 %v6704_v49  ;;  %v10174_v7 = vpack.c.bf16 %v8252_v37, %v8249_v26  ;;  %v6714_v26 = vld [vmem:[%s9965_s3 + $0x470] ss:$8 sps:$4 sm:$0xff]   ;;  %v6715_v37 = vld [vmem:[%s9965_s3 + $0x484] ss:$8 sps:$4 sm:$0xff]  }
 0x293   : > { %3668 = vmatprep.subr.bf16.mxu0 %v6705_v28  ;;  %v6713_v28 = vld [vmem:[%s9965_s3 + $0x474] ss:$8 sps:$4 sm:$0xff]  }
 0x296   : > { %3669 = vmatpush1.bf16.msra.mxu0 %v6706_v19  ;;  %v10175_v19 = vpack.c.bf16 %v8859_v12, %v8856_v10 }
 0x297   : > { %3670 = vmatprep.subr.bf16.mxu0 %v6707_v40  ;;  %v9096_v1 = vpop.f32.mrb[60].mxu1 }
 0x298   : > { %v9104_v22 = vpop.f32.mrb[61].mxu1 }
 0x299   : > { %3602 = vmatmul.mubr.bf16.gmra.mrb[40].mxu0 %v10171_v20  ;;  %v9109_v3 = vpop.f32.mrb[62].mxu1  ;;  %v10176_v20 = vpack.c.bf16 %v8280_v17, %v8265_v47  ;;  %v6718_v47 = vld [vmem:[%s9965_s3 + $0x490] ss:$8 sps:$4 sm:$0xff]   ;;  %v1444_v17 = vld [vmem:[#allocation2 + $0x1e0] sm:$0x3f] }
 0x29a   : > { %3611 = vmatprep.mubr.bf16.mxu0 %v10172_v48  ;;  %3671 = vmatpush1.bf16.msra.mxu0 %v6708_v32  ;;  %v9111_v34 = vpop.f32.mrb[63].mxu1  ;;  %v6716_v48 = vld [vmem:[%s9965_s3 + $0x480] ss:$8 sps:$4 sm:$0xff]  }
 0x29b   : > { %3672 = vmatprep.subr.bf16.mxu0 %v6709_v14  ;;  %v6717_v14 = vld [vmem:[%s9965_s3 + $0x494] ss:$8 sps:$4 sm:$0xff]  }
 0x29e   : > { %3673 = vmatpush1.bf16.msra.mxu0 %v6710_v31  ;;  %v6719_v31 = vld [vmem:[%s9965_s3 + $0x4a4] ss:$8 sps:$4 sm:$0xff]  }
 0x29f   : > { %3674 = vmatprep.subr.bf16.mxu0 %v6711_v41  ;;  %v10177_v41 = vpack.c.bf16 %v8936_v57, %v8933_v61 }
 0x2a1   : > { %3612 = vmatmul.mubr.bf16.gmra.mrb[44].mxu0 %v10173_v56  ;;  %v2002_v56 = vrot.slane %v1444_v17, 2 }
 0x2a2   : > { %3621 = vmatprep.mubr.bf16.mxu0 %v10174_v7  ;;  %3675 = vmatpush1.bf16.msra.mxu0 %v6712_v21  ;;  %v10178_v21 = vpack.c.bf16 %v8299_v63, %v8285_v13  ;;  %v6722_v63 = vld [vmem:[%s9965_s3 + $0x4b0] ss:$8 sps:$4 sm:$0xff]  }
 0x2a3   : > { %3676 = vmatprep.subr.bf16.mxu0 %v6713_v28  ;;  %v6720_v28 = vld [vmem:[%s9965_s3 + $0x4a0] ss:$8 sps:$4 sm:$0xff]  }
 0x2a5   : > { %v9122_v2 = vpop.f32.mrb[64].mxu1 }
 0x2a6   : > { %v9130_v49 = vpop.f32.mrb[65].mxu1  ;;  %3677 = vmatpush1.bf16.msra.mxu0 %v6714_v26 }
 0x2a7   : > { %v9135_v0 = vpop.f32.mrb[66].mxu1  ;;  %3678 = vmatprep.subr.bf16.mxu0 %v6715_v37  ;;  %v6721_v37 = vld [vmem:[%s9965_s3 + $0x4b4] ss:$8 sps:$4 sm:$0xff]  }
 0x2a8   : > { %v9137_v35 = vpop.f32.mrb[67].mxu1 }
 0x2a9   : > { %3622 = vmatmul.mubr.bf16.gmra.mrb[48].mxu0 %v10175_v19  ;;  %v10179_v19 = vrot.slane %v10117_v5, 2  ;;  %v1902_v5 = vrot.slane %v8423_v33, 2 }
 0x2aa   : > { %3631 = vmatprep.mubr.bf16.mxu0 %v10176_v20  ;;  %3679 = vmatpush1.bf16.msra.mxu0 %v6716_v48  ;;  %v1442_v20 = vld [vmem:[#allocation2 + $0x10] sm:$0xfc]  ;;  %v6723_v48 = vld [vmem:[%s9965_s3 + $0x4c4] ss:$8 sps:$4 sm:$0xff]  }
 0x2ab   : > { %3680 = vmatprep.subr.bf16.mxu0 %v6717_v14  ;;  %v2003_v13 = vsel %vm1885_vm5, %v10179_v19, %v2002_v56  ;;  %v1892_v17 = vrot.slane %v1442_v20, 2  ;;  %v6726_v19 = vld [vmem:[%s9965_s3 + $0x4d0] ss:$8 sps:$4 sm:$0xff]  }
 0x2ac   : > { %v2174_v14 = vpack.c.bf16 %v2002_v56, %v2003_v13  ;;  %v6725_v56 = vld [vmem:[%s9965_s3 + $0x4d4] ss:$8 sps:$4 sm:$0xff]   ;;  %v6727_v13 = vld [vmem:[%s9965_s3 + $0x4e4] ss:$8 sps:$4 sm:$0xff]  }
 0x2ad   : > { %v9148_v40 = vpop.f32.mrb[68].mxu1 }
 0x2ae   : > { %v9156_v32 = vpop.f32.mrb[69].mxu1  ;;  %3681 = vmatpush1.bf16.msra.mxu0 %v6718_v47  ;;  %v10180_v47 = vpack.c.bf16 %v8897_v11, %v8894_v44  ;;  %v1893_v44 = vrot.slane %v8396_v39, 2  ;;  %v10181_v39 = vpack.c.bf16 %v8963_v27, %v8960_v51  ;;  %v6618_v51 = vld [vmem:[%s9965_s3 + $0x504] ss:$8 sps:$4 sm:$0xff]   ;;  %v1910_v27 = vrot.slane %v8425_v6, 2 }
 0x2af   : > { %v9161_v10 = vpop.f32.mrb[70].mxu1  ;;  %3682 = vmatprep.subr.bf16.mxu0 %v6719_v31 }
 0x2b0   : > { %v9163_v12 = vpop.f32.mrb[71].mxu1  ;;  %v1911_v6 = vsel %vm1885_vm5, %v1902_v5, %v1910_v27 }
 0x2b1   : > { %3632 = vmatmul.mubr.bf16.gmra.mrb[52].mxu0 %v10177_v41  ;;  %v6724_v41 = vld [vmem:[%s9965_s3 + $0x4c0] ss:$8 sps:$4 sm:$0xff]  }
 0x2b2   : > { %3641 = vmatprep.mubr.bf16.mxu0 %v10178_v21  ;;  %3683 = vmatpush1.bf16.msra.mxu0 %v6720_v28  ;;  %v1894_v28 = vsel %vm1885_vm5, %v1892_v17, %v1893_v44 }
 0x2b3   : > { %3684 = vmatprep.subr.bf16.mxu0 %v6721_v37  ;;  %v1903_v37 = vsel %vm1885_vm5, %v1893_v44, %v1902_v5  ;;  %v6624_v5 = vld [vmem:[%s9965_s3 + $0x524] ss:$8 sps:$4 sm:$0xff]  }
 0x2b5   : > { %v9174_v7 = vpop.f32.mrb[72].mxu1 }
 0x2b6   : > { %v9182_v26 = vpop.f32.mrb[73].mxu1  ;;  %3685 = vmatpush1.bf16.msra.mxu0 %v6722_v63  ;;  %v2099_v63 = vpack.c.bf16 %v1903_v37, %v1894_v28  ;;  %v6730_v37 = vld [vmem:[%s9965_s3 + $0x4f0] ss:$8 sps:$4 sm:$0xff]  }
 0x2b7   : > { %v9187_v61 = vpop.f32.mrb[74].mxu1  ;;  %3686 = vmatprep.subr.bf16.mxu0 %v6723_v48  ;;  %v6728_v48 = vld [vmem:[%s9965_s3 + $0x4e0] ss:$8 sps:$4 sm:$0xff]  }
 0x2b8   : > { %v9189_v57 = vpop.f32.mrb[75].mxu1 }
 0x2b9   : > { %3642 = vmatmul.mubr.bf16.gmra.mrb[56].mxu0 %v10180_v47  ;;  %v6729_v47 = vld [vmem:[%s9965_s3 + $0x4f4] ss:$8 sps:$4 sm:$0xff]  }
 0x2ba   : > { %3651 = vmatprep.mubr.bf16.mxu0 %v2174_v14  ;;  %3687 = vmatpush1.bf16.msra.mxu0 %v6724_v41 }
 0x2bb   : > { %3688 = vmatprep.subr.bf16.mxu0 %v6725_v56  ;;  %v10182_v56 = vld [vmem:[#allocation15_spill] sm:$0xff] }
 0x2bc   : > { %v10183_v44 = vrot.slane %v10182_v56, 2 }
 0x2bd   : > { %v9204_v31 = vpop.f32.mrb[76].mxu1 }
 0x2be   : > { %v9209_v21 = vpop.f32.mrb[77].mxu1  ;;  %3689 = vmatpush1.bf16.msra.mxu0 %v6726_v19  ;;  %v1919_v28 = vsel %vm1885_vm5, %v1910_v27, %v10183_v44  ;;  %v6616_v19 = vld [vmem:[%s9965_s3 + $0x500] ss:$8 sps:$4 sm:$0xff]   ;;  %v10185_v44 = vpack.c.bf16 %v8329_v24, %v8216_v59  ;;  %v6731_v59 = vld [vmem:[#allocation2 + $0xd8] sm:$0xff] }
 0x2bf   : > { %v9215_v11 = vpop.f32.mrb[78].mxu1  ;;  %3690 = vmatprep.subr.bf16.mxu0 %v6727_v13  ;;  %v6621_v13 = vld [vmem:[%s9965_s3 + $0x514] ss:$8 sps:$4 sm:$0xff]   ;;  %v1936_v24 = vrot.slane %v6731_v59, 2 }
 0x2c0   : > { %v9217_v33 = vpop.f32.mrb[79].mxu1 }
 0x2c1   : > { %3652 = vmatmul.mubr.bf16.gmra.mrb[60].mxu0 %v10181_v39  ;;  %v10184_v39 = vpack.c.bf16 %v8211_v8, %v8313_v36  ;;  %v6622_v8 = vld [vmem:[%s9965_s3 + $0x520] ss:$8 sps:$4 sm:$0xff]   ;;  %v6627_v36 = vld [vmem:[%s9965_s3 + $0x534] ss:$8 sps:$4 sm:$0xff]  }
 0x2c2   : > { %3691 = vmatpush1.bf16.msra.mxu0 %v6728_v48  ;;  %3694 = vmatprep.mubr.bf16.mxu0 %v2099_v63  ;;  %v2110_v63 = vpack.c.bf16 %v1919_v28, %v1911_v6  ;;  %v6625_v28 = vld [vmem:[%s9965_s3 + $0x530] ss:$8 sps:$4 sm:$0xff]  }
 0x2c3   : > { %3692 = vmatprep.subr.bf16.mxu0 %v6729_v47  ;;  %v6619_v47 = vld [vmem:[%s9965_s3 + $0x510] ss:$8 sps:$4 sm:$0xff]  }
 0x2c4   : > { %v10188_v6 = vld [vmem:[#allocation18_spill] sm:$0xff] }
 0x2c5   : > { %v9230_v20 = vpop.f32.mrb[80].mxu1 }
 0x2c6   : > { %v9235_v14 = vpop.f32.mrb[81].mxu1  ;;  %3693 = vmatpush1.bf16.msra.mxu0 %v6730_v37  ;;  %v10186_v37 = vmov 0  }
 0x2c7   : > { %v9244_v17 = vpop.f32.mrb[82].mxu1  ;;  %3775 = vmatprep.subr.bf16.mxu0 %v6618_v51 }
 0x2c8   : > { %v9246_v41 = vpop.f32.mrb[83].mxu1 }
 0x2c9   : > { %3695 = vmatmul.mubr.bf16.vlgmr.msra.gmra.mrb[32].mxu0 %v10184_v39 }
 0x2ca   : > { %3704 = vmatprep.mubr.bf16.mxu0 %v2110_v63  ;;  %3776 = vmatpush1.bf16.msra.mxu0 %v6616_v19  ;;  %v10187_v19 = vpack.c.bf16 %v8344_v15, %v8337_v50  ;;  %v6732_v63 = vld [vmem:[#allocation2 + $0xb8] sm:$0xff] }
 0x2cb   : > { %3777 = vmatprep.subr.bf16.mxu0 %v6621_v13  ;;  %v10189_v13 = vpack.c.bf16 %v8368_v58, %v10188_v6  ;;  %v1928_v39 = vrot.slane %v6732_v63, 2  ;;  %v6734_v58 = vld [vmem:[#allocation2 + $0xf8] sm:$0xff] }
 0x2cd   : > { %v9264_v48 = vpop.f32.mrb[84].mxu1 }
 0x2ce   : > { %v9269_v51 = vpop.f32.mrb[85].mxu1  ;;  %3778 = vmatpush1.bf16.msra.mxu0 %v6619_v47  ;;  %v1937_v47 = vsel %vm1885_vm5, %v1928_v39, %v1936_v24 }
 0x2cf   : > { %v9274_v27 = vpop.f32.mrb[86].mxu1  ;;  %3779 = vmatprep.subr.bf16.mxu0 %v6624_v5  ;;  %v10190_v5 = vld [vmem:[#allocation22_spill] sm:$0xff] }
 0x2d0   : > { %v9276_v56 = vpop.f32.mrb[87].mxu1 }
 0x2d1   : > { %3705 = vmatmul.mubr.bf16.gmra.mrb[36].mxu0 %v10185_v44 }
 0x2d2   : > { %3780 = vmatpush1.bf16.msra.mxu0 %v6622_v8  ;;  %3807 = vmatprep.mubr.bf16.mxu0 %v10186_v37  ;;  %v10191_v8 = vrot.slane %v10190_v5, 2 }
 0x2d3   : > { %3781 = vmatprep.subr.bf16.mxu0 %v6627_v36  ;;  %v6733_v36 = vld [vmem:[#allocation2 + $0x118] sm:$0xff] }
 0x2d4   : > { %v1929_v50 = vsel %vm1885_vm5, %v10191_v8, %v1928_v39  ;;  %v1952_v44 = vrot.slane %v6733_v36, 2  ;;  %v6736_v39 = vld [vmem:[#allocation2 + $0x138] sm:$0xff] }
 0x2d5   : > { %v2122_v15 = vpack.c.bf16 %v1937_v47, %v1929_v50  ;;  %v1960_v47 = vrot.slane %v6736_v39, 2 }
 0x2d6   : > { %3782 = vmatpush1.bf16.msra.mxu0 %v6625_v28  ;;  %v1944_v28 = vrot.slane %v6734_v58, 2 }
 0x2d7   : > { %4994 = vmatprep.subr.bf16.mxu0 %v10186_v37  ;;  %v1961_v8 = vsel %vm1885_vm5, %v1952_v44, %v1960_v47 }
 0x2d8   : > { %v1945_v59 = vsel %vm1885_vm5, %v1936_v24, %v1944_v28  ;;  %v6738_v24 = vld [vmem:[#allocation2 + $0x178] sm:$0xff] }
 0x2d9   : > { %5548 = vmatmul.mubr.msk.bf16.vlgmr.msra.gmra.mrb[32].mxu0 %vm1305_vm3, %v10187_v19  ;;  %v1953_v19 = vsel %vm1885_vm5, %v1944_v28, %v1952_v44  ;;  %v1976_v58 = vrot.slane %v6738_v24, 2  ;;  %v6740_v44 = vld [vmem:[#allocation2 + $0x1b8] sm:$0xff] }
 0x2da   : > { %3817 = vmatprep.mubr.bf16.mxu0 %v10186_v37  ;;  %v2133_v6 = vpack.c.bf16 %v1953_v19, %v1945_v59  ;;  %v1992_v39 = vrot.slane %v6740_v44, 2 }
 0x2e1   : > { %5549 = vmatmul.mubr.msk.bf16.gmra.mrb[36].mxu0 %vm1305_vm3, %v10189_v13  ;;  %v6735_v13 = vld [vmem:[#allocation2 + $0x158] sm:$0xff] }
 0x2e2   : > { %3827 = vmatprep.mubr.bf16.mxu0 %v10186_v37  ;;  %v1968_v63 = vrot.slane %v6735_v13, 2 }
 0x2e4   : > { %v1969_v5 = vsel %vm1885_vm5, %v1960_v47, %v1968_v63  ;;  %v1977_v19 = vsel %vm1885_vm5, %v1968_v63, %v1976_v58 }
 0x2e5   : > { %v2144_v50 = vpack.c.bf16 %v1969_v5, %v1961_v8  ;;  %v1447_v5 = vld [vmem:[#allocation2 + $0x1f8] sm:$0x3f] }
 0x2e9   : > { %5550 = vmatmul.mubr.msk.bf16.gmra.mrb[64].mxu0 %vm1305_vm3, %v2122_v15  ;;  %v6737_v15 = vld [vmem:[#allocation2 + $0x198] sm:$0xff] }
 0x2ea   : > { %3837 = vmatprep.mubr.bf16.mxu0 %v10186_v37  ;;  %v1984_v36 = vrot.slane %v6737_v15, 2  ;;  %v2008_v15 = vrot.slane %v1447_v5, 2 }
 0x2ec   : > { %v1985_v28 = vsel %vm1885_vm5, %v1976_v58, %v1984_v36  ;;  %v1993_v8 = vsel %vm1885_vm5, %v1984_v36, %v1992_v39 }
 0x2ed   : > { %v2155_v59 = vpack.c.bf16 %v1985_v28, %v1977_v19 }
 0x2f1   : > { %5551 = vmatmul.mubr.msk.bf16.gmra.mrb[68].mxu0 %vm1305_vm3, %v2133_v6  ;;  %v6739_v6 = vld [vmem:[#allocation2 + $0x1d8] sm:$0xff] }
 0x2f2   : > { %3847 = vmatprep.mubr.bf16.mxu0 %v10186_v37  ;;  %v2000_v13 = vrot.slane %v6739_v6, 2 }
 0x2f4   : > { %v2001_v47 = vsel %vm1885_vm5, %v1992_v39, %v2000_v13  ;;  %v2009_v63 = vsel %vm1885_vm5, %v2000_v13, %v2008_v15 }
 0x2f5   : > { %v2177_v24 = vpack.c.bf16 %v2008_v15, %v2009_v63 }
 0x2f9   : > { %5552 = vmatmul.mubr.msk.bf16.gmra.mrb[72].mxu0 %vm1305_vm3, %v2144_v50  ;;  %v2166_v50 = vpack.c.bf16 %v2001_v47, %v1993_v8 }
 0x2fa   : > { %3857 = vmatprep.mubr.bf16.mxu0 %v10186_v37 }
 0x301   : > { %5553 = vmatmul.mubr.msk.bf16.gmra.mrb[76].mxu0 %vm1305_vm3, %v2155_v59 }
 0x302   : > { %3867 = vmatprep.mubr.bf16.mxu0 %v10186_v37 }
 0x309   : > { %5554 = vmatmul.mubr.msk.bf16.gmra.mrb[80].mxu0 %vm1305_vm3, %v2166_v50 }
 0x30a   : > { %3877 = vmatprep.mubr.bf16.mxu0 %v10186_v37 }
 0x311   : > { %5555 = vmatmul.mubr.msk.bf16.gmra.mrb[84].mxu0 %vm1305_vm3, %v2177_v24 }
 0x36c   : > { %v3603_v58 = vpop.f32.mrb[40].mxu0 }
 0x36d   : > { %v5833_v28 = vadd.f32 %v3603_v58, %v8938_v30  ;;  %v3605_v19 = vpop.f32.mrb[41].mxu0 }
 0x36e   : > { %v5836_v59 = vadd.f32 %v3605_v19, %v8947_v18  ;;  %v3607_v6 = vpop.f32.mrb[42].mxu0 }
 0x36f   : > { %v5839_v36 = vadd.f32 %v3607_v6, %v8952_v9  ;;  %v3609_v44 = vpop.f32.mrb[43].mxu0  ;;  %v9330_v39 = vadd.f32 %v5833_v28, %v9122_v2 }
 0x370   : > { %v5842_v47 = vadd.f32 %v3609_v44, %v8954_v42  ;;  %v9334_v13 = vadd.f32 %v5836_v59, %v9130_v49 }
 0x371   : > { %v9337_v5 = vadd.f32 %v5839_v36, %v9135_v0 }
 0x372   : > { %v9340_v30 = vadd.f32 %v5842_v47, %v9137_v35 }
 0x374   : > { %v3613_v8 = vpop.f32.mrb[44].mxu0 }
 0x375   : > { %v5845_v18 = vadd.f32 %v3613_v8, %v8981_v38  ;;  %v3615_v50 = vpop.f32.mrb[45].mxu0 }
 0x376   : > { %v5848_v9 = vadd.f32 %v3615_v50, %v8986_v60  ;;  %v3617_v15 = vpop.f32.mrb[46].mxu0 }
 0x377   : > { %v5851_v2 = vadd.f32 %v3617_v15, %v8991_v52  ;;  %v3619_v63 = vpop.f32.mrb[47].mxu0  ;;  %v9346_v42 = vadd.f32 %v5845_v18, %v9148_v40 }
 0x378   : > { %v5854_v49 = vadd.f32 %v3619_v63, %v8993_v43  ;;  %v9350_v0 = vadd.f32 %v5848_v9, %v9156_v32 }
 0x379   : > { %v9353_v35 = vadd.f32 %v5851_v2, %v9161_v10 }
 0x37a   : > { %v9356_v38 = vadd.f32 %v5854_v49, %v9163_v12 }
 0x37c   : > { %v3623_v24 = vpop.f32.mrb[48].mxu0 }
 0x37d   : > { %v5857_v60 = vadd.f32 %v3623_v24, %v9010_v25  ;;  %v3625_v58 = vpop.f32.mrb[49].mxu0 }
 0x37e   : > { %v5860_v52 = vadd.f32 %v3625_v58, %v9015_v16  ;;  %v3627_v28 = vpop.f32.mrb[50].mxu0 }
 0x37f   : > { %v5863_v40 = vadd.f32 %v3627_v28, %v9020_v55  ;;  %v3629_v19 = vpop.f32.mrb[51].mxu0  ;;  %v9362_v43 = vadd.f32 %v5857_v60, %v9174_v7 }
 0x380   : > { %v5866_v32 = vadd.f32 %v3629_v19, %v9022_v53  ;;  %v9366_v10 = vadd.f32 %v5860_v52, %v9182_v26  ;;  %v10192_v26 = vld [vmem:[#allocation26_spill] sm:$0xff] }
 0x381   : > { %v9369_v12 = vadd.f32 %v5863_v40, %v9187_v61 }
 0x382   : > { %v9372_v25 = vadd.f32 %v5866_v32, %v9189_v57 }
 0x384   : > { %v3633_v59 = vpop.f32.mrb[52].mxu0 }
 0x385   : > { %v5869_v16 = vadd.f32 %v3633_v59, %v9035_v54  ;;  %v3635_v6 = vpop.f32.mrb[53].mxu0 }
 0x386   : > { %v5872_v55 = vadd.f32 %v3635_v6, %v9040_v4  ;;  %v3637_v36 = vpop.f32.mrb[54].mxu0 }
 0x387   : > { %v5875_v7 = vadd.f32 %v3637_v36, %v9042_v62  ;;  %v3639_v44 = vpop.f32.mrb[55].mxu0  ;;  %v9378_v53 = vadd.f32 %v5869_v16, %v9204_v31  ;;  %v10198_v36 = vld [vmem:[#allocation23_spill] sm:$0xff] }
 0x388   : > { %v5878_v47 = vadd.f32 %v3639_v44, %v10192_v26  ;;  %v9382_v61 = vadd.f32 %v5872_v55, %v9209_v21  ;;  %v10199_v26 = vld [vmem:[#allocation24_spill] sm:$0xff] }
 0x389   : > { %v9385_v57 = vadd.f32 %v5875_v7, %v9215_v11 }
 0x38a   : > { %v9388_v54 = vadd.f32 %v5878_v47, %v9217_v33 }
 0x38c   : > { %v3643_v8 = vpop.f32.mrb[56].mxu0 }
 0x38d   : > { %v5881_v4 = vadd.f32 %v3643_v8, %v9057_v45  ;;  %v3645_v18 = vpop.f32.mrb[57].mxu0 }
 0x38e   : > { %v5884_v62 = vadd.f32 %v3645_v18, %v9059_v46  ;;  %v3647_v50 = vpop.f32.mrb[58].mxu0 }
 0x38f   : > { %v5887_v31 = vadd.f32 %v3647_v50, %v9064_v23  ;;  %v3649_v9 = vpop.f32.mrb[59].mxu0  ;;  %v9394_v15 = vadd.f32 %v5881_v4, %v9230_v20  ;;  %v10200_v4 = vld [vmem:[#allocation25_spill] sm:$0xff] }
 0x390   : > { %v5890_v21 = vadd.f32 %v3649_v9, %v9066_v29  ;;  %v9398_v11 = vadd.f32 %v5884_v62, %v9235_v14 }
 0x391   : > { %v9401_v33 = vadd.f32 %v5887_v31, %v9244_v17 }
 0x392   : > { %v9404_v45 = vadd.f32 %v5890_v21, %v9246_v41 }
 0x394   : > { %v3653_v2 = vpop.f32.mrb[60].mxu0 }
 0x395   : > { %v5893_v46 = vadd.f32 %v3653_v2, %v9096_v1  ;;  %v3655_v63 = vpop.f32.mrb[61].mxu0 }
 0x396   : > { %v5896_v23 = vadd.f32 %v3655_v63, %v9104_v22  ;;  %v3657_v49 = vpop.f32.mrb[62].mxu0  ;;  %v10193_v22 = vld [vmem:[#allocation19_spill] sm:$0xff] }
 0x397   : > { %v5899_v20 = vadd.f32 %v3657_v49, %v9109_v3  ;;  %v3659_v24 = vpop.f32.mrb[63].mxu0  ;;  %v9410_v29 = vadd.f32 %v5893_v46, %v9264_v48  ;;  %v10194_v3 = vld [vmem:[#allocation17_spill] sm:$0xff]  ;;  %v10195_v48 = vld [vmem:[#allocation20_spill] sm:$0xff] }
 0x398   : > { %v5902_v14 = vadd.f32 %v3659_v24, %v9111_v34  ;;  %v9414_v17 = vadd.f32 %v5896_v23, %v9269_v51  ;;  %v10196_v34 = vld [vmem:[#allocation21_spill] sm:$0xff] }
 0x399   : > { %v9417_v41 = vadd.f32 %v5899_v20, %v9274_v27  ;;  %v10197_v27 = vld [vmem:[#allocation16_spill] sm:$0xff] }
 0x39a   : > { %v9420_v1 = vadd.f32 %v5902_v14, %v9276_v56 }
 0x3ac   : > { %v3809_v60 = vpop.f32.mrb[32].mxu0 }
 0x3ad   : > { %v5825_v58 = vadd.f32 %v3809_v60, %v10193_v22  ;;  %v3811_v52 = vpop.f32.mrb[33].mxu0 }
 0x3ae   : > { %v5826_v28 = vadd.f32 %v3811_v52, %v10194_v3  ;;  %v3813_v40 = vpop.f32.mrb[34].mxu0 }
 0x3af   : > { %v5827_v19 = vadd.f32 %v3813_v40, %v10195_v48  ;;  %v3815_v32 = vpop.f32.mrb[35].mxu0 }
 0x3b0   : > { %v5828_v59 = vadd.f32 %v3815_v32, %v10196_v34 }
 0x3b1   : > { %v3896_v51 = vpack.c.bf16 %v5827_v19, %v5825_v58 }
 0x3b2   : > { %v3897_v16 = vpack.c.bf16 %v5828_v59, %v5826_v28 }
 0x3b4   : > { %v3819_v6 = vpop.f32.mrb[36].mxu0  ;;  %3963 = vmatprep.subr.bf16.mxu1 %v3897_v16 }
 0x3b5   : > { %v5829_v55 = vadd.f32 %v3819_v6, %v10197_v27  ;;  %v3821_v56 = vpop.f32.mrb[37].mxu0  ;;  %3964 = vmatpush1.bf16.msra.mxu1 %v3896_v51 }
 0x3b6   : > { %v5830_v7 = vadd.f32 %v3821_v56, %v10198_v36  ;;  %v3823_v44 = vpop.f32.mrb[38].mxu0 }
 0x3b7   : > { %v5831_v47 = vadd.f32 %v3823_v44, %v10199_v26  ;;  %v3825_v8 = vpop.f32.mrb[39].mxu0 }
 0x3b8   : > { %v5832_v18 = vadd.f32 %v3825_v8, %v10200_v4 }
 0x3b9   : > { %v3898_v62 = vpack.c.bf16 %v5831_v47, %v5829_v55 }
 0x3ba   : > { %v3899_v50 = vpack.c.bf16 %v5832_v18, %v5830_v7 }
 0x3bc   : > { %v3829_v31 = vpop.f32.mrb[64].mxu0  ;;  %3965 = vmatprep.subr.bf16.mxu1 %v3899_v50 }
 0x3bd   : > { %v5835_v9 = vadd.f32 %v9330_v39, %v3829_v31  ;;  %v3831_v21 = vpop.f32.mrb[65].mxu0  ;;  %3966 = vmatpush1.bf16.msra.mxu1 %v3898_v62 }
 0x3be   : > { %v5838_v2 = vadd.f32 %v9334_v13, %v3831_v21  ;;  %v3833_v46 = vpop.f32.mrb[66].mxu0  ;;  %v6632_v21 = vld [vmem:[%s9968_s6 + $0x40] sm:$0xff]  }
 0x3bf   : > { %v5841_v63 = vadd.f32 %v9337_v5, %v3833_v46  ;;  %v3835_v23 = vpop.f32.mrb[67].mxu0  ;;  %v6634_v46 = vld [vmem:[%s9968_s6 + $0x48] sm:$0xff]  }
 0x3c0   : > { %v5844_v49 = vadd.f32 %v9340_v30, %v3835_v23  ;;  %v6636_v23 = vld [vmem:[%s9968_s6 + $0x50] sm:$0xff]  }
 0x3c1   : > { %v3900_v20 = vpack.c.bf16 %v5841_v63, %v5835_v9  ;;  %v6635_v63 = vld [vmem:[%s9968_s6 + $0x8] sm:$0xff]  }
 0x3c2   : > { %v3901_v24 = vpack.c.bf16 %v5844_v49, %v5838_v2  ;;  %v6633_v2 = vld [vmem:[%s9968_s6] sm:$0xff]   ;;  %v6637_v49 = vld [vmem:[%s9968_s6 + $0x10] sm:$0xff]  }
 0x3c4   : > { %v3839_v14 = vpop.f32.mrb[68].mxu0  ;;  %3967 = vmatprep.subr.bf16.mxu1 %v3901_v24  ;;  %v6639_v24 = vld [vmem:[%s9968_s6 + $0x18] sm:$0xff]  }
 0x3c5   : > { %v5847_v60 = vadd.f32 %v9346_v42, %v3839_v14  ;;  %v3841_v22 = vpop.f32.mrb[69].mxu0  ;;  %3968 = vmatpush1.bf16.msra.mxu1 %v3900_v20  ;;  %v6638_v20 = vld [vmem:[%s9968_s6 + $0x58] sm:$0xff]   ;;  %v6640_v14 = vld [vmem:[%s9968_s6 + $0x60] sm:$0xff]  }
 0x3c6   : > { %v5850_v39 = vadd.f32 %v9350_v0, %v3841_v22  ;;  %v3843_v58 = vpop.f32.mrb[70].mxu0  ;;  %v6642_v22 = vld [vmem:[%s9968_s6 + $0x68] sm:$0xff]  }
 0x3c7   : > { %v5853_v52 = vadd.f32 %v9353_v35, %v3843_v58  ;;  %v3845_v13 = vpop.f32.mrb[71].mxu0  ;;  %v6644_v58 = vld [vmem:[%s9968_s6 + $0x70] sm:$0xff]  }
 0x3c8   : > { %v5856_v3 = vadd.f32 %v9356_v38, %v3845_v13  ;;  %v3912_v13 = vld [vmem:[%s9966_s4] sm:$0x3] }
 0x3c9   : > { %v3902_v5 = vpack.c.bf16 %v5853_v52, %v5847_v60  ;;  %v6641_v60 = vld [vmem:[%s9968_s6 + $0x20] sm:$0xff]   ;;  %v6645_v52 = vld [vmem:[%s9968_s6 + $0x30] sm:$0xff]  }
 0x3ca   : > { %v3903_v28 = vpack.c.bf16 %v5856_v3, %v5850_v39  ;;  %v6643_v39 = vld [vmem:[%s9968_s6 + $0x28] sm:$0xff]   ;;  %v10201_v3 = vld [vmem:[#allocation14_spill] sm:$0xff] }
 0x3cc   : > { %v3849_v40 = vpop.f32.mrb[72].mxu0  ;;  %3969 = vmatprep.subr.bf16.mxu1 %v3903_v28 }
 0x3cd   : > { %v5859_v30 = vadd.f32 %v9362_v43, %v3849_v40  ;;  %v3851_v48 = vpop.f32.mrb[73].mxu0  ;;  %3970 = vmatpush1.bf16.msra.mxu1 %v3902_v5  ;;  %v10202_v5 = vsub.s32 0, %v10201_v3  ;;  %v10203_v40 = vsub.s32 1, %v10201_v3 }
 0x3ce   : > { %v5862_v42 = vadd.f32 %v9366_v10, %v3851_v48  ;;  %v3853_v19 = vpop.f32.mrb[74].mxu0 }
 0x3cf   : > { %v5865_v32 = vadd.f32 %v9369_v12, %v3853_v19  ;;  %v3855_v0 = vpop.f32.mrb[75].mxu0  ;;  %v9518_v28 = vrot.slane %v3912_v13, %v10202_v5 }
 0x3d0   : > { %v5868_v34 = vadd.f32 %v9372_v25, %v3855_v0 }
 0x3d1   : > { %v3904_v35 = vpack.c.bf16 %v5865_v32, %v5859_v30  ;;  %v9522_v30 = vrot.slane %v3912_v13, %v10203_v40 }
 0x3d2   : > { %v3905_v59 = vpack.c.bf16 %v5868_v34, %v5862_v42 }
 0x3d4   : > { %v3859_v51 = vpop.f32.mrb[76].mxu0  ;;  %3971 = vmatprep.subr.bf16.mxu1 %v3905_v59 }
 0x3d5   : > { %v5871_v38 = vadd.f32 %v9378_v53, %v3859_v51  ;;  %v3861_v16 = vpop.f32.mrb[77].mxu0  ;;  %3972 = vmatpush1.bf16.msra.mxu1 %v3904_v35 }
 0x3d6   : > { %v5874_v43 = vadd.f32 %v9382_v61, %v3861_v16  ;;  %v3863_v6 = vpop.f32.mrb[78].mxu0 }
 0x3d7   : > { %v5877_v27 = vadd.f32 %v9385_v57, %v3863_v6  ;;  %v3865_v10 = vpop.f32.mrb[79].mxu0  ;;  %v6647_v6 = vld [vmem:[%s9968_s6 + $0x38] sm:$0xff]  }
 0x3d8   : > { %v5880_v55 = vadd.f32 %v9388_v54, %v3865_v10 }
 0x3d9   : > { %v3906_v12 = vpack.c.bf16 %v5877_v27, %v5871_v38 }
 0x3da   : > { %v3907_v56 = vpack.c.bf16 %v5880_v55, %v5874_v43  ;;  %v6646_v43 = vld [vmem:[%s9968_s6 + $0x78] sm:$0xff]  }
 0x3dc   : > { %v3869_v36 = vpop.f32.mrb[80].mxu0  ;;  %3973 = vmatprep.subr.bf16.mxu1 %v3907_v56 }
 0x3dd   : > { %v5883_v25 = vadd.f32 %v9394_v15, %v3869_v36  ;;  %v3871_v7 = vpop.f32.mrb[81].mxu0  ;;  %3974 = vmatpush1.bf16.msra.mxu1 %v3906_v12 }
 0x3de   : > { %v5886_v53 = vadd.f32 %v9398_v11, %v3871_v7  ;;  %v3873_v44 = vpop.f32.mrb[82].mxu0 }
 0x3df   : > { %v5889_v26 = vadd.f32 %v9401_v33, %v3873_v44  ;;  %v3875_v61 = vpop.f32.mrb[83].mxu0 }
 0x3e0   : > { %v5892_v47 = vadd.f32 %v9404_v45, %v3875_v61 }
 0x3e1   : > { %v3908_v57 = vpack.c.bf16 %v5889_v26, %v5883_v25  ;;  %v6648_v26 = vld [vmem:[%s9968_s6 + $0xc0] sm:$0xff]  }
 0x3e2   : > { %v3909_v8 = vpack.c.bf16 %v5892_v47, %v5886_v53 }
 0x3e4   : > { %v3879_v4 = vpop.f32.mrb[84].mxu0  ;;  %3975 = vmatprep.subr.bf16.mxu1 %v3909_v8 }
 0x3e5   : > { %v5895_v54 = vadd.f32 %v9410_v29, %v3879_v4  ;;  %v3881_v18 = vpop.f32.mrb[85].mxu0  ;;  %3976 = vmatpush1.bf16.msra.mxu1 %v3908_v57  ;;  %v6628_v29 = vld [vmem:[%s9967_s5] sm:$0xff]  }
 0x3e6   : > { %v5898_v15 = vadd.f32 %v9414_v17, %v3881_v18  ;;  %v3883_v62 = vpop.f32.mrb[86].mxu0  ;;  %v6629_v17 = vld [vmem:[%s9967_s5 + $0x8] sm:$0xff]  }
 0x3e7   : > { %v5901_v50 = vadd.f32 %v9417_v41, %v3883_v62  ;;  %v3885_v11 = vpop.f32.mrb[87].mxu0  ;;  %v6630_v41 = vld [vmem:[%s9967_s5 + $0x10] sm:$0xff]  }
 0x3e8   : > { %v5904_v31 = vadd.f32 %v9420_v1, %v3885_v11  ;;  %v6631_v1 = vld [vmem:[%s9967_s5 + $0x18] sm:$0x7f]  }
 0x3e9   : > { %v3910_v33 = vpack.c.bf16 %v5901_v50, %v5895_v54 }
 0x3ea   : > { %v3911_v9 = vpack.c.bf16 %v5904_v31, %v5898_v15 }
 0x3eb   : > { %v3958_v45 = vsel %vm1885_vm5, %v3910_v33, 0 }
 0x3ec   : > { %5560 = vmatprep.subr.msk.bf16.mxu1 %vm1885_vm5, %v3911_v9 }
 0x3ed   : > { %3978 = vmatpush1.bf16.msra.mxu1 %v3958_v45 }
 0x3ee   : > { %5638 = vmatprep.subr.bf16.mxu1 %v6632_v21 }
 0x3f0   : > { %5561 = vmatmul.mubr.msk.bf16.vlgmr.msra.gmra.mrb[88].mxu1 %vm3944_vm7, %v6628_v29 }
 0x3f1   : > { %4005 = vmatprep.mubr.bf16.mxu1 %v10186_v37  ;;  %5639 = vmatpush3.bf16.msra.mxu1 %v6633_v2 }
 0x3f2   : > { %5640 = vmatprep.subr.bf16.mxu1 %v6634_v46 }
 0x3f5   : > { %5641 = vmatpush3.bf16.msra.mxu1 %v6635_v63 }
 0x3f6   : > { %5642 = vmatprep.subr.bf16.mxu1 %v6636_v23 }
 0x3f8   : > { %5562 = vmatmul.mubr.msk.bf16.gmra.mrb[92].mxu1 %vm3944_vm7, %v6629_v17 }
 0x3f9   : > { %4015 = vmatprep.mubr.bf16.mxu1 %v10186_v37  ;;  %5643 = vmatpush3.bf16.msra.mxu1 %v6637_v49 }
 0x3fa   : > { %5644 = vmatprep.subr.bf16.mxu1 %v6638_v20 }
 0x3fd   : > { %5645 = vmatpush3.bf16.msra.mxu1 %v6639_v24 }
 0x3fe   : > { %5646 = vmatprep.subr.bf16.mxu1 %v6640_v14 }
 0x400   : > { %5563 = vmatmul.mubr.msk.bf16.gmra.mrb[96].mxu1 %vm3944_vm7, %v6630_v41 }
 0x401   : > { %4025 = vmatprep.mubr.bf16.mxu1 %v10186_v37  ;;  %5647 = vmatpush3.bf16.msra.mxu1 %v6641_v60 }
 0x402   : > { %5648 = vmatprep.subr.bf16.mxu1 %v6642_v22 }
 0x405   : > { %5649 = vmatpush3.bf16.msra.mxu1 %v6643_v39 }
 0x406   : > { %5650 = vmatprep.subr.bf16.mxu1 %v6644_v58 }
 0x408   : > { %5564 = vmatmul.mubr.msk.bf16.gmra.mrb[100].mxu1 %vm3944_vm7, %v6631_v1 }
 0x409   : > { %5651 = vmatpush3.bf16.msra.mxu1 %v6645_v52 }
 0x40a   : > { %5652 = vmatprep.subr.bf16.mxu1 %v6646_v43 }
 0x40d   : > { %5653 = vmatpush3.bf16.msra.mxu1 %v6647_v6 }
 0x40e   : > { %5678 = vmatprep.subr.bf16.mxu1 %v6648_v26 }
 0x4c3   : > { %v3997_v48 = vpop.f32.mrb[88].mxu1 }
 0x4c4   : > { %v3998_v42 = vadd.f32 %v3997_v48, %v9518_v28  ;;  %v3999_v19 = vpop.f32.mrb[89].mxu1 }
 0x4c5   : > { %v4000_v32 = vadd.f32 %v3999_v19, %v9522_v30  ;;  %v4001_v0 = vpop.f32.mrb[90].mxu1 }
 0x4c6   : > { %v4036_v34 = vmax.f32 %v3998_v42, 0.0  ;;  %v4002_v35 = vadd.f32 %v4001_v0, %v9518_v28  ;;  %v4003_v59 = vpop.f32.mrb[91].mxu1 }
 0x4c7   : > { %v4037_v51 = vmax.f32 %v4000_v32, 0.0  ;;  %v4004_v38 = vadd.f32 %v4003_v59, %v9522_v30 }
 0x4c8   : > { %4052 = vst [vmem:[#allocation3] sm:$0xff] %v4036_v34  ;;  %v4038_v16 = vmax.f32 %v4002_v35, 0.0 }
 0x4c9   : > { %4053 = vst.msk [vmem:[#allocation3 + $0x8] sm:$0xff] %vm1305_vm3, %v4037_v51  ;;  %v4039_v27 = vmax.f32 %v4004_v38, 0.0 }
 0x4ca   : > { %v9535_v10 = vpack.c.bf16 %v4038_v16, %v4036_v34  ;;  %v4109_v18 = vrot.slane %v4038_v16, 1  ;;  %v4199_v11 = vrot.slane %v4038_v16, 2 }
 0x4cb   : > { %4055 = vst.msk [vmem:[#allocation3 + $0x18] sm:$0xff] %vm1305_vm3, %v4039_v27  ;;  %v4007_v55 = vpop.f32.mrb[92].mxu1 }
 0x4cc   : > { %v4008_v12 = vadd.f32 %v4007_v55, %v9518_v28  ;;  %v4009_v56 = vpop.f32.mrb[93].mxu1 }
 0x4cd   : > { %v4010_v36 = vadd.f32 %v4009_v56, %v9522_v30  ;;  %v4011_v25 = vpop.f32.mrb[94].mxu1 }
 0x4ce   : > { %v9540_v7 = vmax.f32 %v4008_v12, 0.0  ;;  %v4012_v53 = vadd.f32 %v4011_v25, %v9518_v28  ;;  %v4013_v44 = vpop.f32.mrb[95].mxu1 }
 0x4cf   : > { %v4041_v61 = vmax.f32 %v4010_v36, 0.0  ;;  %v4014_v47 = vadd.f32 %v4013_v44, %v9522_v30  ;;  %v4084_v57 = vld [vmem:[#allocation3] sm:$0xfe] }
 0x4d0   : > { %v4088_v8 = vld [vmem:[#allocation3] sm:$0xfc]  ;;  %v9547_v4 = vmax.f32 %v4012_v53, 0.0  ;;  %v4108_v54 = vrot.slane %v4084_v57, 1  ;;  %v4114_v15 = vrot.slane %v9540_v7, 1  ;;  %v4204_v1 = vrot.slane %v9540_v7, 2 }
 0x4d1   : > { %4057 = vst.msk [vmem:[#allocation3 + $0x28] sm:$0xff] %vm1305_vm3, %v4041_v61  ;;  %v4043_v62 = vmax.f32 %v4014_v47, 0.0  ;;  %v4198_v50 = vrot.slane %v4088_v8, 2 }
 0x4d2   : > { %v4110_v31 = vsel %vm1512_vm4, %v4108_v54, %v4109_v18  ;;  %v4115_v33 = vsel %vm1512_vm4, %v4109_v18, %v4114_v15  ;;  %v4118_v9 = vrot.slane %v9547_v4, 1  ;;  %v4257_v45 = vpack.c.bf16 %v9547_v4, %v9540_v7  ;;  %v9604_v53 = vld [vmem:[#allocation3 + $0x18] sm:$0xff] }
 0x4d3   : > { %4059 = vst.msk [vmem:[#allocation3 + $0x38] sm:$0xff] %vm1305_vm3, %v4043_v62  ;;  %v4017_v29 = vpop.f32.mrb[96].mxu1  ;;  %v6272_v17 = vpack.i.bf16 %v4115_v33, %v4110_v31  ;;  %v9558_v41 = vsel %vm1885_vm5, %v4198_v50, %v4199_v11  ;;  %v4208_v63 = vrot.slane %v9547_v4, 2  ;;  %v9567_v20 = vsel %vm1885_vm5, %v4199_v11, %v4204_v1 }
 0x4d4   : > { %v4018_v21 = vadd.f32 %v4017_v29, %v9518_v28  ;;  %v4019_v2 = vpop.f32.mrb[97].mxu1  ;;  %v4119_v46 = vsel %vm1512_vm4, %v4114_v15, %v4118_v9  ;;  %v4255_v22 = vpack.c.bf16 %v9567_v20, %v9558_v41  ;;  %v6666_v41 = vld [vmem:[%s9968_s6 + $0x110] sm:$0xff]  }
 0x4d5   : > { %v4020_v23 = vadd.f32 %v4019_v2, %v9522_v30  ;;  %v4021_v49 = vpop.f32.mrb[98].mxu1  ;;  %6273 = vrot.lane.b32.xlu0 %v6272_v17, %s6807_s29  ;;  %v9575_v39 = vsel %vm1885_vm5, %v4204_v1, %v4208_v63 }
 0x4d6   : > { %v9569_v24 = vmax.f32 %v4018_v21, 0.0  ;;  %v4022_v14 = vadd.f32 %v4021_v49, %v9518_v28  ;;  %v4023_v60 = vpop.f32.mrb[99].mxu1 }
 0x4d7   : > { %v4045_v58 = vmax.f32 %v4020_v23, 0.0  ;;  %v4024_v52 = vadd.f32 %v4023_v60, %v9522_v30 }
 0x4d8   : > { %v9578_v13 = vmax.f32 %v4022_v14, 0.0  ;;  %v4122_v3 = vrot.slane %v9569_v24, 1  ;;  %v4212_v5 = vrot.slane %v9569_v24, 2  ;;  %v9597_v6 = vld [vmem:[#allocation3 + $0x28] sm:$0xff] }
 0x4d9   : > { %4061 = vst.msk [vmem:[#allocation3 + $0x48] sm:$0xff] %vm1305_vm3, %v4045_v58  ;;  %v4047_v40 = vmax.f32 %v4024_v52, 0.0  ;;  %v4116_v47 = vrot.slane %v9597_v6, 1 }
 0x4da   : > { %v4123_v48 = vsel %vm1512_vm4, %v4118_v9, %v4122_v3  ;;  %v4126_v42 = vrot.slane %v9578_v13, 1  ;;  %v4262_v19 = vpack.c.bf16 %v9578_v13, %v9569_v24  ;;  %v9588_v32 = vsel %vm1885_vm5, %v4208_v63, %v4212_v5  ;;  %v9634_v2 = vld [vmem:[#allocation3 + $0x38] sm:$0xff] }
 0x4db   : > { %4063 = vst.msk [vmem:[#allocation3 + $0x58] sm:$0xff] %vm1305_vm3, %v4047_v40  ;;  %v4027_v0 = vpop.f32.mrb[100].mxu1  ;;  %v6277_v34 = vpack.i.bf16 %v4123_v48, %v4119_v46  ;;  %v4260_v38 = vpack.c.bf16 %v9588_v32, %v9575_v39  ;;  %v4216_v27 = vrot.slane %v9578_v13, 2  ;;  %v4120_v52 = vrot.slane %v9634_v2, 1  ;;  %v6661_v13 = vld [vmem:[%s9968_s6 + $0xb0] sm:$0xff]   ;;  %v6667_v39 = vld [vmem:[%s9968_s6 + $0x118] sm:$0xff]  }
 0x4dc   : > { %v4028_v35 = vadd.f32 %v4027_v0, %v9518_v28  ;;  %v4029_v59 = vpop.f32.mrb[101].mxu1  ;;  %v4127_v51 = vsel %vm1512_vm4, %v4122_v3, %v4126_v42 }
 0x4dd   : > { %v4030_v16 = vadd.f32 %v4029_v59, %v9522_v30  ;;  %v4031_v43 = vpop.f32.mrb[102].mxu1  ;;  %6278 = vrot.lane.b32.xlu1 %v6277_v34, %s6807_s29  ;;  %v9607_v44 = vsel %vm1885_vm5, %v4212_v5, %v4216_v27 }
 0x4de   : > { %v9600_v55 = vmax.f32 %v4028_v35, 0.0  ;;  %v4032_v12 = vadd.f32 %v4031_v43, %v9518_v28  ;;  %v4033_v56 = vpop.f32.mrb[103].mxu1  ;;  %v4085_v28 = vld [vmem:[#allocation3 + $0x8] sm:$0xfe] }
 0x4df   : > { %v4049_v36 = vmax.f32 %v4030_v16, 0.0  ;;  %v4034_v25 = vadd.f32 %v4033_v56, %v9522_v30  ;;  %v4112_v30 = vrot.slane %v9604_v53, 1  ;;  %v4111_v50 = vrot.slane %v4085_v28, 1  ;;  %v4069_v43 = vld [vmem:[#allocation3 + $0x8] sm:$0xff]  ;;  %v6652_v28 = vld [vmem:[%s9968_s6 + $0xd0] sm:$0xff]  }
 0x4e0   : > { %v4050_v26 = vmax.f32 %v4032_v12, 0.0  ;;  %v4130_v61 = vrot.slane %v9600_v55, 1  ;;  %v4220_v57 = vrot.slane %v9600_v55, 2  ;;  %v9628_v9 = vld [vmem:[#allocation3 + $0x48] sm:$0xff] }
 0x4e1   : > { %4065 = vst.msk [vmem:[#allocation3 + $0x68] sm:$0xff] %vm1305_vm3, %v4049_v36  ;;  %v4051_v8 = vmax.f32 %v4034_v25, 0.0  ;;  %v4117_v11 = vsel %vm1512_vm4, %v4112_v30, %v4116_v47  ;;  %v4113_v33 = vsel %vm1512_vm4, %v4111_v50, %v4112_v30  ;;  %v4124_v46 = vrot.slane %v9628_v9, 1  ;;  %v6649_v36 = vld [vmem:[%s9968_s6 + $0x80] sm:$0xff]   ;;  %v6650_v25 = vld [vmem:[%s9968_s6 + $0xc8] sm:$0xff]   ;;  %v6654_v50 = vld [vmem:[%s9968_s6 + $0xd8] sm:$0xff]  }
 0x4e2   : > { %4066 = vst [vmem:[#allocation3 + $0x70] sm:$0x3f] %v4050_v26  ;;  %v4131_v54 = vsel %vm1512_vm4, %v4126_v42, %v4130_v61  ;;  %v9618_v18 = vsel %vm1885_vm5, %v4216_v27, %v4220_v57  ;;  %v9624_v31 = vld [vmem:[#allocation3 + $0x58] sm:$0xff]  ;;  %v6292_v29 = vpack.i.bf16 %v4117_v11, %v4113_v33  ;;  %v4121_v42 = vsel %vm1512_vm4, %v4116_v47, %v4120_v52 }
 0x4e3   : > { %4067 = vst.msk [vmem:[#allocation3 + $0x78] sm:$0x3f] %vm1366_vm6, %v4051_v8  ;;  %v6282_v15 = vpack.i.bf16 %v4131_v54, %v4127_v51  ;;  %v4265_v62 = vpack.c.bf16 %v9618_v18, %v9607_v44  ;;  %v4128_v17 = vrot.slane %v9624_v31, 1  ;;  %v4125_v40 = vsel %vm1512_vm4, %v4120_v52, %v4124_v46  ;;  %v6655_v33 = vld [vmem:[%s9968_s6 + $0x98] sm:$0xff]  }
 0x4e4   : > { %v6297_v0 = vpack.i.bf16 %v4125_v40, %v4121_v42  ;;  %v6662_v40 = vld [vmem:[%s9968_s6 + $0xf8] sm:$0xff]  }
 0x4e5   : > { %6283 = vrot.lane.b32.xlu0 %v6282_v15, %s6807_s29  ;;  %v4129_v49 = vsel %vm1512_vm4, %v4124_v46, %v4128_v17  ;;  %v6653_v15 = vld [vmem:[%s9968_s6 + $0x90] sm:$0xff]   ;;  %v6657_v46 = vld [vmem:[%s9968_s6 + $0xa0] sm:$0xff]  }
 0x4e8   : > { %v9631_v1 = vld [vmem:[#allocation3 + $0x68] sm:$0xff] }
 0x4e9   : > { %v4086_v21 = vld [vmem:[#allocation3 + $0x70] sm:$0x1f]  ;;  %6293 = vrot.lane.b32.xlu0 %v6292_v29, %s6807_s29  ;;  %v4132_v63 = vrot.slane %v9631_v1, 1 }
 0x4ea   : > { %v4134_v23 = vrot.slane %v4086_v21, 1  ;;  %v4087_v60 = vld [vmem:[#allocation3 + $0x78] sm:$0x1f]  ;;  %v6656_v21 = vld [vmem:[%s9968_s6 + $0xe0] sm:$0xff]   ;;  %v4082_v24 = vld [vmem:[#allocation3 + $0x70] sm:$0xf] }
 0x4eb   : > { %v4133_v14 = vsel %vm1512_vm4, %v4128_v17, %v4132_v63  ;;  %v4136_v48 = vrot.slane %v4087_v60, 1  ;;  %v4083_v52 = vld [vmem:[#allocation3 + $0x78] sm:$0xf]  ;;  %v4267_v42 = vpack.c.bf16 %v4082_v24, %v9600_v55 }
 0x4ec   : > { %v4135_v58 = vsel %vm1512_vm4, %v4130_v61, %v4134_v23  ;;  %v6302_v3 = vpack.i.bf16 %v4133_v14, %v4129_v49  ;;  %v6651_v61 = vld [vmem:[%s9968_s6 + $0x88] sm:$0xff]   ;;  %v6660_v49 = vld [vmem:[%s9968_s6 + $0xf0] sm:$0xff]  }
 0x4ed   : > { %v6287_v5 = vpack.i.bf16 %v4134_v23, %v4135_v58  ;;  %v4137_v34 = vsel %vm1512_vm4, %v4132_v63, %v4136_v48  ;;  %v6658_v63 = vld [vmem:[%s9968_s6 + $0xe8] sm:$0xff]  }
 0x4ee   : > { %6303 = vrot.lane.b32.xlu0 %v6302_v3, %s6807_s29  ;;  %v6307_v35 = vpack.i.bf16 %v4136_v48, %v4137_v34  ;;  %v6659_v23 = vld [vmem:[%s9968_s6 + $0xa8] sm:$0xff]  }
 0x4ef   : > { %6288 = vrot.lane.b32.xlu1 %v6287_v5, %s6807_s29 }
 0x4f3   : > { %6298 = vrot.lane.b32.xlu1 %v6297_v0, %s6807_s29 }
 0x4f7   : > { %6308 = vrot.lane.b32.xlu1 %v6307_v35, %s6807_s29  ;;  %v6663_v35 = vld [vmem:[%s9968_s6 + $0xb8] sm:$0xff]   ;;  %s6812_s29 = smov [#allocation5]  }
 0x4f8   : > { %s6745_s26 = sshll.u32 %s6812_s29, 4  ;;  %s6746_s26 = int_to_ptr.vmem [resolvable:$false] %s6745_s26 }
 0x4f9   : > { %s6747_s24 = scalar_lea.vmem %s6746_s26, 256  ;;  %p6748_p0 = scmp.lt.s32.totalorder %s9922_s23, %s6746_s26 }
 0x4fa   : > { %p6749_p1 = scmp.lt.s32.totalorder %s6747_s24, %s6741_s25 }
 0x4fc   : > { %p6750_p2 = por %p6749_p1, %p6748_p0 }
 0x4fe   : > { %p6751_p3 = pnand %p6750_p2, %p6744_p13 }
 0x547   : > { %v9649_v59 = vpop.permute.xlu0 %6273 }
 0x548   : > { %v6276_v51 = vunpack.i.h.bf16 %v9649_v59  ;;  %v6275_v16 = vunpack.i.l.bf16 %v9649_v59 }
 0x54a   : > { %v4244_v27 = vsel %vm1305_vm3, %v4069_v43, %v6275_v16  ;;  %v4245_v12 = vsel %vm1305_vm3, %v9604_v53, %v6276_v51  ;;  %v6664_v43 = vld [vmem:[%s9968_s6 + $0x100] sm:$0xff]  }
 0x54b   : > { %v4253_v56 = vpack.c.bf16 %v4245_v12, %v4244_v27 }
 0x54d   : > { %4604 = vmatprep.mubr.bf16.mxu1 %v4253_v56 }
 0x54e   : > { %4605 = vmatmul.mubr.bf16.vlgmr.msra.gmra.mrb[104].mxu1 %v9535_v10 }
 0x54f   : > { %v9667_v26 = vpop.permute.xlu1 %6278  ;;  %5679 = vmatpush3.bf16.msra.mxu1 %v6649_v36 }
 0x550   : > { %v6281_v47 = vunpack.i.h.bf16 %v9667_v26  ;;  %v6280_v8 = vunpack.i.l.bf16 %v9667_v26  ;;  %5680 = vmatprep.subr.bf16.mxu1 %v6650_v25  ;;  %v6665_v25 = vld [vmem:[%s9968_s6 + $0x108] sm:$0xff]  }
 0x552   : > { %v4246_v10 = vsel %vm1305_vm3, %v9597_v6, %v6280_v8  ;;  %v4247_v54 = vsel %vm1305_vm3, %v9634_v2, %v6281_v47 }
 0x553   : > { %5681 = vmatpush3.bf16.msra.mxu1 %v6651_v61  ;;  %v4258_v30 = vpack.c.bf16 %v4247_v54, %v4246_v10 }
 0x554   : > { %5682 = vmatprep.subr.bf16.mxu1 %v6652_v28 }
 0x555   : > { %4612 = vmatprep.mubr.bf16.mxu1 %v4258_v30 }
 0x556   : > { %4613 = vmatmul.mubr.bf16.gmra.mrb[108].mxu1 %v4257_v45 }
 0x557   : > { %v9694_v11 = vpop.permute.xlu0 %6283  ;;  %5683 = vmatpush3.bf16.msra.mxu1 %v6653_v15 }
 0x558   : > { %v6286_v29 = vunpack.i.h.bf16 %v9694_v11  ;;  %v6285_v17 = vunpack.i.l.bf16 %v9694_v11  ;;  %5684 = vmatprep.subr.bf16.mxu1 %v6654_v50  ;;  %v4089_v50 = vld [vmem:[#allocation3 + $0x8] sm:$0xfc] }
 0x55a   : > { %v4248_v7 = vsel %vm1305_vm3, %v9628_v9, %v6285_v17  ;;  %v4249_v4 = vsel %vm1305_vm3, %v9624_v31, %v6286_v29 }
 0x55b   : > { %5685 = vmatpush3.bf16.msra.mxu1 %v6655_v33  ;;  %v4263_v45 = vpack.c.bf16 %v4249_v4, %v4248_v7  ;;  %v4202_v33 = vrot.slane %v9604_v53, 2  ;;  %v4222_v53 = vrot.slane %v9631_v1, 2  ;;  %v4210_v4 = vrot.slane %v9634_v2, 2 }
 0x55c   : > { %5686 = vmatprep.subr.bf16.mxu1 %v6656_v21 }
 0x55d   : > { %4620 = vmatprep.mubr.bf16.mxu1 %v4263_v45  ;;  %v4218_v45 = vrot.slane %v9624_v31, 2  ;;  %v6668_v31 = vld [vmem:[%s9970_s8] sm:$0xff]  }
 0x55e   : > { %4621 = vmatmul.mubr.bf16.gmra.mrb[112].mxu1 %v4262_v19  ;;  %v6294_v19 = vpop.permute.xlu0 %6293 }
 0x55f   : > { %5687 = vmatpush3.bf16.msra.mxu1 %v6657_v46  ;;  %v6296_v0 = vunpack.i.h.bf16 %v6294_v19  ;;  %v6295_v34 = vunpack.i.l.bf16 %v6294_v19 }
 0x560   : > { %5688 = vmatprep.subr.bf16.mxu1 %v6658_v63  ;;  %v4223_v63 = vsel %vm1885_vm5, %v4218_v45, %v4222_v53 }
 0x561   : > { %v9727_v14 = vpop.permute.xlu1 %6288  ;;  %v4170_v27 = vsel %vm1305_vm3, %v6275_v16, %v6295_v34  ;;  %v4171_v12 = vsel %vm1305_vm3, %v6276_v51, %v6296_v0  ;;  %v4090_v51 = vld [vmem:[#allocation3 + $0x70] sm:$0x3f] }
 0x562   : > { %v6291_v60 = vunpack.i.h.bf16 %v9727_v14  ;;  %v6290_v58 = vunpack.i.l.bf16 %v9727_v14  ;;  %v4254_v36 = vpack.c.bf16 %v4171_v12, %v4170_v27  ;;  %v6304_v59 = vpop.permute.xlu0 %6303  ;;  %v4224_v10 = vrot.slane %v4090_v51, 2 }
 0x563   : > { %5689 = vmatpush3.bf16.msra.mxu1 %v6659_v23  ;;  %v6306_v32 = vunpack.i.h.bf16 %v6304_v59  ;;  %v4091_v23 = vld [vmem:[#allocation3 + $0x78] sm:$0x3f] }
 0x564   : > { %v4250_v3 = vsel %vm1305_vm3, %v9631_v1, %v6290_v58  ;;  %v4251_v5 = vsel %vm1305_vm3, %v4083_v52, %v6291_v60  ;;  %5690 = vmatprep.subr.bf16.mxu1 %v6660_v49  ;;  %v4225_v54 = vsel %vm1885_vm5, %v4220_v57, %v4224_v10  ;;  %v4201_v57 = vrot.slane %v4089_v50, 2 }
 0x565   : > { %v4268_v48 = vpack.c.bf16 %v4251_v5, %v4250_v3  ;;  %v6299_v56 = vpop.permute.xlu1 %6298  ;;  %v4270_v18 = vpack.c.bf16 %v4224_v10, %v4225_v54 }
 0x566   : > { %v6301_v61 = vunpack.i.h.bf16 %v6299_v56  ;;  %v6300_v28 = vunpack.i.l.bf16 %v6299_v56  ;;  %v4203_v21 = vsel %vm1885_vm5, %v4201_v57, %v4202_v33 }
 0x567   : > { %4628 = vmatprep.mubr.bf16.mxu1 %v4268_v48  ;;  %5691 = vmatpush3.bf16.msra.mxu1 %v6661_v13 }
 0x568   : > { %4629 = vmatmul.mubr.bf16.gmra.mrb[116].mxu1 %v4267_v42  ;;  %5692 = vmatprep.subr.bf16.mxu1 %v6662_v40  ;;  %v4172_v20 = vsel %vm1305_vm3, %v6280_v8, %v6300_v28 }
 0x569   : > { %4669 = vmatprep.mubr.bf16.mxu1 %v4255_v22  ;;  %v4173_v22 = vsel %vm1305_vm3, %v6281_v47, %v6301_v61  ;;  %v4175_v47 = vsel %vm1305_vm3, %v6286_v29, %v6306_v32  ;;  %v6309_v8 = vpop.permute.xlu1 %6308 }
 0x56a   : > { %v4259_v16 = vpack.c.bf16 %v4173_v22, %v4172_v20  ;;  %v6311_v15 = vunpack.i.h.bf16 %v6309_v8  ;;  %v6310_v44 = vunpack.i.l.bf16 %v6309_v8 }
 0x56b   : > { %5693 = vmatpush3.bf16.msra.mxu1 %v6663_v35 }
 0x56c   : > { %5741 = vmatprep.subr.bf16.mxu1 %v6664_v43  ;;  %v4176_v11 = vsel %vm1305_vm3, %v6290_v58, %v6310_v44  ;;  %v4177_v55 = vsel %vm1305_vm3, %v6291_v60, %v6311_v15  ;;  %v4226_v58 = vrot.slane %v4091_v23, 2 }
 0x56e   : > { %v4227_v1 = vsel %vm1885_vm5, %v4222_v53, %v4226_v58 }
 0x56f   : > { %v4271_v2 = vpack.c.bf16 %v4226_v58, %v4227_v1 }
 0x570   : > { %4670 = vmatmul.mubr.bf16.vlgmr.msra.gmra.mrb[120].mxu1 %v4254_v36 }
 0x571   : > { %4677 = vmatprep.mubr.bf16.mxu1 %v4260_v38  ;;  %5742 = vmatpush3.bf16.msra.mxu1 %v6664_v43  ;;  %v6305_v38 = vunpack.i.l.bf16 %v6304_v59 }
 0x572   : > { %5743 = vmatprep.subr.bf16.mxu1 %v6665_v25 }
 0x573   : > { %v4174_v26 = vsel %vm1305_vm3, %v6285_v17, %v6305_v38  ;;  %v4269_v17 = vpack.c.bf16 %v4177_v55, %v4176_v11 }
 0x574   : > { %v4264_v30 = vpack.c.bf16 %v4175_v47, %v4174_v26 }
 0x575   : > { %5744 = vmatpush3.bf16.msra.mxu1 %v6665_v25 }
 0x576   : > { %5745 = vmatprep.subr.bf16.mxu1 %v6666_v41 }
 0x578   : > { %4678 = vmatmul.mubr.bf16.gmra.mrb[124].mxu1 %v4259_v16 }
 0x579   : > { %4685 = vmatprep.mubr.bf16.mxu1 %v4265_v62  ;;  %5746 = vmatpush3.bf16.msra.mxu1 %v6666_v41  ;;  %v4206_v62 = vrot.slane %v9597_v6, 2  ;;  %v4214_v6 = vrot.slane %v9628_v9, 2 }
 0x57a   : > { %5747 = vmatprep.subr.bf16.mxu1 %v6667_v39 }
 0x57b   : > { %v4207_v29 = vsel %vm1885_vm5, %v4202_v33, %v4206_v62  ;;  %v4215_v46 = vsel %vm1885_vm5, %v4210_v4, %v4214_v6  ;;  %v4211_v49 = vsel %vm1885_vm5, %v4206_v62, %v4210_v4  ;;  %v4219_v9 = vsel %vm1885_vm5, %v4214_v6, %v4218_v45 }
 0x57c   : > { %v4256_v7 = vpack.c.bf16 %v4207_v29, %v4203_v21  ;;  %v4261_v14 = vpack.c.bf16 %v4215_v46, %v4211_v49  ;;  %v4266_v60 = vpack.c.bf16 %v4223_v63, %v4219_v9 }
 0x57d   : > { %5748 = vmatpush3.bf16.msra.mxu1 %v6667_v39 }
 0x580   : > { %4686 = vmatmul.mubr.bf16.gmra.mrb[128].mxu1 %v4264_v30 }
 0x581   : > { %4693 = vmatprep.mubr.bf16.mxu1 %v4270_v18 }
 0x588   : > { %4694 = vmatmul.mubr.bf16.gmra.mrb[132].mxu1 %v4269_v17 }
 0x589   : > { %5749 = vmatprep.mubr.msk.bf16.mxu1 %vm1305_vm3, %v4256_v7 }
 0x590   : > { %5750 = vmatmul.mubr.msk.bf16.vlgmr.msra.gmra.mrb[136].mxu1 %vm1305_vm3, %v4261_v14 }
 0x591   : > { %5753 = vmatprep.mubr.msk.bf16.mxu1 %vm1305_vm3, %v4266_v60 }
 0x598   : > { %5754 = vmatmul.mubr.msk.bf16.gmra.mrb[140].mxu1 %vm1305_vm3, %v4271_v2 }
 0x599   : > { %5765 = vmatprep.mubr.msk.bf16.mxu1 %vm4792_vm8, %v6668_v31 }
 0x621   : > { %v5654_v52 = vpop.f32.mrb[104].mxu1 }
 0x622   : > { %v5655_v24 = vpop.f32.mrb[105].mxu1 }
 0x623   : > { %v5656_v13 = vadd.f32 %v5655_v24, %v5654_v52  ;;  %v5657_v19 = vpop.f32.mrb[106].mxu1 }
 0x624   : > { %v5658_v3 = vpop.f32.mrb[107].mxu1 }
 0x625   : > { %v5659_v5 = vadd.f32 %v5658_v3, %v5657_v19 }
 0x629   : > { %v5660_v40 = vpop.f32.mrb[108].mxu1 }
 0x62a   : > { %v5661_v48 = vpop.f32.mrb[109].mxu1 }
 0x62b   : > { %v5662_v42 = vadd.f32 %v5661_v48, %v5660_v40  ;;  %v5663_v0 = vpop.f32.mrb[110].mxu1 }
 0x62c   : > { %v5664_v34 = vpop.f32.mrb[111].mxu1 }
 0x62d   : > { %v5665_v35 = vadd.f32 %v5664_v34, %v5663_v0 }
 0x631   : > { %v5666_v43 = vpop.f32.mrb[112].mxu1 }
 0x632   : > { %v5667_v27 = vpop.f32.mrb[113].mxu1 }
 0x633   : > { %v5668_v12 = vadd.f32 %v5667_v27, %v5666_v43  ;;  %v5669_v56 = vpop.f32.mrb[114].mxu1 }
 0x634   : > { %v5670_v36 = vpop.f32.mrb[115].mxu1 }
 0x635   : > { %v5671_v25 = vadd.f32 %v5670_v36, %v5669_v56  ;;  %v6670_v56 = vld [vmem:[%s9971_s9] sm:$0xff]   ;;  %v6671_v36 = vld [vmem:[%s9971_s9 + $0x8] sm:$0xff]  }
 0x636   : > { %4995 = vmatpush1.bf16.msra.mxu0 %v6670_v56  ;;  %v5043_v56 = vld [vmem:[%s9973_s11] sm:$0xf] }
 0x637   : > { %4996 = vmatprep.subr.bf16.mxu0 %v10186_v37 }
 0x63a   : > { %4997 = vmatpush1.bf16.msra.mxu0 %v6671_v36  ;;  %v6682_v36 = vld [vmem:[%s9974_s12] sm:$0xff]  }
 0x63b   : > { %v5672_v61 = vpop.f32.mrb[116].mxu1  ;;  %4998 = vmatprep.subr.bf16.mxu0 %v10186_v37 }
 0x63c   : > { %v5673_v28 = vpop.f32.mrb[117].mxu1 }
 0x63d   : > { %v5674_v41 = vadd.f32 %v5673_v28, %v5672_v61  ;;  %v5675_v20 = vpop.f32.mrb[118].mxu1  ;;  %v6673_v61 = vld [vmem:[%s9971_s9 + $0x18] sm:$0xff]   ;;  %v6674_v28 = vld [vmem:[%s9971_s9 + $0x20] sm:$0xff]  }
 0x63e   : > { %v5676_v22 = vpop.f32.mrb[119].mxu1 }
 0x63f   : > { %v5677_v59 = vadd.f32 %v5676_v22, %v5675_v20  ;;  %v6676_v20 = vld [vmem:[%s9971_s9 + $0x30] sm:$0xff]   ;;  %v6677_v22 = vld [vmem:[%s9971_s9 + $0x38] sm:$0xff]  }
 0x643   : > { %v5694_v51 = vpop.f32.mrb[120].mxu1 }
 0x644   : > { %v5695_v16 = vpop.f32.mrb[121].mxu1 }
 0x645   : > { %v5696_v39 = vadd.f32 %v5695_v16, %v5694_v51  ;;  %v5697_v32 = vpop.f32.mrb[122].mxu1  ;;  %v6679_v51 = vld [vmem:[%s9971_s9 + $0x48] sm:$0xff]   ;;  %v6680_v16 = vld [vmem:[%s9971_s9 + $0x50] sm:$0xff]  }
 0x646   : > { %v5698_v38 = vpop.f32.mrb[123].mxu1 }
 0x647   : > { %v5699_v10 = vadd.f32 %v5698_v38, %v5697_v32  ;;  %v4672_v26 = vadd.f32 %v5696_v39, %v5656_v13  ;;  %v5605_v39 = vld [vmem:[%s9969_s7] ss:$0 sm:$0xff] }
 0x649   : > { %v4675_v47 = vadd.f32 %v5699_v10, %v5659_v5 }
 0x64b   : > { %v5700_v8 = vpop.f32.mrb[124].mxu1 }
 0x64c   : > { %v5701_v54 = vpop.f32.mrb[125].mxu1 }
 0x64d   : > { %v5702_v30 = vadd.f32 %v5701_v54, %v5700_v8  ;;  %v5703_v15 = vpop.f32.mrb[126].mxu1 }
 0x64e   : > { %v5704_v44 = vpop.f32.mrb[127].mxu1 }
 0x64f   : > { %v5705_v18 = vadd.f32 %v5704_v44, %v5703_v15  ;;  %v4680_v62 = vadd.f32 %v5702_v30, %v5662_v42 }
 0x651   : > { %v4683_v50 = vadd.f32 %v5705_v18, %v5665_v35 }
 0x653   : > { %v5706_v33 = vpop.f32.mrb[128].mxu1 }
 0x654   : > { %v5707_v11 = vpop.f32.mrb[129].mxu1 }
 0x655   : > { %v5708_v55 = vadd.f32 %v5707_v11, %v5706_v33  ;;  %v5709_v57 = vpop.f32.mrb[130].mxu1 }
 0x656   : > { %v5710_v29 = vpop.f32.mrb[131].mxu1 }
 0x657   : > { %v5711_v17 = vadd.f32 %v5710_v29, %v5709_v57  ;;  %v4688_v21 = vadd.f32 %v5708_v55, %v5668_v12  ;;  %v6669_v12 = vld [vmem:[%s9970_s8 + $0x8] sm:$0x7f]  }
 0x659   : > { %v4691_v6 = vadd.f32 %v5711_v17, %v5671_v25  ;;  %v6672_v25 = vld [vmem:[%s9971_s9 + $0x10] sm:$0xff]  }
 0x65a   : > { %4999 = vmatpush1.bf16.msra.mxu0 %v6672_v25  ;;  %v6683_v25 = vld [vmem:[%s9974_s12 + $0x8] sm:$0xff]  }
 0x65b   : > { %v5712_v7 = vpop.f32.mrb[132].mxu1  ;;  %5000 = vmatprep.subr.bf16.mxu0 %v10186_v37 }
 0x65c   : > { %v5713_v53 = vpop.f32.mrb[133].mxu1 }
 0x65d   : > { %v5714_v4 = vadd.f32 %v5713_v53, %v5712_v7  ;;  %v5715_v45 = vpop.f32.mrb[134].mxu1 }
 0x65e   : > { %v5716_v46 = vpop.f32.mrb[135].mxu1  ;;  %5001 = vmatpush1.bf16.msra.mxu0 %v6673_v61  ;;  %v5624_v61 = vld [vmem:[%s9972_s10] ss:$0 sm:$0xff] }
 0x65f   : > { %v5717_v63 = vadd.f32 %v5716_v46, %v5715_v45  ;;  %v4696_v23 = vadd.f32 %v5714_v4, %v5674_v41  ;;  %5002 = vmatprep.subr.bf16.mxu0 %v10186_v37  ;;  %v6675_v41 = vld [vmem:[%s9971_s9 + $0x28] sm:$0xff]  }
 0x661   : > { %v4699_v49 = vadd.f32 %v5717_v63, %v5677_v59  ;;  %v6678_v59 = vld [vmem:[%s9971_s9 + $0x40] sm:$0xff]  }
 0x662   : > { %5003 = vmatpush1.bf16.msra.mxu0 %v6674_v28 }
 0x663   : > { %v5751_v14 = vpop.f32.mrb[136].mxu1  ;;  %5004 = vmatprep.subr.bf16.mxu0 %v10186_v37 }
 0x664   : > { %v4745_v9 = vadd.f32 %v5751_v14, %v4680_v62  ;;  %v4736_v60 = vpop.f32.mrb[137].mxu1  ;;  %v6681_v62 = vld [vmem:[%s9971_s9 + $0x58] sm:$0xff]  }
 0x665   : > { %v4737_v58 = vadd.f32 %v4736_v60, %v4672_v26  ;;  %v5752_v1 = vpop.f32.mrb[138].mxu1 }
 0x666   : > { %v4748_v2 = vadd.f32 %v5752_v1, %v4683_v50  ;;  %v4739_v31 = vpop.f32.mrb[139].mxu1  ;;  %5005 = vmatpush1.bf16.msra.mxu0 %v6675_v41 }
 0x667   : > { %v4740_v52 = vadd.f32 %v4739_v31, %v4675_v47  ;;  %5006 = vmatprep.subr.bf16.mxu0 %v10186_v37 }
 0x668   : > { %v4772_v24 = vpack.c.bf16 %v4748_v2, %v4745_v9 }
 0x669   : > { %v4771_v13 = vpack.c.bf16 %v4740_v52, %v4737_v58  ;;  %v6809_v52 = vmov 0.0  }
 0x66a   : > { %5007 = vmatpush1.bf16.msra.mxu0 %v6676_v20 }
 0x66b   : > { %v5755_v19 = vpop.f32.mrb[140].mxu1  ;;  %5757 = vmatprep.subr.bf16.mxu1 %v4771_v13  ;;  %5008 = vmatprep.subr.bf16.mxu0 %v10186_v37 }
 0x66c   : > { %v4761_v3 = vadd.f32 %v5755_v19, %v4696_v23  ;;  %v4752_v5 = vpop.f32.mrb[141].mxu1  ;;  %5758 = vmatpush3.bf16.msra.mxu1 %v4771_v13 }
 0x66d   : > { %v4753_v40 = vadd.f32 %v4752_v5, %v4688_v21  ;;  %v5756_v48 = vpop.f32.mrb[142].mxu1  ;;  %5759 = vmatprep.subr.bf16.mxu1 %v4772_v24 }
 0x66e   : > { %v4764_v42 = vadd.f32 %v5756_v48, %v4699_v49  ;;  %v4755_v0 = vpop.f32.mrb[143].mxu1  ;;  %5009 = vmatpush1.bf16.msra.mxu0 %v6677_v22 }
 0x66f   : > { %v4756_v34 = vadd.f32 %v4755_v0, %v4691_v6  ;;  %5010 = vmatprep.subr.bf16.mxu0 %v10186_v37 }
 0x670   : > { %v4774_v35 = vpack.c.bf16 %v4764_v42, %v4761_v3  ;;  %5760 = vmatpush3.bf16.msra.mxu1 %v4772_v24 }
 0x671   : > { %v4773_v43 = vpack.c.bf16 %v4756_v34, %v4753_v40  ;;  %v6811_v40 = vmov 65535  }
 0x672   : > { %v4800_v27 = vsel %vm1885_vm5, %v4774_v35, 0  ;;  %5011 = vmatpush1.bf16.msra.mxu0 %v6678_v59  ;;  %v5057_v48 = vsel %vm1885_vm5, 4294967295, %v6811_v40 }
 0x673   : > { %5761 = vmatprep.subr.bf16.mxu1 %v4773_v43  ;;  %5012 = vmatprep.subr.bf16.mxu0 %v10186_v37 }
 0x674   : > { %5762 = vmatpush3.bf16.msra.mxu1 %v4773_v43 }
 0x675   : > { %5985 = vmatprep.subr.msk.bf16.mxu1 %vm1885_vm5, %v4774_v35  ;;  %v5058_v35 = vsel %vm1512_vm4, %v5057_v48, 0 }
 0x676   : > { %5013 = vmatpush1.bf16.msra.mxu0 %v6679_v51 }
 0x677   : > { %5014 = vmatprep.subr.bf16.mxu0 %v10186_v37 }
 0x678   : > { %5764 = vmatpush3.bf16.msra.mxu1 %v4800_v27 }
 0x679   : > { %5769 = vmatprep.subr.bf16.mxu1 %v6809_v52 }
 0x67a   : > { %5015 = vmatpush1.bf16.msra.mxu0 %v6680_v16 }
 0x67b   : > { %5766 = vmatmul.mubr.msk.bf16.vlgmr.msra.gmra.mrb[144].mxu1 %vm4792_vm8, %v6669_v12  ;;  %5016 = vmatprep.subr.bf16.mxu0 %v10186_v37 }
 0x67c   : > { %5773 = vmatprep.mubr.msk.bf16.mxu1 %vm6810_vm10, %v6809_v52 }
 0x67e   : > { %5017 = vmatpush1.bf16.msra.mxu0 %v6681_v62 }
 0x74e   : > { %v5767_v32 = vpop.f32.mrb[144].mxu1 }
 0x74f   : > { %v4845_v38 = vadd.f32 %v5767_v32, %v5605_v39  ;;  %v4836_v10 = vpop.f32.mrb[145].mxu1 }
 0x750   : > { %v4837_v26 = vadd.f32 %v5605_v39, %v4836_v10  ;;  %v5768_v47 = vpop.f32.mrb[146].mxu1 }
 0x751   : > { %v4853_v8 = vmax.f32 %v4845_v38, 0.0  ;;  %v4848_v54 = vadd.f32 %v5768_v47, %v5605_v39  ;;  %v4839_v30 = vpop.f32.mrb[147].mxu1  ;;  %v6685_v47 = vld [vmem:[%s9976_s14 + $0x8] sm:$0xff]  }
 0x752   : > { %v4851_v15 = vmax.f32 %v4837_v26, 0.0  ;;  %v4840_v44 = vadd.f32 %v5605_v39, %v4839_v30  ;;  %v6684_v26 = vld [vmem:[%s9976_s14] sm:$0xff]  }
 0x753   : > { %4857 = vst.msk [vmem:[#allocation4 + $0x10] sm:$0xff] %vm716_vm1, %v4853_v8  ;;  %v4854_v18 = vmax.f32 %v4848_v54, 0.0  ;;  %v5626_v8 = vld [vmem:[%s9975_s13] ss:$0 sm:$0xff] }
 0x754   : > { %4855 = vst.msk [vmem:[#allocation4] sm:$0xff] %vm716_vm1, %v4851_v15  ;;  %v4852_v37 = vmax.f32 %v4840_v44, 0.0 }
 0x755   : > { %4859 = vst.msk [vmem:[#allocation4 + $0x18] sm:$0x3f] %vm4858_vm9, %v4854_v18 }
 0x756   : > { %4856 = vst.msk [vmem:[#allocation4 + $0x8] sm:$0xff] %vm716_vm1, %v4852_v37 }
 0x75a   : > { %v4862_v60 = vld [vmem:[#allocation4 + $0x10] sm:$0xff] }
 0x75b   : > { %v4860_v46 = vld [vmem:[#allocation4] sm:$0xff] }
 0x75c   : > { %v4866_v50 = vld [vmem:[#allocation4 + $0x11] sm:$0xff]  ;;  %v4867_v33 = vld [vmem:[#allocation4 + $0x19] sm:$0x1f] }
 0x75d   : > { %v6317_v11 = vpack.i.bf16 %v4867_v33, %v4866_v50  ;;  %v4864_v55 = vld [vmem:[#allocation4 + $0x1] sm:$0xff]  ;;  %v4865_v57 = vld [vmem:[#allocation4 + $0x9] sm:$0xff]  ;;  %v4863_v58 = vld [vmem:[#allocation4 + $0x18] sm:$0x1f] }
 0x75e   : > { %v6312_v29 = vpack.i.bf16 %v4865_v57, %v4864_v55  ;;  %v4861_v45 = vld [vmem:[#allocation4 + $0x8] sm:$0xff]  ;;  %v5630_v57 = vld [vmem:[%s9977_s15] ss:$0 sm:$0xff] }
 0x75f   : > { %6318 = vrot.lane.b32.xlu1 %v6317_v11, %s10042_s19 }
 0x760   : > { %6313 = vrot.lane.b32.xlu0 %v6312_v29, %s10042_s19  ;;  %s5249_s19 = scalar_lea.sflag [#allocation6], %s513_s18 }
 0x7d1   : > { %v6319_v17 = vpop.permute.xlu1 %6318 }
 0x7d2   : > { %v6314_v21 = vpop.permute.xlu0 %6313  ;;  %v6321_v6 = vunpack.i.h.bf16 %v6319_v17  ;;  %v6320_v7 = vunpack.i.l.bf16 %v6319_v17 }
 0x7d3   : > { %v6316_v53 = vunpack.i.h.bf16 %v6314_v21  ;;  %v6315_v4 = vunpack.i.l.bf16 %v6314_v21 }
 0x7d4   : > { %v4891_v9 = vpack.c.bf16 %v6321_v6, %v6320_v7  ;;  %v4886_v1 = vsel %vm716_vm1, %v4862_v60, %v6320_v7  ;;  %v4887_v2 = vsel %vm716_vm1, %v4863_v58, %v6321_v6 }
 0x7d5   : > { %v4885_v63 = vsel %vm716_vm1, %v4861_v45, %v6316_v53  ;;  %v4884_v23 = vsel %vm716_vm1, %v4860_v46, %v6315_v4  ;;  %v4889_v49 = vpack.c.bf16 %v6316_v53, %v6315_v4  ;;  %v4890_v31 = vpack.c.bf16 %v4887_v2, %v4886_v1 }
 0x7d6   : > { %v4888_v14 = vpack.c.bf16 %v4885_v63, %v4884_v23 }
 0x7d7   : > { %5622 = vmatprep.mubr.msk.bf16.mxu0 %vm1305_vm3, %v4889_v49 }
 0x7d8   : > { %5027 = vmatmul.mubr.bf16.vlgmr.msra.gmra.mrb[88].mxu0 %v4888_v14 }
 0x7d9   : > { %5623 = vmatprep.mubr.msk.bf16.mxu0 %vm1305_vm3, %v4891_v9 }
 0x7e0   : > { %5035 = vmatmul.mubr.bf16.gmra.mrb[92].mxu0 %v4890_v31 }
 0x8ab   : > { %v5028_v24 = vpop.f32.mrb[88].mxu0 }
 0x8ac   : > { %v5030_v13 = vpop.f32.mrb[89].mxu0 }
 0x8ad   : > { %v5031_v19 = vpop.f32.mrb[90].mxu0 }
 0x8ae   : > { %v5044_v3 = vpack.c.bf16 %v5031_v19, %v5028_v24  ;;  %v5033_v5 = vpop.f32.mrb[91].mxu0 }
 0x8b0   : > { %5770 = vmatpush3.bf16.msra.mxu1 %v5044_v3 }
 0x8b1   : > { %5771 = vmatprep.subr.bf16.mxu1 %v6809_v52 }
 0x8b3   : > { %v5036_v42 = vpop.f32.mrb[92].mxu0 }
 0x8b4   : > { %v5038_v0 = vpop.f32.mrb[93].mxu0 }
 0x8b5   : > { %v5039_v34 = vpop.f32.mrb[94].mxu0 }
 0x8b6   : > { %v5045_v43 = vpack.c.bf16 %v5039_v34, %v5036_v42  ;;  %v5041_v27 = vpop.f32.mrb[95].mxu0 }
 0x8b8   : > { %v5060_v12 = vand.u32 %v5058_v35, %v5045_v43 }
 0x8ba   : > { %5772 = vmatpush3.bf16.msra.mxu1 %v5060_v12 }
 0x8bb   : > { %5777 = vmatprep.subr.bf16.mxu1 %v6809_v52 }
 0x8bd   : > { %5774 = vmatmul.mubr.msk.bf16.vlgmr.msra.gmra.mrb[148].mxu1 %vm5053_vm11, %v5043_v56 }
 0x8be   : > { %5781 = vmatprep.mubr.msk.bf16.mxu1 %vm6810_vm10, %v6809_v52  ;;  %5778 = vmatpush3.bf16.msra.mxu1 %v6682_v36 }
 0x8bf   : > { %5779 = vmatprep.subr.bf16.mxu1 %v6809_v52 }
 0x8c2   : > { %5780 = vmatpush3.bf16.msra.mxu1 %v6683_v25 }
 0x8c3   : > { %5785 = vmatprep.subr.bf16.mxu1 %v6809_v52 }
 0x990   : > { %v5096_v28 = vpop.f32.mrb[148].mxu1 }
 0x991   : > { %v5097_v41 = vadd.f32 %v5624_v61, %v5096_v28  ;;  %v5775_v20 = vpop.f32.mrb[149].mxu1 }
 0x992   : > { %v5099_v22 = vpop.f32.mrb[150].mxu1 }
 0x993   : > { %v5102_v59 = vadd.f32 3.0, %v5097_v41  ;;  %v5776_v51 = vpop.f32.mrb[151].mxu1 }
 0x995   : > { %v5103_v16 = vmax.f32 %v5102_v59, 0.0 }
 0x997   : > { %v5104_v39 = vmin.f32 %v5103_v16, 6.0 }
 0x999   : > { %v5105_v32 = vmul.f32 %v5104_v39, %v5097_v41 }
 0x99b   : > { %v5106_v38 = vmul.f32 0.16666667, %v5105_v32 }
 0x99d   : > { %v5107_v10 = vpack.c.bf16 %v5106_v38, %v5106_v38 }
 0x99f   : > { %5782 = vmatmul.mubr.msk.bf16.vlgmr.msra.gmra.mrb[152].mxu1 %vm5131_vm12, %v5107_v10 }
 0x9a0   : > { %5789 = vmatprep.mubr.msk.bf16.mxu1 %vm6810_vm10, %v6809_v52  ;;  %5786 = vmatpush3.bf16.msra.mxu1 %v6684_v26 }
 0x9a1   : > { %5787 = vmatprep.subr.bf16.mxu1 %v6809_v52 }
 0x9a4   : > { %5788 = vmatpush3.bf16.msra.mxu1 %v6685_v47 }
 0xa72   : > { %v5169_v54 = vpop.f32.mrb[152].mxu1 }
 0xa73   : > { %v5170_v30 = vadd.f32 %v5626_v8, %v5169_v54  ;;  %v5783_v15 = vpop.f32.mrb[153].mxu1 }
 0xa74   : > { %v5172_v44 = vpop.f32.mrb[154].mxu1 }
 0xa75   : > { %v5175_v18 = vadd.f32 3.0, %v5170_v30  ;;  %v5784_v37 = vpop.f32.mrb[155].mxu1 }
 0xa77   : > { %v5176_v62 = vmax.f32 %v5175_v18, 0.0 }
 0xa79   : > { %v5177_v50 = vmin.f32 %v5176_v62, 6.0 }
 0xa7b   : > { %v5178_v33 = vmul.f32 %v5177_v50, %v5170_v30 }
 0xa7d   : > { %v5179_v11 = vmul.f32 0.16666667, %v5178_v33 }
 0xa7f   : > { %v5180_v55 = vpack.c.bf16 %v5179_v11, %v5179_v11 }
 0xa81   : > { %5790 = vmatmul.mubr.msk.bf16.vlgmr.msra.gmra.mrb[156].mxu1 %vm5131_vm12, %v5180_v55 }
 0xb54   : > { %v5241_v29 = vpop.f32.mrb[156].mxu1 }
 0xb55   : > { %v5242_v17 = vadd.f32 %v5630_v57, %v5241_v29  ;;  %v5791_v21 = vpop.f32.mrb[157].mxu1 }
 0xb56   : > { %v5244_v6 = vpop.f32.mrb[158].mxu1 }
 0xb57   : > { %5247 = vst [vmem:[%s515_s30] sm:$0xff] %v5242_v17  ;;  %v5792_v7 = vpop.f32.mrb[159].mxu1 }
 0xb58   : > { %6754 = shalt.err (!%p6751_p3)
}
 0xb59   : > { %s6755_s18 = scalar_lea.hbm %s9920_s21, 128  ;;  %s6759_s30 = scalar_lea.hbm %s9978_s16, 256 }
 0xb5a   : > { %p6756_p4 = scmp.ne.s32.totalorder %s9920_s21, %s6755_s18  ;;  %p6760_p9 = scmp.lt.u32.totalorder %s9920_s21, %s9978_s16 }
 0xb5b   : > { %p6761_p10 = scmp.lt.u32.totalorder %s6759_s30, %s6755_s18  ;;  %p6763_p12 = scmp.lt.u32.totalorder %s6755_s18, %s9920_s21 }
 0xb5c   : > { %p6757_p7 = pnand %p6756_p4, %p6936_p5 }
 0xb5d   : > { %p6762_p11 = por %p6761_p10, %p6760_p9 }
 0xb5e   : > { %p6758_p8 = pneg %p6757_p7 }
 0xb5f   : > { %p6764_p13 = por %p6763_p12, %p6762_p11 }
 0xb61   : > { %p6765_p0 = pnand %p6764_p13, %p6758_p8 }
 0xb63   : > { %6768 = shalt.err (!%p6765_p0)
}
 0xb64   : > { %5986 = dma.vmem_to_hbm [thread:$0]  (%p6936_p5), %s9922_s23, 128, %s9920_s21, %s5249_s19  }
 0xb65 PF: > { %s10204_s25 = sld [smem:[#allocation10_spill]]  ;;  %s10205_s29 = sld [smem:[#allocation8_spill]] }
 0xb6b   : > { %p5992_p1 = scmp.ge.s32.totalorder %s10204_s25, 2  ;;  %s5274_s24 = sand.u32 1, %s10205_s29  }
 0xb6c   : > { %s5275_s20 = scalar_lea.sflag [#allocation6], %s5274_s24 }
 0xb6d   : > { %p5989_p2 = pnand %p5992_p1, %p6940_p6 }
 0xb6f   : > { %6786 = dma.done.wait (!%p5989_p2), %s5275_s20, 128  }
 0xb70   : > { %6788 = vsyncadd (!%p5989_p2), %s5275_s20, 4294967168  ;;  %s10207_s24 = sld [smem:[#allocation11_spill]]  ;;  %s10208_s18 = sld [smem:[#allocation9_spill]] }
 0xb71   : > { %s10209_s23 = sld [smem:[#allocation12_spill]]  ;;  %s10210_s21 = smov %s6795_s22 }
 0xb76   : > { %p26_p3 = scmp.ge.s32.totalorder %s10207_s24, 4   ;;  %s10211_s22 = smov %s10208_s18 }
 0xb78   :  { %28 = sbr.rel (!%p26_p3) target bundleno = 5 (0x5), region = 119 }
 0xb7f   :  { %5280 = vsyncpa [#allocation6], 1 }
 0xb80   :  { %5282 = vsyncpa [#allocation6 + $0x1], 1 }

</bundles_post_ra>
